<compile_context>
chip_gen: v7x
topology: tpu7x:2x2x1
jax: 0.10.0
libtpu: 0.0.40
codegen_flags: <defaults>
</compile_context>

<pallas_src>
import functools

import jax
import jax.numpy as jnp
from jax.experimental import pallas as pl
from jax.experimental.pallas import tpu as pltpu

LANES = 128      # lane width / padded output-channel width
POOL = 3         # MaxPool2d(kernel_size=3, stride=3)
CONV_K = 5       # Conv2d kernel size
RF = CONV_K + POOL - 1   # 7: receptive field of conv5+pool3 per pooled output
TM = 128         # fixed row tile (review: small tile, cdiv grid, many steps)


def _pick_groups_per_dot():
    """128-lane tap groups per MXU dot: 2 on 256-wide MXUs (v6e/v7x), 1 on
    128-wide MXUs (<= v5) to keep acc+part inside the vreg file."""
    try:
        kind = jax.devices()[0].device_kind.lower()
    except Exception:
        return 2
    return 1 if any(t in kind for t in ("v2", "v3", "v4", "v5")) else 2


_GROUPS_PER_DOT = _pick_groups_per_dot()


# ---------------------------------------------------------------------------
# Pallas kernels
# ---------------------------------------------------------------------------
def _conv_pool_relu_kernel(x_ref, w_ref, b_ref, o_ref, *, n_groups, groups_per_dot):
    """Fused Conv2d(5x5) + MaxPool2d(3) + ReLU.

    x_ref: (tm, K)        bf16  7x7 receptive-field patches (stride-3 windows)
    w_ref: (K, 9*128)     bf16  group g=a*3+b holds conv weights shifted by (a,b)
    b_ref: (1, 128)       f32   conv bias, zero-padded to 128 lanes
    o_ref: (tm, 128)      bf16  relu(max_g conv_g + bias)
    """
    x = x_ref[...]
    acc = None
    g = 0
    while g < n_groups:
        gw = min(groups_per_dot, n_groups - g)
        part = jnp.dot(x, w_ref[:, g * LANES:(g + gw) * LANES],
                       preferred_element_type=jnp.float32)
        for h in range(gw):                       # lane-aligned 128-wide slices
            piece = part[:, h * LANES:(h + 1) * LANES]
            acc = piece if acc is None else jnp.maximum(acc, piece)
        g += gw
    o_ref[...] = jnp.maximum(acc + b_ref[...], 0.0).astype(o_ref.dtype)


def _matmul_bias_kernel(x_ref, w_ref, b_ref, o_ref):
    # x: (tm, K) bf16, w: (K, 128) bf16, b: (1, 128) f32 -> o: (tm, 128) f32
    o_ref[...] = (
        jnp.dot(x_ref[...], w_ref[...], preferred_element_type=jnp.float32)
        + b_ref[...]
    ).astype(o_ref.dtype)


# ---------------------------------------------------------------------------
# pallas_call wrappers
# ---------------------------------------------------------------------------
def conv_pool_relu(lhs, w_rhs, bias):
    m, k = lhs.shape
    n_groups = w_rhs.shape[1] // LANES
    tm = m if m <= TM else TM                     # ragged last block handled by Pallas
    kernel = functools.partial(_conv_pool_relu_kernel, n_groups=n_groups,
                               groups_per_dot=_GROUPS_PER_DOT)
    return pl.pallas_call(
        kernel,
        out_shape=jax.ShapeDtypeStruct((m, LANES), jnp.bfloat16),
        grid=(pl.cdiv(m, tm),),
        in_specs=[
            pl.BlockSpec((tm, k), lambda i: (i, 0)),
            pl.BlockSpec((k, n_groups * LANES), lambda i: (0, 0)),
            pl.BlockSpec((1, LANES), lambda i: (0, 0)),
        ],
        out_specs=pl.BlockSpec((tm, LANES), lambda i: (i, 0)),
        compiler_params=pltpu.CompilerParams(dimension_semantics=("parallel",)),
    )(lhs, w_rhs, bias)


def matmul_bias(x, w, b):
    m, k = x.shape
    _, n = w.shape
    tm = m if m <= TM else TM
    return pl.pallas_call(
        _matmul_bias_kernel,
        out_shape=jax.ShapeDtypeStruct((m, n), jnp.float32),
        grid=(pl.cdiv(m, tm),),
        in_specs=[
            pl.BlockSpec((tm, k), lambda i: (i, 0)),
            pl.BlockSpec((k, n), lambda i: (0, 0)),
            pl.BlockSpec((1, n), lambda i: (0, 0)),
        ],
        out_specs=pl.BlockSpec((tm, n), lambda i: (i, 0)),
        compiler_params=pltpu.CompilerParams(dimension_semantics=("parallel",)),
    )(x, w, b)


# ---------------------------------------------------------------------------
# Glue: build the 7x7 receptive-field LHS (compact, input-sized data only)
# ---------------------------------------------------------------------------
def _round_up(x, mult):
    return ((x + mult - 1) // mult) * mult


def _stage_lhs(x_nhwc, hp, wp, k_pad):
    """Rows = pooled output positions (b, p, q); features in (u, v, c) order,
    where u, v in [0, 7) index the 7x7 receptive field at input (3p+u, 3q+v)."""
    n, h, w, c = x_nhwc.shape
    taps = [x_nhwc[:, u:u + 3 * hp - 2:3, v:v + 3 * wp - 2:3, :]
            for u in range(RF) for v in range(RF)]
    p = jnp.stack(taps, axis=3)                      # (n, hp, wp, 49, c)
    lhs = p.reshape(n * hp * wp, RF * RF * c)
    k = lhs.shape[1]
    if k < k_pad:
        lhs = jnp.pad(lhs, ((0, 0), (0, k_pad - k)))
    return lhs.astype(jnp.bfloat16)


# ---------------------------------------------------------------------------
# One-time parameter preparation (hoisted out of the forward hot path)
# ---------------------------------------------------------------------------
def _build_stage_weights(conv_w, conv_b):
    """Torch Conv2d weight (O, C, 5, 5) -> fused conv+pool RHS (K, 9*128)."""
    o_ch, c_in, kh, kw = conv_w.shape
    k_real = RF * RF * c_in                          # (u, v, c) over 7x7 field
    k_pad = _round_up(k_real, LANES)
    wk = jnp.transpose(conv_w, (2, 3, 1, 0)).astype(jnp.float32)   # (di, dj, c, o)
    # t[u, v, c, a, b, o] = W[o, c, u-a, v-b] if 0 <= u-a,v-b < 5 else 0
    t = jnp.zeros((RF, RF, c_in, POOL, POOL, o_ch), jnp.float32)
    for a in range(POOL):
        for b in range(POOL):
            t = t.at[a:a + kh, b:b + kw, :, a, b, :].set(wk)
    rhs = t.reshape(k_real, POOL * POOL, o_ch)
    rhs = jnp.pad(rhs, ((0, k_pad - k_real), (0, 0), (0, LANES - o_ch)))
    rhs = rhs.reshape(k_pad, POOL * POOL * LANES).astype(jnp.bfloat16)
    bias = jnp.pad(conv_b.astype(jnp.float32), (0, LANES - o_ch)).reshape(1, LANES)
    return {"w": rhs, "b": bias, "k_pad": k_pad, "c_out": o_ch}


def prepare_params(params, hp2=5, wp2=5):
    stage1 = _build_stage_weights(params["conv1_w"], params["conv1_b"])
    stage2 = _build_stage_weights(params["conv2_w"], params["conv2_b"])
    c2 = stage2["c_out"]
    # Fold fc1/fc2 (no activation between layer8 and layer9 in the reference):
    #   out = x @ (W1^T W2^T) + (b1 @ W2^T + b2)
    w1t = params["fc1_w"].T.astype(jnp.float32)      # (500, 100)
    w2t = params["fc2_w"].T.astype(jnp.float32)      # (100, 15)
    wf = w1t @ w2t                                   # (500, 15), f32
    bf = params["fc1_b"].astype(jnp.float32) @ w2t + params["fc2_b"].astype(jnp.float32)
    n_out = wf.shape[1]
    # Fold the torch (c, h, w) flatten order + channel lane-padding into the
    # weight so the stage-2 output (n*hp2*wp2, 128) feeds this matmul with a
    # plain contiguous reshape (no transpose / pad in the forward path).
    wf = wf.reshape(c2, hp2, wp2, n_out).transpose(1, 2, 0, 3)      # (h, w, c, o)
    wf = jnp.pad(wf, ((0, 0), (0, 0), (0, LANES - c2), (0, LANES - n_out)))
    wf = wf.reshape(hp2 * wp2 * LANES, LANES).astype(jnp.bfloat16)
    bias = jnp.pad(bf, (0, LANES - n_out)).reshape(1, LANES)
    return {"stage1": stage1, "stage2": stage2,
            "fc": {"w": wf, "b": bias, "n_out": n_out}}


def init_params(key):
    ks = jax.random.split(key, 8)

    def uni(k, shape, fan_in):
        bound = 1.0 / jnp.sqrt(fan_in)
        return jax.random.uniform(k, shape, jnp.float32, -bound, bound)

    return {
        "conv1_w": uni(ks[0], (10, 1, 5, 5), 1 * 5 * 5),
        "conv1_b": uni(ks[1], (10,), 1 * 5 * 5),
        "conv2_w": uni(ks[2], (20, 10, 5, 5), 10 * 5 * 5),
        "conv2_b": uni(ks[3], (20,), 10 * 5 * 5),
        "fc1_w": uni(ks[4], (100, 500), 500),   # torch Linear layout: (out, in)
        "fc1_b": uni(ks[5], (100,), 500),
        "fc2_w": uni(ks[6], (15, 100), 100),
        "fc2_b": uni(ks[7], (15,), 100),
    }


# ---------------------------------------------------------------------------
# SimpleNet forward
# ---------------------------------------------------------------------------
def simple_net_forward(prep, x_nchw):
    n = x_nchw.shape[0]
    x = jnp.transpose(x_nchw, (0, 2, 3, 1)).astype(jnp.bfloat16)   # NHWC bf16

    # layer1-3: Conv2d(1,10,5) + MaxPool2d(3) + ReLU   (N,64,64,1) -> (N,20,20,10)
    s1 = prep["stage1"]
    hp1 = (x.shape[1] - (CONV_K - 1)) // POOL
    wp1 = (x.shape[2] - (CONV_K - 1)) // POOL
    lhs1 = _stage_lhs(x, hp1, wp1, s1["k_pad"])
    y1 = conv_pool_relu(lhs1, s1["w"], s1["b"])                    # (N*400, 128)
    y1 = y1[:, :s1["c_out"]].reshape(n, hp1, wp1, s1["c_out"])

    # layer4-6: Conv2d(10,20,5) + MaxPool2d(3) + ReLU  -> (N,5,5,20)
    s2 = prep["stage2"]
    hp2 = (hp1 - (CONV_K - 1)) // POOL
    wp2 = (wp1 - (CONV_K - 1)) // POOL
    lhs2 = _stage_lhs(y1, hp2, wp2, s2["k_pad"])
    y2 = conv_pool_relu(lhs2, s2["w"], s2["b"])                    # (N*25, 128)

    # layer7-9: Flatten + Linear(500,100) + Linear(100,15), folded into one
    # matmul; the NCHW-flatten permutation and lane padding live in the
    # precomputed weight, so only a contiguous reshape sits between kernels.
    fc = prep["fc"]
    feat = y2.reshape(n, hp2 * wp2 * LANES)                        # (N, 3200)
    logits = matmul_bias(feat, fc["w"], fc["b"])                   # (N, 128) f32
    # TODO(synk): nn.CrossEntropyLoss(reduction='mean') is defined in __init__
    # but never used in forward(); not implemented here.
    return logits[:, :fc["n_out"]]                                  # (N, 15)


if __name__ == "__main__":
    key = jax.random.PRNGKey(0)
    pkey, xkey = jax.random.split(key)
    params = init_params(pkey)
    prep = prepare_params(params)

    # (N, C, H, W) = (2, 1, 64, 64): two conv(5)+pool(3) stages -> (N, 20, 5, 5),
    # Flatten -> 500, matching Linear(500, 100).
    x = jax.random.normal(xkey, (2, 1, 64, 64), dtype=jnp.float32)

    fwd = jax.jit(lambda inp: simple_net_forward(prep, inp))
    y = jax.block_until_ready(fwd(x))
    assert y.shape == (2, 15), y.shape
    assert bool(jnp.all(jnp.isfinite(y)))
    print("KERNEL_OK")
</pallas_src>

<mosaic_0001>
module attributes {stable_mosaic.version = 11 : i64} {
  func.func @_conv_pool_relu_kernel(%arg0: i32, %arg1: memref<128x128xbf16, #tpu.memory_space<vmem>>, %arg2: memref<128x1152xbf16, #tpu.memory_space<vmem>>, %arg3: memref<1x128xf32, #tpu.memory_space<vmem>>, %arg4: memref<128x128xbf16, #tpu.memory_space<vmem>>) attributes {dimension_semantics = [#tpu.dimension_semantics<parallel>], iteration_bounds = array<i64: 7>, scalar_prefetch = 0 : i64, scratch_operands = 0 : i64, tpu.core_type = #tpu.core_type<tc>, window_params = [{transform_indices = @transform_0, window_bounds = array<i64: 128, 128>}, {pipeline_mode = #tpu.pipeline_mode<synchronous>, transform_indices = @transform_1, window_bounds = array<i64: 128, 1152>}, {pipeline_mode = #tpu.pipeline_mode<synchronous>, transform_indices = @transform_2, window_bounds = array<i64: 1, 128>}, {transform_indices = @transform_3, window_bounds = array<i64: 128, 128>}]} {
    %c0 = arith.constant 0 : index
    %c0_0 = arith.constant 0 : index
    %0 = vector.load %arg1[%c0, %c0_0] : memref<128x128xbf16, #tpu.memory_space<vmem>>, vector<128x128xbf16>
    %c0_1 = arith.constant 0 : index
    %c0_2 = arith.constant 0 : index
    %1 = vector.load %arg2[%c0_1, %c0_2] : memref<128x1152xbf16, #tpu.memory_space<vmem>>, vector<128x256xbf16>
    %cst = arith.constant dense<0.000000e+00> : vector<128x256xf32>
    %2 = tpu.matmul %0, %1, %cst {dimension_numbers = #tpu.dot_dimension_numbers<[1], [0], [0], [1], [0, 0, 1, 1], [], []>} : vector<128x128xbf16>, vector<128x256xbf16>, vector<128x256xf32> -> vector<128x256xf32>
    %3 = vector.extract_strided_slice %2 {offsets = [0, 0], sizes = [128, 128], strides = [1, 1]} : vector<128x256xf32> to vector<128x128xf32>
    %4 = vector.extract_strided_slice %2 {offsets = [0, 128], sizes = [128, 128], strides = [1, 1]} : vector<128x256xf32> to vector<128x128xf32>
    %5 = arith.maximumf %3, %4 : vector<128x128xf32>
    %c0_3 = arith.constant 0 : index
    %c256 = arith.constant 256 : index
    %6 = vector.load %arg2[%c0_3, %c256] : memref<128x1152xbf16, #tpu.memory_space<vmem>>, vector<128x256xbf16>
    %cst_4 = arith.constant dense<0.000000e+00> : vector<128x256xf32>
    %7 = tpu.matmul %0, %6, %cst_4 {dimension_numbers = #tpu.dot_dimension_numbers<[1], [0], [0], [1], [0, 0, 1, 1], [], []>} : vector<128x128xbf16>, vector<128x256xbf16>, vector<128x256xf32> -> vector<128x256xf32>
    %8 = vector.extract_strided_slice %7 {offsets = [0, 0], sizes = [128, 128], strides = [1, 1]} : vector<128x256xf32> to vector<128x128xf32>
    %9 = arith.maximumf %5, %8 : vector<128x128xf32>
    %10 = vector.extract_strided_slice %7 {offsets = [0, 128], sizes = [128, 128], strides = [1, 1]} : vector<128x256xf32> to vector<128x128xf32>
    %11 = arith.maximumf %9, %10 : vector<128x128xf32>
    %c0_5 = arith.constant 0 : index
    %c512 = arith.constant 512 : index
    %12 = vector.load %arg2[%c0_5, %c512] : memref<128x1152xbf16, #tpu.memory_space<vmem>>, vector<128x256xbf16>
    %cst_6 = arith.constant dense<0.000000e+00> : vector<128x256xf32>
    %13 = tpu.matmul %0, %12, %cst_6 {dimension_numbers = #tpu.dot_dimension_numbers<[1], [0], [0], [1], [0, 0, 1, 1], [], []>} : vector<128x128xbf16>, vector<128x256xbf16>, vector<128x256xf32> -> vector<128x256xf32>
    %14 = vector.extract_strided_slice %13 {offsets = [0, 0], sizes = [128, 128], strides = [1, 1]} : vector<128x256xf32> to vector<128x128xf32>
    %15 = arith.maximumf %11, %14 : vector<128x128xf32>
    %16 = vector.extract_strided_slice %13 {offsets = [0, 128], sizes = [128, 128], strides = [1, 1]} : vector<128x256xf32> to vector<128x128xf32>
    %17 = arith.maximumf %15, %16 : vector<128x128xf32>
    %c0_7 = arith.constant 0 : index
    %c768 = arith.constant 768 : index
    %18 = vector.load %arg2[%c0_7, %c768] : memref<128x1152xbf16, #tpu.memory_space<vmem>>, vector<128x256xbf16>
    %cst_8 = arith.constant dense<0.000000e+00> : vector<128x256xf32>
    %19 = tpu.matmul %0, %18, %cst_8 {dimension_numbers = #tpu.dot_dimension_numbers<[1], [0], [0], [1], [0, 0, 1, 1], [], []>} : vector<128x128xbf16>, vector<128x256xbf16>, vector<128x256xf32> -> vector<128x256xf32>
    %20 = vector.extract_strided_slice %19 {offsets = [0, 0], sizes = [128, 128], strides = [1, 1]} : vector<128x256xf32> to vector<128x128xf32>
    %21 = arith.maximumf %17, %20 : vector<128x128xf32>
    %22 = vector.extract_strided_slice %19 {offsets = [0, 128], sizes = [128, 128], strides = [1, 1]} : vector<128x256xf32> to vector<128x128xf32>
    %23 = arith.maximumf %21, %22 : vector<128x128xf32>
    %c0_9 = arith.constant 0 : index
    %c1024 = arith.constant 1024 : index
    %24 = vector.load %arg2[%c0_9, %c1024] : memref<128x1152xbf16, #tpu.memory_space<vmem>>, vector<128x128xbf16>
    %cst_10 = arith.constant dense<0.000000e+00> : vector<128x128xf32>
    %25 = tpu.matmul %0, %24, %cst_10 {dimension_numbers = #tpu.dot_dimension_numbers<[1], [0], [0], [1], [0, 0, 1, 1], [], []>} : vector<128x128xbf16>, vector<128x128xbf16>, vector<128x128xf32> -> vector<128x128xf32>
    %26 = arith.maximumf %23, %25 : vector<128x128xf32>
    %c0_11 = arith.constant 0 : index
    %c0_12 = arith.constant 0 : index
    %27 = vector.load %arg3[%c0_11, %c0_12] : memref<1x128xf32, #tpu.memory_space<vmem>>, vector<1x128xf32>
    %28 = vector.broadcast %27 : vector<1x128xf32> to vector<128x128xf32>
    %29 = arith.addf %26, %28 : vector<128x128xf32>
    %cst_13 = arith.constant 0.000000e+00 : f32
    %30 = vector.broadcast %cst_13 : f32 to vector<128x128xf32>
    %31 = arith.maximumf %29, %30 : vector<128x128xf32>
    %32 = arith.truncf %31 : vector<128x128xf32> to vector<128x128xbf16>
    %c0_14 = arith.constant 0 : index
    %c0_15 = arith.constant 0 : index
    %33 = vector.load %arg4[%c0_14, %c0_15] : memref<128x128xbf16, #tpu.memory_space<vmem>>, vector<128x128xbf16>
    tpu.vector_store %arg4[%c0_14, %c0_15], %32 {strides = array<i32>} : memref<128x128xbf16, #tpu.memory_space<vmem>>, vector<128x128xbf16>,
    return
  }
  func.func @transform_0(%arg0: i32) -> (i32, i32) {
    %c0_i32 = arith.constant 0 : i32
    %c0_i32_0 = arith.constant 0 : i32
    return %arg0, %c0_i32 : i32, i32
  }
  func.func @transform_1(%arg0: i32) -> (i32, i32) {
    %c0_i32 = arith.constant 0 : i32
    %c0_i32_0 = arith.constant 0 : i32
    %c0_i32_1 = arith.constant 0 : i32
    return %c0_i32, %c0_i32_0 : i32, i32
  }
  func.func @transform_2(%arg0: i32) -> (i32, i32) {
    %c0_i32 = arith.constant 0 : i32
    %c0_i32_0 = arith.constant 0 : i32
    %c0_i32_1 = arith.constant 0 : i32
    return %c0_i32, %c0_i32_0 : i32, i32
  }
  func.func @transform_3(%arg0: i32) -> (i32, i32) {
    %c0_i32 = arith.constant 0 : i32
    %c0_i32_0 = arith.constant 0 : i32
    return %arg0, %c0_i32 : i32, i32
  }
}

module attributes {stable_mosaic.version = 11 : i64} {
  func.func @_conv_pool_relu_kernel(%arg0: i32, %arg1: memref<50x512xbf16, #tpu.memory_space<vmem>>, %arg2: memref<512x1152xbf16, #tpu.memory_space<vmem>>, %arg3: memref<1x128xf32, #tpu.memory_space<vmem>>, %arg4: memref<50x128xbf16, #tpu.memory_space<vmem>>) attributes {dimension_semantics = [#tpu.dimension_semantics<parallel>], iteration_bounds = array<i64: 1>, scalar_prefetch = 0 : i64, scratch_operands = 0 : i64, tpu.core_type = #tpu.core_type<tc>, window_params = [{transform_indices = @transform_0, window_bounds = array<i64: 50, 512>}, {pipeline_mode = #tpu.pipeline_mode<synchronous>, transform_indices = @transform_1, window_bounds = array<i64: 512, 1152>}, {pipeline_mode = #tpu.pipeline_mode<synchronous>, transform_indices = @transform_2, window_bounds = array<i64: 1, 128>}, {transform_indices = @transform_3, window_bounds = array<i64: 50, 128>}]} {
    %c0 = arith.constant 0 : index
    %c0_0 = arith.constant 0 : index
    %0 = vector.load %arg1[%c0, %c0_0] : memref<50x512xbf16, #tpu.memory_space<vmem>>, vector<50x512xbf16>
    %c0_1 = arith.constant 0 : index
    %c0_2 = arith.constant 0 : index
    %1 = vector.load %arg2[%c0_1, %c0_2] : memref<512x1152xbf16, #tpu.memory_space<vmem>>, vector<512x256xbf16>
    %cst = arith.constant dense<0.000000e+00> : vector<50x256xf32>
    %2 = tpu.matmul %0, %1, %cst {dimension_numbers = #tpu.dot_dimension_numbers<[1], [0], [0], [1], [0, 0, 1, 1], [], []>} : vector<50x512xbf16>, vector<512x256xbf16>, vector<50x256xf32> -> vector<50x256xf32>
    %3 = vector.extract_strided_slice %2 {offsets = [0, 0], sizes = [50, 128], strides = [1, 1]} : vector<50x256xf32> to vector<50x128xf32>
    %4 = vector.extract_strided_slice %2 {offsets = [0, 128], sizes = [50, 128], strides = [1, 1]} : vector<50x256xf32> to vector<50x128xf32>
    %5 = arith.maximumf %3, %4 : vector<50x128xf32>
    %c0_3 = arith.constant 0 : index
    %c256 = arith.constant 256 : index
    %6 = vector.load %arg2[%c0_3, %c256] : memref<512x1152xbf16, #tpu.memory_space<vmem>>, vector<512x256xbf16>
    %cst_4 = arith.constant dense<0.000000e+00> : vector<50x256xf32>
    %7 = tpu.matmul %0, %6, %cst_4 {dimension_numbers = #tpu.dot_dimension_numbers<[1], [0], [0], [1], [0, 0, 1, 1], [], []>} : vector<50x512xbf16>, vector<512x256xbf16>, vector<50x256xf32> -> vector<50x256xf32>
    %8 = vector.extract_strided_slice %7 {offsets = [0, 0], sizes = [50, 128], strides = [1, 1]} : vector<50x256xf32> to vector<50x128xf32>
    %9 = arith.maximumf %5, %8 : vector<50x128xf32>
    %10 = vector.extract_strided_slice %7 {offsets = [0, 128], sizes = [50, 128], strides = [1, 1]} : vector<50x256xf32> to vector<50x128xf32>
    %11 = arith.maximumf %9, %10 : vector<50x128xf32>
    %c0_5 = arith.constant 0 : index
    %c512 = arith.constant 512 : index
    %12 = vector.load %arg2[%c0_5, %c512] : memref<512x1152xbf16, #tpu.memory_space<vmem>>, vector<512x256xbf16>
    %cst_6 = arith.constant dense<0.000000e+00> : vector<50x256xf32>
    %13 = tpu.matmul %0, %12, %cst_6 {dimension_numbers = #tpu.dot_dimension_numbers<[1], [0], [0], [1], [0, 0, 1, 1], [], []>} : vector<50x512xbf16>, vector<512x256xbf16>, vector<50x256xf32> -> vector<50x256xf32>
    %14 = vector.extract_strided_slice %13 {offsets = [0, 0], sizes = [50, 128], strides = [1, 1]} : vector<50x256xf32> to vector<50x128xf32>
    %15 = arith.maximumf %11, %14 : vector<50x128xf32>
    %16 = vector.extract_strided_slice %13 {offsets = [0, 128], sizes = [50, 128], strides = [1, 1]} : vector<50x256xf32> to vector<50x128xf32>
    %17 = arith.maximumf %15, %16 : vector<50x128xf32>
    %c0_7 = arith.constant 0 : index
    %c768 = arith.constant 768 : index
    %18 = vector.load %arg2[%c0_7, %c768] : memref<512x1152xbf16, #tpu.memory_space<vmem>>, vector<512x256xbf16>
    %cst_8 = arith.constant dense<0.000000e+00> : vector<50x256xf32>
    %19 = tpu.matmul %0, %18, %cst_8 {dimension_numbers = #tpu.dot_dimension_numbers<[1], [0], [0], [1], [0, 0, 1, 1], [], []>} : vector<50x512xbf16>, vector<512x256xbf16>, vector<50x256xf32> -> vector<50x256xf32>
    %20 = vector.extract_strided_slice %19 {offsets = [0, 0], sizes = [50, 128], strides = [1, 1]} : vector<50x256xf32> to vector<50x128xf32>
    %21 = arith.maximumf %17, %20 : vector<50x128xf32>
    %22 = vector.extract_strided_slice %19 {offsets = [0, 128], sizes = [50, 128], strides = [1, 1]} : vector<50x256xf32> to vector<50x128xf32>
    %23 = arith.maximumf %21, %22 : vector<50x128xf32>
    %c0_9 = arith.constant 0 : index
    %c1024 = arith.constant 1024 : index
    %24 = vector.load %arg2[%c0_9, %c1024] : memref<512x1152xbf16, #tpu.memory_space<vmem>>, vector<512x128xbf16>
    %cst_10 = arith.constant dense<0.000000e+00> : vector<50x128xf32>
    %25 = tpu.matmul %0, %24, %cst_10 {dimension_numbers = #tpu.dot_dimension_numbers<[1], [0], [0], [1], [0, 0, 1, 1], [], []>} : vector<50x512xbf16>, vector<512x128xbf16>, vector<50x128xf32> -> vector<50x128xf32>
    %26 = arith.maximumf %23, %25 : vector<50x128xf32>
    %c0_11 = arith.constant 0 : index
    %c0_12 = arith.constant 0 : index
    %27 = vector.load %arg3[%c0_11, %c0_12] : memref<1x128xf32, #tpu.memory_space<vmem>>, vector<1x128xf32>
    %28 = vector.broadcast %27 : vector<1x128xf32> to vector<50x128xf32>
    %29 = arith.addf %26, %28 : vector<50x128xf32>
    %cst_13 = arith.constant 0.000000e+00 : f32
    %30 = vector.broadcast %cst_13 : f32 to vector<50x128xf32>
    %31 = arith.maximumf %29, %30 : vector<50x128xf32>
    %32 = arith.truncf %31 : vector<50x128xf32> to vector<50x128xbf16>
    %c0_14 = arith.constant 0 : index
    %c0_15 = arith.constant 0 : index
    %33 = vector.load %arg4[%c0_14, %c0_15] : memref<50x128xbf16, #tpu.memory_space<vmem>>, vector<50x128xbf16>
    tpu.vector_store %arg4[%c0_14, %c0_15], %32 {strides = array<i32>} : memref<50x128xbf16, #tpu.memory_space<vmem>>, vector<50x128xbf16>,
    return
  }
  func.func @transform_0(%arg0: i32) -> (i32, i32) {
    %c0_i32 = arith.constant 0 : i32
    %c0_i32_0 = arith.constant 0 : i32
    return %arg0, %c0_i32 : i32, i32
  }
  func.func @transform_1(%arg0: i32) -> (i32, i32) {
    %c0_i32 = arith.constant 0 : i32
    %c0_i32_0 = arith.constant 0 : i32
    %c0_i32_1 = arith.constant 0 : i32
    return %c0_i32, %c0_i32_0 : i32, i32
  }
  func.func @transform_2(%arg0: i32) -> (i32, i32) {
    %c0_i32 = arith.constant 0 : i32
    %c0_i32_0 = arith.constant 0 : i32
    %c0_i32_1 = arith.constant 0 : i32
    return %c0_i32, %c0_i32_0 : i32, i32
  }
  func.func @transform_3(%arg0: i32) -> (i32, i32) {
    %c0_i32 = arith.constant 0 : i32
    %c0_i32_0 = arith.constant 0 : i32
    return %arg0, %c0_i32 : i32, i32
  }
}

module attributes {stable_mosaic.version = 11 : i64} {
  func.func @_matmul_bias_kernel(%arg0: i32, %arg1: memref<2x3200xbf16, #tpu.memory_space<vmem>>, %arg2: memref<3200x128xbf16, #tpu.memory_space<vmem>>, %arg3: memref<1x128xf32, #tpu.memory_space<vmem>>, %arg4: memref<2x128xf32, #tpu.memory_space<vmem>>) attributes {dimension_semantics = [#tpu.dimension_semantics<parallel>], iteration_bounds = array<i64: 1>, scalar_prefetch = 0 : i64, scratch_operands = 0 : i64, tpu.core_type = #tpu.core_type<tc>, window_params = [{transform_indices = @transform_0, window_bounds = array<i64: 2, 3200>}, {pipeline_mode = #tpu.pipeline_mode<synchronous>, transform_indices = @transform_1, window_bounds = array<i64: 3200, 128>}, {pipeline_mode = #tpu.pipeline_mode<synchronous>, transform_indices = @transform_2, window_bounds = array<i64: 1, 128>}, {transform_indices = @transform_3, window_bounds = array<i64: 2, 128>}]} {
    %c0 = arith.constant 0 : index
    %c0_0 = arith.constant 0 : index
    %0 = vector.load %arg1[%c0, %c0_0] : memref<2x3200xbf16, #tpu.memory_space<vmem>>, vector<2x3200xbf16>
    %c0_1 = arith.constant 0 : index
    %c0_2 = arith.constant 0 : index
    %1 = vector.load %arg2[%c0_1, %c0_2] : memref<3200x128xbf16, #tpu.memory_space<vmem>>, vector<3200x128xbf16>
    %cst = arith.constant dense<0.000000e+00> : vector<2x128xf32>
    %2 = tpu.matmul %0, %1, %cst {dimension_numbers = #tpu.dot_dimension_numbers<[1], [0], [0], [1], [0, 0, 1, 1], [], []>} : vector<2x3200xbf16>, vector<3200x128xbf16>, vector<2x128xf32> -> vector<2x128xf32>
    %c0_3 = arith.constant 0 : index
    %c0_4 = arith.constant 0 : index
    %3 = vector.load %arg3[%c0_3, %c0_4] : memref<1x128xf32, #tpu.memory_space<vmem>>, vector<1x128xf32>
    %4 = vector.broadcast %3 : vector<1x128xf32> to vector<2x128xf32>
    %5 = arith.addf %2, %4 : vector<2x128xf32>
    %c0_5 = arith.constant 0 : index
    %c0_6 = arith.constant 0 : index
    %6 = vector.load %arg4[%c0_5, %c0_6] : memref<2x128xf32, #tpu.memory_space<vmem>>, vector<2x128xf32>
    tpu.vector_store %arg4[%c0_5, %c0_6], %5 {strides = array<i32>} : memref<2x128xf32, #tpu.memory_space<vmem>>, vector<2x128xf32>,
    return
  }
  func.func @transform_0(%arg0: i32) -> (i32, i32) {
    %c0_i32 = arith.constant 0 : i32
    %c0_i32_0 = arith.constant 0 : i32
    return %arg0, %c0_i32 : i32, i32
  }
  func.func @transform_1(%arg0: i32) -> (i32, i32) {
    %c0_i32 = arith.constant 0 : i32
    %c0_i32_0 = arith.constant 0 : i32
    %c0_i32_1 = arith.constant 0 : i32
    return %c0_i32, %c0_i32_0 : i32, i32
  }
  func.func @transform_2(%arg0: i32) -> (i32, i32) {
    %c0_i32 = arith.constant 0 : i32
    %c0_i32_0 = arith.constant 0 : i32
    %c0_i32_1 = arith.constant 0 : i32
    return %c0_i32, %c0_i32_0 : i32, i32
  }
  func.func @transform_3(%arg0: i32) -> (i32, i32) {
    %c0_i32 = arith.constant 0 : i32
    %c0_i32_0 = arith.constant 0 : i32
    return %arg0, %c0_i32 : i32, i32
  }
}

</mosaic_0001>

<bundles_post_ra>
// kernel: _lambda_.3
= control target key start
LH: loop header
LB: loop body
LE: loop exit
PB: predicated region body
PF: predicated region fallthrough
CT: control target
= control target key end

     0   :  { %s2336_s12 = smov 0   ;;  %s2338_s13 = smov 0   ;;  %s3071_s0 = inlined_call_operand.vmem [shape: bf16[800,128], index: 0, kind: input, shape index: {}]   ;;  %s3072_s1 = inlined_call_operand.vmem [shape: bf16[128,1152], index: 1, kind: input, shape index: {}]   ;;  %s3073_s2 = inlined_call_operand.vmem [shape: f32[1,128], index: 2, kind: input, shape index: {}]   ;;  %s3074_s3 = inlined_call_operand.vmem [shape: bf16[800,128], index: 3, kind: output, shape index: {}]  }
   0x1   :  { %s2340_s14 = smov 0  }
   0x2 LB: > { %s2349_s15 = sadd.s32 4294967295, %s2281_s14   ;;  %s2351_s16 = sadd.s32 1, %s2281_s14   ;;  %s2281_s14 = sphi %s2340_s14, %s3081_s14   ;;  %s2277_s13 = sphi %s2338_s13, %s3080_s13   ;;  %s2273_s12 = sphi %s2336_s12, %s3079_s12  }
   0x3   : > { %s85_s17 = ssub.s32 %s2281_s14, %s2351_s16  ;;  %s88_s18 = sadd.s32 1, %s2277_s13 }
   0x4   : > { %p86_p0 = scmp.eq.s32.totalorder %s85_s17, 0  ;;  %p98_p1 = scmp.ne.s32.totalorder %s2277_s13, %s2273_s12 }
   0x5   : > { %p99_p2 = scmp.eq.s32.totalorder %s2349_s15, 6  ;;  %p1778_p3 = scmp.ge.s32.totalorder %s2281_s14, 1 }
   0x6   : > { %s2359_s19 = scalar_select %p86_p0, %s2277_s13, %s88_s18  }
   0x7   : > { %p2361_p4 = por %p99_p2, %p98_p1  ;;  %p146_p5 = scmp.lt.s32.totalorder %s2281_s14, 8 }
   0x9   : > { %p147_p6 = pnand %p1778_p3, %p146_p5 }
   0xa   : > { %v2115_v0 = vld [vmem:[%s3072_s1 + $0x4] ss:$36 sps:$4 sm:$0xff] (!%p147_p6)   ;;  %v2117_v1 = vld [vmem:[%s3072_s1 + $0xc] ss:$36 sps:$4 sm:$0xff] (!%p147_p6)   ;;  %v2315_v2 = vmov (!%p147_p6), 0   ;;  %s2395_s14 = sshll.u32 (!%p147_p6), %s2349_s15, 4 }
   0xb   : > { %150 = sbr.rel (%p147_p6) target bundleno = 464 (0x1d0), region = 32  ;;  %385 = vmatprep.mubr.bf16.mxu0 (!%p147_p6), %v2315_v2  ;;  %610 = vmatprep.mubr.bf16.mxu1 (!%p147_p6), %v2315_v2  ;;  %v2119_v3 = vld [vmem:[%s3072_s1] ss:$36 sps:$4 sm:$0xff] (!%p147_p6)   ;;  %v2120_v4 = vld [vmem:[%s3072_s1 + $0x8] ss:$36 sps:$4 sm:$0xff] (!%p147_p6)   ;;  %p178_p7 = scmp.lt.s32.totalorder (!%p147_p6), %s2395_s14, 99 }
   0xc   : > { %353 = vmatprep.subr.bf16.mxu0 (!%p147_p6), %v2115_v0  ;;  %578 = vmatprep.subr.bf16.mxu1 (!%p147_p6), %v2117_v1  ;;  %v2121_v5 = vld [vmem:[%s3072_s1 + $0x4c] ss:$36 sps:$4 sm:$0xff] (!%p147_p6)   ;;  %v2123_v6 = vld [vmem:[%s3072_s1 + $0x54] ss:$36 sps:$4 sm:$0xff] (!%p147_p6)   ;;  %v2129_v10 = vld [vmem:[%s3072_s1 + $0x9c] ss:$36 sps:$4 sm:$0xff] (!%p147_p6)  }
   0xd   : > { %354 = vmatpush1.bf16.msra.mxu0 (!%p147_p6), %v2119_v3  ;;  %579 = vmatpush1.bf16.msra.mxu1 (!%p147_p6), %v2120_v4  ;;  %v2125_v7 = vld [vmem:[%s3072_s1 + $0x48] ss:$36 sps:$4 sm:$0xff] (!%p147_p6)   ;;  %v2126_v8 = vld [vmem:[%s3072_s1 + $0x50] ss:$36 sps:$4 sm:$0xff] (!%p147_p6)   ;;  %v2132_v12 = vld [vmem:[%s3072_s1 + $0x98] ss:$36 sps:$4 sm:$0xff] (!%p147_p6)  }
   0xe   : > { %355 = vmatprep.subr.bf16.mxu0 (!%p147_p6), %v2121_v5  ;;  %580 = vmatprep.subr.bf16.mxu1 (!%p147_p6), %v2123_v6  ;;  %v2127_v9 = vld [vmem:[%s3072_s1 + $0x94] ss:$36 sps:$4 sm:$0xff] (!%p147_p6)   ;;  %v2133_v13 = vld [vmem:[%s3072_s1 + $0xdc] ss:$36 sps:$4 sm:$0xff] (!%p147_p6)   ;;  %v2135_v14 = vld [vmem:[%s3072_s1 + $0xe4] ss:$36 sps:$4 sm:$0xff] (!%p147_p6)  }
   0xf   : > { %v2131_v11 = vld [vmem:[%s3072_s1 + $0x90] ss:$36 sps:$4 sm:$0xff] (!%p147_p6)   ;;  %v2137_v15 = vld [vmem:[%s3072_s1 + $0xd8] ss:$36 sps:$4 sm:$0xff] (!%p147_p6)   ;;  %v2138_v16 = vld [vmem:[%s3072_s1 + $0xe0] ss:$36 sps:$4 sm:$0xff] (!%p147_p6)  }
  0x10   : > { %v2139_v17 = vld [vmem:[%s3072_s1 + $0x124] ss:$36 sps:$4 sm:$0xff] (!%p147_p6)   ;;  %v2141_v18 = vld [vmem:[%s3072_s1 + $0x12c] ss:$36 sps:$4 sm:$0xff] (!%p147_p6)   ;;  %v2147_v22 = vld [vmem:[%s3072_s1 + $0x174] ss:$36 sps:$4 sm:$0xff] (!%p147_p6)  }
  0x11   : > { %356 = vmatpush1.bf16.msra.mxu0 (!%p147_p6), %v2125_v7  ;;  %581 = vmatpush1.bf16.msra.mxu1 (!%p147_p6), %v2126_v8  ;;  %v2143_v19 = vld [vmem:[%s3072_s1 + $0x120] ss:$36 sps:$4 sm:$0xff] (!%p147_p6)   ;;  %v2144_v20 = vld [vmem:[%s3072_s1 + $0x128] ss:$36 sps:$4 sm:$0xff] (!%p147_p6)   ;;  %v2150_v24 = vld [vmem:[%s3072_s1 + $0x170] ss:$36 sps:$4 sm:$0xff] (!%p147_p6)  }
  0x12   : > { %357 = vmatprep.subr.bf16.mxu0 %v2127_v9  ;;  %582 = vmatprep.subr.bf16.mxu1 %v2129_v10  ;;  %s179_s10 = scalar_select %p178_p7, %s2395_s14, 99  ;;  %v2145_v21 = vld [vmem:[%s3072_s1 + $0x16c] ss:$36 sps:$4 sm:$0xff]   ;;  %v2151_v25 = vld [vmem:[%s3072_s1 + $0x1b4] ss:$36 sps:$4 sm:$0xff]  }
  0x13   : > { %v2149_v23 = vld [vmem:[%s3072_s1 + $0x168] ss:$36 sps:$4 sm:$0xff]   ;;  %v2153_v26 = vld [vmem:[%s3072_s1 + $0x1bc] ss:$36 sps:$4 sm:$0xff]   ;;  %v2155_v27 = vld [vmem:[%s3072_s1 + $0x1b0] ss:$36 sps:$4 sm:$0xff]  }
  0x14   : > { %s1781_s26 = sshll.u32 %s179_s10, 2  ;;  %v2156_v28 = vld [vmem:[%s3072_s1 + $0x1b8] ss:$36 sps:$4 sm:$0xff]   ;;  %v2159_v30 = vld [vmem:[%s3072_s1 + $0x204] ss:$36 sps:$4 sm:$0xff]   ;;  %s170_s9 = sand.u32 1, %s2273_s12  }
  0x15   : > { %358 = vmatpush1.bf16.msra.mxu0 %v2131_v11  ;;  %583 = vmatpush1.bf16.msra.mxu1 %v2132_v12  ;;  %s2450_s8 = scalar_lea.vmem %s3071_s0, %s1781_s26  ;;  %v2157_v29 = vld [vmem:[%s3072_s1 + $0x1fc] ss:$36 sps:$4 sm:$0xff]   ;;  %v2166_v33 = vld [vmem:[%s3072_s1 + $0x14] ss:$36 sps:$4 sm:$0xff]   ;;  %v2176_v39 = vld [vmem:[%s3072_s1 + $0x64] ss:$36 sps:$4 sm:$0xff]  }
  0x16   : > { %359 = vmatprep.subr.bf16.mxu0 %v2133_v13  ;;  %584 = vmatprep.subr.bf16.mxu1 %v2135_v14  ;;  %v2161_v31 = vld [vmem:[%s3072_s1 + $0x1f8] ss:$36 sps:$4 sm:$0xff]   ;;  %v2162_v32 = vld [vmem:[%s3072_s1 + $0x200] ss:$36 sps:$4 sm:$0xff]   ;;  %v2164_v36 = vld [vmem:[%s3072_s1 + $0x10] ss:$36 sps:$4 sm:$0xff]  }
  0x17   : > { %v2169_v34 = vld [vmem:[%s3072_s1 + $0x1c] ss:$36 sps:$4 sm:$0xff]   ;;  %v2180_v42 = vld [vmem:[%s3072_s1 + $0xa4] ss:$36 sps:$4 sm:$0xff]   ;;  %v2183_v43 = vld [vmem:[%s3072_s1 + $0xac] ss:$36 sps:$4 sm:$0xff]  }
  0x18   : > { %v2480_v35 = vld [vmem:[%s2450_s8] sm:$0xff]   ;;  %v2167_v37 = vld [vmem:[%s3072_s1 + $0x18] ss:$36 sps:$4 sm:$0xff]   ;;  %v2511_v44 = vld [vmem:[%s2450_s8 + $0x8] sm:$0xff]   ;;  %s1779_s12 = sshll.u32 %s170_s9, 6  ;;  %s1509_s11 = ssub.s32 (%p2361_p4), 100, %s2395_s14 }
  0x19   : > { %360 = vmatpush1.bf16.msra.mxu0 %v2137_v15  ;;  %585 = vmatpush1.bf16.msra.mxu1 %v2138_v16  ;;  %v2173_v38 = vld [vmem:[%s3072_s1 + $0x5c] ss:$36 sps:$4 sm:$0xff]   ;;  %v2181_v46 = vld [vmem:[%s3072_s1 + $0xa8] ss:$36 sps:$4 sm:$0xff]   ;;  %v2190_v48 = vld [vmem:[%s3072_s1 + $0xf4] ss:$36 sps:$4 sm:$0xff]  }
  0x1a   : > { %361 = vmatprep.subr.bf16.mxu0 %v2139_v17  ;;  %586 = vmatprep.subr.bf16.mxu1 %v2141_v18  ;;  %v2171_v40 = vld [vmem:[%s3072_s1 + $0x58] ss:$36 sps:$4 sm:$0xff]   ;;  %v2174_v41 = vld [vmem:[%s3072_s1 + $0x60] ss:$36 sps:$4 sm:$0xff]   ;;  %v2187_v47 = vld [vmem:[%s3072_s1 + $0xec] ss:$36 sps:$4 sm:$0xff]  }
  0x1b   : > { %v2178_v45 = vld [vmem:[%s3072_s1 + $0xa0] ss:$36 sps:$4 sm:$0xff]   ;;  %v2185_v49 = vld [vmem:[%s3072_s1 + $0xe8] ss:$36 sps:$4 sm:$0xff]   ;;  %v2188_v50 = vld [vmem:[%s3072_s1 + $0xf0] ss:$36 sps:$4 sm:$0xff]  }
  0x1c   : > { %v2194_v51 = vld [vmem:[%s3072_s1 + $0x134] ss:$36 sps:$4 sm:$0xff]   ;;  %v2197_v52 = vld [vmem:[%s3072_s1 + $0x13c] ss:$36 sps:$4 sm:$0xff]   ;;  %v2204_v57 = vld [vmem:[%s3072_s1 + $0x184] ss:$36 sps:$4 sm:$0xff]  }
  0x1d   : > { %362 = vmatpush1.bf16.msra.mxu0 %v2143_v19  ;;  %587 = vmatpush1.bf16.msra.mxu1 %v2144_v20  ;;  %v2542_v53 = vld [vmem:[%s2450_s8 + $0x10] sm:$0xff]   ;;  %v2195_v55 = vld [vmem:[%s3072_s1 + $0x138] ss:$36 sps:$4 sm:$0xff]   ;;  %v2202_v59 = vld [vmem:[%s3072_s1 + $0x180] ss:$36 sps:$4 sm:$0xff]   ;;  %s2941_s10 = scalar_lea.vmem [#allocation2], %s1779_s12  }
  0x1e   : > { %363 = vmatprep.subr.bf16.mxu0 %v2145_v21  ;;  %588 = vmatprep.subr.bf16.mxu1 %v2147_v22  ;;  %v2192_v54 = vld [vmem:[%s3072_s1 + $0x130] ss:$36 sps:$4 sm:$0xff]   ;;  %v2201_v56 = vld [vmem:[%s3072_s1 + $0x17c] ss:$36 sps:$4 sm:$0xff]   ;;  %v2208_v60 = vld [vmem:[%s3072_s1 + $0x1c4] ss:$36 sps:$4 sm:$0xff]  }
  0x1f   : > { %v2199_v58 = vld [vmem:[%s3072_s1 + $0x178] ss:$36 sps:$4 sm:$0xff]   ;;  %v2211_v61 = vld [vmem:[%s3072_s1 + $0x1cc] ss:$36 sps:$4 sm:$0xff]   ;;  %v2206_v63 = vld [vmem:[%s3072_s1 + $0x1c0] ss:$36 sps:$4 sm:$0xff]  }
  0x20   : > { %v2573_v62 = vld [vmem:[%s2450_s8 + $0x18] sm:$0xff]   ;;  %v2209_v0 = vld [vmem:[%s3072_s1 + $0x1c8] ss:$36 sps:$4 sm:$0xff]   ;;  %v2216_v5 = vld [vmem:[%s3072_s1 + $0x210] ss:$36 sps:$4 sm:$0xff]   ;;  %s1912_s17 = sshll.u32 (%p2361_p4), %s2349_s15, 6 }
  0x21   : > { %364 = vmatpush1.bf16.msra.mxu0 %v2149_v23  ;;  %589 = vmatpush1.bf16.msra.mxu1 %v2150_v24  ;;  %v2215_v1 = vld [vmem:[%s3072_s1 + $0x20c] ss:$36 sps:$4 sm:$0xff]   ;;  %v2218_v3 = vld [vmem:[%s3072_s1 + $0x214] ss:$36 sps:$4 sm:$0xff]   ;;  %v2219_v6 = vld [vmem:[%s3072_s1 + $0x20] ss:$36 sps:$4 sm:$0xff]  }
  0x22   : > { %365 = vmatprep.subr.bf16.mxu0 %v2151_v25  ;;  %590 = vmatprep.subr.bf16.mxu1 %v2153_v26  ;;  %v2213_v4 = vld [vmem:[%s3072_s1 + $0x208] ss:$36 sps:$4 sm:$0xff]   ;;  %v2601_v7 = vld [vmem:[%s2450_s8 + $0x20] sm:$0xff]   ;;  %v2615_v9 = vld [vmem:[%s2450_s8 + $0x30] sm:$0xff]   ;;  %p1510_p8 = scmp.lt.s32.totalorder (%p2361_p4), %s1509_s11, 16 }
  0x23   : > { %v2608_v8 = vld [vmem:[%s2450_s8 + $0x28] sm:$0xff]   ;;  %v2622_v10 = vld [vmem:[%s2450_s8 + $0x38] sm:$0xff]   ;;  %v2221_v12 = vld [vmem:[%s3072_s1 + $0xb0] ss:$36 sps:$4 sm:$0xff]   ;;  %s2975_s8 = scalar_lea.vmem (%p2361_p4), %s3074_s3, %s1912_s17  }
  0x24   : > { %v2220_v11 = vld [vmem:[%s3072_s1 + $0x68] ss:$36 sps:$4 sm:$0xff]   ;;  %v2222_v13 = vld [vmem:[%s3072_s1 + $0xf8] ss:$36 sps:$4 sm:$0xff]   ;;  %v2223_v14 = vld [vmem:[%s3072_s1 + $0x140] ss:$36 sps:$4 sm:$0xff]  }
  0x25   : > { %366 = vmatpush1.bf16.msra.mxu0 %v2155_v27  ;;  %591 = vmatpush1.bf16.msra.mxu1 %v2156_v28  ;;  %v2224_v15 = vld [vmem:[%s3072_s1 + $0x188] ss:$36 sps:$4 sm:$0xff]   ;;  %v2225_v16 = vld [vmem:[%s3072_s1 + $0x1d0] ss:$36 sps:$4 sm:$0xff]   ;;  %v2226_v17 = vld [vmem:[%s3072_s1 + $0x218] ss:$36 sps:$4 sm:$0xff]  }
  0x26   : > { %367 = vmatprep.subr.bf16.mxu0 %v2157_v29  ;;  %592 = vmatprep.subr.bf16.mxu1 %v2159_v30 }
  0x29   : > { %368 = vmatpush1.bf16.msra.mxu0 %v2161_v31  ;;  %593 = vmatpush1.bf16.msra.mxu1 %v2162_v32 }
  0x2a   : > { %819 = vmatprep.subr.bf16.mxu0 %v2166_v33  ;;  %1060 = vmatprep.subr.bf16.mxu1 %v2169_v34 }
  0x2c   : > { %386 = vmatmul.mubr.bf16.vlgmr.msra.gmra.mrb[0].mxu0 %v2480_v35  ;;  %611 = vmatmul.mubr.bf16.vlgmr.msra.gmra.mrb[0].mxu1 %v2480_v35 }
  0x2d   : > { %820 = vmatpush1.bf16.msra.mxu0 %v2164_v36  ;;  %1061 = vmatpush1.bf16.msra.mxu1 %v2167_v37 }
  0x2e   : > { %395 = vmatprep.mubr.bf16.mxu0 %v2315_v2  ;;  %620 = vmatprep.mubr.bf16.mxu1 %v2315_v2 }
  0x2f   : > { %821 = vmatprep.subr.bf16.mxu0 %v2173_v38  ;;  %1062 = vmatprep.subr.bf16.mxu1 %v2176_v39 }
  0x31   : > { %822 = vmatpush1.bf16.msra.mxu0 %v2171_v40  ;;  %1063 = vmatpush1.bf16.msra.mxu1 %v2174_v41 }
  0x32   : > { %823 = vmatprep.subr.bf16.mxu0 %v2180_v42  ;;  %1064 = vmatprep.subr.bf16.mxu1 %v2183_v43 }
  0x34   : > { %396 = vmatmul.mubr.bf16.gmra.mrb[4].mxu0 %v2511_v44  ;;  %621 = vmatmul.mubr.bf16.gmra.mrb[4].mxu1 %v2511_v44 }
  0x35   : > { %405 = vmatprep.mubr.bf16.mxu0 %v2315_v2  ;;  %630 = vmatprep.mubr.bf16.mxu1 %v2315_v2 }
  0x36   : > { %824 = vmatpush1.bf16.msra.mxu0 %v2178_v45  ;;  %1065 = vmatpush1.bf16.msra.mxu1 %v2181_v46 }
  0x37   : > { %825 = vmatprep.subr.bf16.mxu0 %v2187_v47  ;;  %1066 = vmatprep.subr.bf16.mxu1 %v2190_v48 }
  0x3a   : > { %826 = vmatpush1.bf16.msra.mxu0 %v2185_v49  ;;  %1067 = vmatpush1.bf16.msra.mxu1 %v2188_v50 }
  0x3b   : > { %827 = vmatprep.subr.bf16.mxu0 %v2194_v51  ;;  %1068 = vmatprep.subr.bf16.mxu1 %v2197_v52 }
  0x3c   : > { %406 = vmatmul.mubr.bf16.gmra.mrb[8].mxu0 %v2542_v53  ;;  %631 = vmatmul.mubr.bf16.gmra.mrb[8].mxu1 %v2542_v53 }
  0x3d   : > { %415 = vmatprep.mubr.bf16.mxu0 %v2315_v2  ;;  %640 = vmatprep.mubr.bf16.mxu1 %v2315_v2 }
  0x3e   : > { %828 = vmatpush1.bf16.msra.mxu0 %v2192_v54  ;;  %1069 = vmatpush1.bf16.msra.mxu1 %v2195_v55 }
  0x3f   : > { %829 = vmatprep.subr.bf16.mxu0 %v2201_v56  ;;  %1070 = vmatprep.subr.bf16.mxu1 %v2204_v57 }
  0x42   : > { %830 = vmatpush1.bf16.msra.mxu0 %v2199_v58  ;;  %1071 = vmatpush1.bf16.msra.mxu1 %v2202_v59 }
  0x43   : > { %831 = vmatprep.subr.bf16.mxu0 %v2208_v60  ;;  %1072 = vmatprep.subr.bf16.mxu1 %v2211_v61 }
  0x44   : > { %416 = vmatmul.mubr.bf16.gmra.mrb[12].mxu0 %v2573_v62  ;;  %641 = vmatmul.mubr.bf16.gmra.mrb[12].mxu1 %v2573_v62 }
  0x45   : > { %425 = vmatprep.mubr.bf16.mxu0 %v2315_v2  ;;  %650 = vmatprep.mubr.bf16.mxu1 %v2315_v2 }
  0x46   : > { %832 = vmatpush1.bf16.msra.mxu0 %v2206_v63  ;;  %1073 = vmatpush1.bf16.msra.mxu1 %v2209_v0 }
  0x47   : > { %833 = vmatprep.subr.bf16.mxu0 %v2215_v1  ;;  %1074 = vmatprep.subr.bf16.mxu1 %v2218_v3 }
  0x4a   : > { %834 = vmatpush1.bf16.msra.mxu0 %v2213_v4  ;;  %1075 = vmatpush1.bf16.msra.mxu1 %v2216_v5 }
  0x4b   : > { %1978 = vmatprep.subr.bf16.mxu0 %v2219_v6  ;;  %2010 = vmatprep.subr.bf16.mxu1 %v2219_v6 }
  0x4c   : > { %426 = vmatmul.mubr.bf16.gmra.mrb[16].mxu0 %v2601_v7  ;;  %651 = vmatmul.mubr.bf16.gmra.mrb[16].mxu1 %v2601_v7 }
  0x4d   : > { %435 = vmatprep.mubr.bf16.mxu0 %v2315_v2  ;;  %660 = vmatprep.mubr.bf16.mxu1 %v2315_v2 }
  0x54   : > { %436 = vmatmul.mubr.bf16.gmra.mrb[20].mxu0 %v2608_v8  ;;  %661 = vmatmul.mubr.bf16.gmra.mrb[20].mxu1 %v2608_v8 }
  0x55   : > { %445 = vmatprep.mubr.bf16.mxu0 %v2315_v2  ;;  %670 = vmatprep.mubr.bf16.mxu1 %v2315_v2 }
  0x5c   : > { %446 = vmatmul.mubr.bf16.gmra.mrb[24].mxu0 %v2615_v9  ;;  %671 = vmatmul.mubr.bf16.gmra.mrb[24].mxu1 %v2615_v9 }
  0x5d   : > { %455 = vmatprep.mubr.bf16.mxu0 %v2315_v2  ;;  %680 = vmatprep.mubr.bf16.mxu1 %v2315_v2 }
  0x64   : > { %456 = vmatmul.mubr.bf16.gmra.mrb[28].mxu0 %v2622_v10  ;;  %681 = vmatmul.mubr.bf16.gmra.mrb[28].mxu1 %v2622_v10 }
  0x65   : > { %851 = vmatprep.mubr.bf16.mxu0 %v2315_v2  ;;  %1092 = vmatprep.mubr.bf16.mxu1 %v2315_v2 }
  0x6c   : > { %852 = vmatmul.mubr.bf16.vlgmr.msra.gmra.mrb[32].mxu0 %v2480_v35  ;;  %1093 = vmatmul.mubr.bf16.vlgmr.msra.gmra.mrb[32].mxu1 %v2480_v35 }
  0x6d   : > { %1979 = vmatpush3.bf16.msra.mxu0 %v2219_v6  ;;  %2018 = vmatpush3.bf16.msra.mxu1 %v2219_v6 }
  0x6e   : > { %861 = vmatprep.mubr.bf16.mxu0 %v2315_v2  ;;  %1102 = vmatprep.mubr.bf16.mxu1 %v2315_v2 }
  0x6f   : > { %1980 = vmatprep.subr.bf16.mxu0 %v2220_v11  ;;  %2011 = vmatprep.subr.bf16.mxu1 %v2220_v11 }
  0x71   : > { %1981 = vmatpush3.bf16.msra.mxu0 %v2220_v11  ;;  %2019 = vmatpush3.bf16.msra.mxu1 %v2220_v11 }
  0x72   : > { %1982 = vmatprep.subr.bf16.mxu0 %v2221_v12  ;;  %2012 = vmatprep.subr.bf16.mxu1 %v2221_v12 }
  0x74   : > { %862 = vmatmul.mubr.bf16.gmra.mrb[36].mxu0 %v2511_v44  ;;  %1103 = vmatmul.mubr.bf16.gmra.mrb[36].mxu1 %v2511_v44 }
  0x75   : > { %871 = vmatprep.mubr.bf16.mxu0 %v2315_v2  ;;  %1112 = vmatprep.mubr.bf16.mxu1 %v2315_v2 }
  0x76   : > { %1983 = vmatpush3.bf16.msra.mxu0 %v2221_v12  ;;  %2020 = vmatpush3.bf16.msra.mxu1 %v2221_v12 }
  0x77   : > { %1984 = vmatprep.subr.bf16.mxu0 %v2222_v13  ;;  %2013 = vmatprep.subr.bf16.mxu1 %v2222_v13 }
  0x7a   : > { %1985 = vmatpush3.bf16.msra.mxu0 %v2222_v13  ;;  %2021 = vmatpush3.bf16.msra.mxu1 %v2222_v13 }
  0x7b   : > { %1986 = vmatprep.subr.bf16.mxu0 %v2223_v14  ;;  %2014 = vmatprep.subr.bf16.mxu1 %v2223_v14 }
  0x7c   : > { %872 = vmatmul.mubr.bf16.gmra.mrb[40].mxu0 %v2542_v53  ;;  %1113 = vmatmul.mubr.bf16.gmra.mrb[40].mxu1 %v2542_v53 }
  0x7d   : > { %881 = vmatprep.mubr.bf16.mxu0 %v2315_v2  ;;  %1122 = vmatprep.mubr.bf16.mxu1 %v2315_v2 }
  0x7e   : > { %1987 = vmatpush3.bf16.msra.mxu0 %v2223_v14  ;;  %2022 = vmatpush3.bf16.msra.mxu1 %v2223_v14 }
  0x7f   : > { %1988 = vmatprep.subr.bf16.mxu0 %v2224_v15  ;;  %2015 = vmatprep.subr.bf16.mxu1 %v2224_v15 }
  0x82   : > { %1989 = vmatpush3.bf16.msra.mxu0 %v2224_v15  ;;  %2023 = vmatpush3.bf16.msra.mxu1 %v2224_v15 }
  0x83   : > { %1990 = vmatprep.subr.bf16.mxu0 %v2225_v16  ;;  %2016 = vmatprep.subr.bf16.mxu1 %v2225_v16 }
  0x84   : > { %882 = vmatmul.mubr.bf16.gmra.mrb[44].mxu0 %v2573_v62  ;;  %1123 = vmatmul.mubr.bf16.gmra.mrb[44].mxu1 %v2573_v62 }
  0x85   : > { %891 = vmatprep.mubr.bf16.mxu0 %v2315_v2  ;;  %1132 = vmatprep.mubr.bf16.mxu1 %v2315_v2 }
  0x86   : > { %1991 = vmatpush3.bf16.msra.mxu0 %v2225_v16  ;;  %2024 = vmatpush3.bf16.msra.mxu1 %v2225_v16 }
  0x87   : > { %1992 = vmatprep.subr.bf16.mxu0 %v2226_v17  ;;  %2017 = vmatprep.subr.bf16.mxu1 %v2226_v17 }
  0x8a   : > { %1993 = vmatpush3.bf16.msra.mxu0 %v2226_v17  ;;  %2025 = vmatpush3.bf16.msra.mxu1 %v2226_v17 }
  0x8c   : > { %892 = vmatmul.mubr.bf16.gmra.mrb[48].mxu0 %v2601_v7  ;;  %1133 = vmatmul.mubr.bf16.gmra.mrb[48].mxu1 %v2601_v7 }
  0x8d   : > { %901 = vmatprep.mubr.bf16.mxu0 %v2315_v2  ;;  %1142 = vmatprep.mubr.bf16.mxu1 %v2315_v2 }
  0x94   : > { %902 = vmatmul.mubr.bf16.gmra.mrb[52].mxu0 %v2608_v8  ;;  %1143 = vmatmul.mubr.bf16.gmra.mrb[52].mxu1 %v2608_v8 }
  0x95   : > { %911 = vmatprep.mubr.bf16.mxu0 %v2315_v2  ;;  %1152 = vmatprep.mubr.bf16.mxu1 %v2315_v2 }
  0x9c   : > { %912 = vmatmul.mubr.bf16.gmra.mrb[56].mxu0 %v2615_v9  ;;  %1153 = vmatmul.mubr.bf16.gmra.mrb[56].mxu1 %v2615_v9 }
  0x9d   : > { %921 = vmatprep.mubr.bf16.mxu0 %v2315_v2  ;;  %1162 = vmatprep.mubr.bf16.mxu1 %v2315_v2 }
  0xa4   : > { %922 = vmatmul.mubr.bf16.gmra.mrb[60].mxu0 %v2622_v10  ;;  %1163 = vmatmul.mubr.bf16.gmra.mrb[60].mxu1 %v2622_v10 }
  0xa5   : > { %1994 = vmatprep.mubr.bf16.mxu0 %v2480_v35  ;;  %2002 = vmatprep.mubr.bf16.mxu1 %v2601_v7 }
  0xac   : > { %1995 = vmatmul.mubr.bf16.vlgmr.msra.gmra.mrb[64].mxu0 %v2511_v44  ;;  %2003 = vmatmul.mubr.bf16.vlgmr.msra.gmra.mrb[64].mxu1 %v2608_v8 }
  0xad   : > { %1998 = vmatprep.mubr.bf16.mxu0 %v2542_v53  ;;  %2006 = vmatprep.mubr.bf16.mxu1 %v2615_v9 }
  0xb4   : > { %1999 = vmatmul.mubr.bf16.gmra.mrb[68].mxu0 %v2573_v62  ;;  %2007 = vmatmul.mubr.bf16.gmra.mrb[68].mxu1 %v2622_v10 }
  0xff   : > { %v387_v2 = vpop.f32.mrb[0].mxu0  ;;  %v612_v18 = vpop.f32.mrb[0].mxu1 }
 0x100   : > { %v389_v19 = vpop.f32.mrb[1].mxu0  ;;  %v2687_v20 = vpop.f32.mrb[1].mxu1 }
 0x101   : > { %v466_v21 = vmax.f32 %v387_v2, %v389_v19  ;;  %v391_v22 = vpop.f32.mrb[2].mxu0  ;;  %v616_v23 = vpop.f32.mrb[2].mxu1 }
 0x102   : > { %v393_v24 = vpop.f32.mrb[3].mxu0  ;;  %v2689_v25 = vpop.f32.mrb[3].mxu1 }
 0x103   : > { %v2691_v26 = vmax.f32 %v466_v21, %v612_v18  ;;  %v467_v27 = vmax.f32 %v391_v22, %v393_v24 }
 0x105   : > { %v707_v28 = vmax.f32 %v2691_v26, %v2687_v20  ;;  %v2695_v29 = vmax.f32 %v467_v27, %v616_v23 }
 0x107   : > { %v708_v30 = vmax.f32 %v2695_v29, %v2689_v25  ;;  %v397_v31 = vpop.f32.mrb[4].mxu0  ;;  %v622_v32 = vpop.f32.mrb[4].mxu1 }
 0x108   : > { %v399_v33 = vpop.f32.mrb[5].mxu0  ;;  %v2699_v34 = vpop.f32.mrb[5].mxu1 }
 0x109   : > { %v468_v35 = vmax.f32 %v397_v31, %v399_v33  ;;  %v401_v36 = vpop.f32.mrb[6].mxu0  ;;  %v626_v37 = vpop.f32.mrb[6].mxu1 }
 0x10a   : > { %v403_v38 = vpop.f32.mrb[7].mxu0  ;;  %v2701_v39 = vpop.f32.mrb[7].mxu1 }
 0x10b   : > { %v2703_v40 = vmax.f32 %v468_v35, %v622_v32  ;;  %v469_v41 = vmax.f32 %v401_v36, %v403_v38 }
 0x10d   : > { %v709_v42 = vmax.f32 %v2703_v40, %v2699_v34  ;;  %v2707_v43 = vmax.f32 %v469_v41, %v626_v37 }
 0x10f   : > { %v710_v44 = vmax.f32 %v2707_v43, %v2701_v39  ;;  %v407_v45 = vpop.f32.mrb[8].mxu0  ;;  %v632_v46 = vpop.f32.mrb[8].mxu1 }
 0x110   : > { %v409_v47 = vpop.f32.mrb[9].mxu0  ;;  %v2711_v48 = vpop.f32.mrb[9].mxu1 }
 0x111   : > { %v470_v49 = vmax.f32 %v407_v45, %v409_v47  ;;  %v411_v50 = vpop.f32.mrb[10].mxu0  ;;  %v636_v51 = vpop.f32.mrb[10].mxu1 }
 0x112   : > { %v413_v52 = vpop.f32.mrb[11].mxu0  ;;  %v2713_v53 = vpop.f32.mrb[11].mxu1 }
 0x113   : > { %v2715_v54 = vmax.f32 %v470_v49, %v632_v46  ;;  %v471_v55 = vmax.f32 %v411_v50, %v413_v52 }
 0x115   : > { %v711_v56 = vmax.f32 %v2715_v54, %v2711_v48  ;;  %v2719_v57 = vmax.f32 %v471_v55, %v636_v51 }
 0x117   : > { %v712_v58 = vmax.f32 %v2719_v57, %v2713_v53  ;;  %v417_v59 = vpop.f32.mrb[12].mxu0  ;;  %v642_v60 = vpop.f32.mrb[12].mxu1 }
 0x118   : > { %v419_v61 = vpop.f32.mrb[13].mxu0  ;;  %v2723_v62 = vpop.f32.mrb[13].mxu1 }
 0x119   : > { %v472_v63 = vmax.f32 %v417_v59, %v419_v61  ;;  %v421_v0 = vpop.f32.mrb[14].mxu0  ;;  %v646_v1 = vpop.f32.mrb[14].mxu1 }
 0x11a   : > { %v423_v3 = vpop.f32.mrb[15].mxu0  ;;  %v2725_v4 = vpop.f32.mrb[15].mxu1 }
 0x11b   : > { %v2727_v5 = vmax.f32 %v472_v63, %v642_v60  ;;  %v473_v6 = vmax.f32 %v421_v0, %v423_v3 }
 0x11d   : > { %v713_v7 = vmax.f32 %v2727_v5, %v2723_v62  ;;  %v2731_v8 = vmax.f32 %v473_v6, %v646_v1 }
 0x11f   : > { %v714_v9 = vmax.f32 %v2731_v8, %v2725_v4  ;;  %v427_v10 = vpop.f32.mrb[16].mxu0  ;;  %v652_v11 = vpop.f32.mrb[16].mxu1 }
 0x120   : > { %v429_v12 = vpop.f32.mrb[17].mxu0  ;;  %v2735_v13 = vpop.f32.mrb[17].mxu1 }
 0x121   : > { %v474_v14 = vmax.f32 %v427_v10, %v429_v12  ;;  %v431_v15 = vpop.f32.mrb[18].mxu0  ;;  %v656_v16 = vpop.f32.mrb[18].mxu1 }
 0x122   : > { %v433_v17 = vpop.f32.mrb[19].mxu0  ;;  %v2737_v2 = vpop.f32.mrb[19].mxu1 }
 0x123   : > { %v2739_v18 = vmax.f32 %v474_v14, %v652_v11  ;;  %v475_v19 = vmax.f32 %v431_v15, %v433_v17 }
 0x125   : > { %v715_v21 = vmax.f32 %v2739_v18, %v2735_v13  ;;  %v2743_v22 = vmax.f32 %v475_v19, %v656_v16 }
 0x127   : > { %v716_v23 = vmax.f32 %v2743_v22, %v2737_v2  ;;  %v437_v24 = vpop.f32.mrb[20].mxu0  ;;  %v662_v27 = vpop.f32.mrb[20].mxu1 }
 0x128   : > { %v439_v31 = vpop.f32.mrb[21].mxu0  ;;  %v2747_v32 = vpop.f32.mrb[21].mxu1 }
 0x129   : > { %v476_v33 = vmax.f32 %v437_v24, %v439_v31  ;;  %v441_v35 = vpop.f32.mrb[22].mxu0  ;;  %v666_v36 = vpop.f32.mrb[22].mxu1 }
 0x12a   : > { %v443_v37 = vpop.f32.mrb[23].mxu0  ;;  %v2749_v38 = vpop.f32.mrb[23].mxu1 }
 0x12b   : > { %v2751_v41 = vmax.f32 %v476_v33, %v662_v27  ;;  %v477_v45 = vmax.f32 %v441_v35, %v443_v37 }
 0x12d   : > { %v717_v46 = vmax.f32 %v2751_v41, %v2747_v32  ;;  %v2755_v47 = vmax.f32 %v477_v45, %v666_v36 }
 0x12f   : > { %v718_v49 = vmax.f32 %v2755_v47, %v2749_v38  ;;  %v447_v50 = vpop.f32.mrb[24].mxu0  ;;  %v672_v51 = vpop.f32.mrb[24].mxu1 }
 0x130   : > { %v449_v52 = vpop.f32.mrb[25].mxu0  ;;  %v2759_v55 = vpop.f32.mrb[25].mxu1 }
 0x131   : > { %v478_v59 = vmax.f32 %v447_v50, %v449_v52  ;;  %v451_v60 = vpop.f32.mrb[26].mxu0  ;;  %v676_v61 = vpop.f32.mrb[26].mxu1 }
 0x132   : > { %v453_v63 = vpop.f32.mrb[27].mxu0  ;;  %v2761_v0 = vpop.f32.mrb[27].mxu1 }
 0x133   : > { %v2763_v1 = vmax.f32 %v478_v59, %v672_v51  ;;  %v479_v3 = vmax.f32 %v451_v60, %v453_v63 }
 0x135   : > { %v719_v6 = vmax.f32 %v2763_v1, %v2759_v55  ;;  %v2767_v10 = vmax.f32 %v479_v3, %v676_v61 }
 0x137   : > { %v720_v11 = vmax.f32 %v2767_v10, %v2761_v0  ;;  %v457_v12 = vpop.f32.mrb[28].mxu0  ;;  %v682_v14 = vpop.f32.mrb[28].mxu1 }
 0x138   : > { %v459_v15 = vpop.f32.mrb[29].mxu0  ;;  %v2771_v16 = vpop.f32.mrb[29].mxu1 }
 0x139   : > { %v480_v17 = vmax.f32 %v457_v12, %v459_v15  ;;  %v461_v19 = vpop.f32.mrb[30].mxu0  ;;  %v686_v24 = vpop.f32.mrb[30].mxu1 }
 0x13a   : > { %v463_v27 = vpop.f32.mrb[31].mxu0  ;;  %v2773_v31 = vpop.f32.mrb[31].mxu1 }
 0x13b   : > { %v2775_v33 = vmax.f32 %v480_v17, %v682_v14  ;;  %v481_v35 = vmax.f32 %v461_v19, %v463_v27 }
 0x13d   : > { %v721_v36 = vmax.f32 %v2775_v33, %v2771_v16  ;;  %v2779_v37 = vmax.f32 %v481_v35, %v686_v24  ;;  %v2906_v16 = vld [vmem:[%s3073_s2] ss:$0 sm:$0xff] }
 0x13f   : > { %v722_v45 = vmax.f32 %v2779_v37, %v2773_v31  ;;  %v853_v50 = vpop.f32.mrb[32].mxu0  ;;  %v1094_v51 = vpop.f32.mrb[32].mxu1 }
 0x140   : > { %v932_v52 = vmax.f32 %v707_v28, %v853_v50  ;;  %v855_v59 = vpop.f32.mrb[33].mxu0  ;;  %v2786_v60 = vpop.f32.mrb[33].mxu1 }
 0x141   : > { %v857_v61 = vpop.f32.mrb[34].mxu0  ;;  %v1098_v63 = vpop.f32.mrb[34].mxu1 }
 0x142   : > { %v948_v3 = vmax.f32 %v932_v52, %v855_v59  ;;  %v933_v12 = vmax.f32 %v708_v30, %v857_v61  ;;  %v859_v14 = vpop.f32.mrb[35].mxu0  ;;  %v2791_v15 = vpop.f32.mrb[35].mxu1 }
 0x144   : > { %v2793_v17 = vmax.f32 %v948_v3, %v1094_v51  ;;  %v949_v19 = vmax.f32 %v933_v12, %v859_v14 }
 0x146   : > { %v1189_v20 = vmax.f32 %v2793_v17, %v2786_v60  ;;  %v2797_v26 = vmax.f32 %v949_v19, %v1098_v63 }
 0x147   : > { %v863_v28 = vpop.f32.mrb[36].mxu0  ;;  %v1104_v24 = vpop.f32.mrb[36].mxu1 }
 0x148   : > { %v1190_v27 = vmax.f32 %v2797_v26, %v2791_v15  ;;  %v934_v25 = vmax.f32 %v709_v42, %v863_v28  ;;  %v865_v29 = vpop.f32.mrb[37].mxu0  ;;  %v2804_v30 = vpop.f32.mrb[37].mxu1 }
 0x149   : > { %v867_v35 = vpop.f32.mrb[38].mxu0  ;;  %v1108_v50 = vpop.f32.mrb[38].mxu1 }
 0x14a   : > { %v950_v51 = vmax.f32 %v934_v25, %v865_v29  ;;  %v935_v52 = vmax.f32 %v710_v44, %v867_v35  ;;  %v869_v59 = vpop.f32.mrb[39].mxu0  ;;  %v2809_v61 = vpop.f32.mrb[39].mxu1 }
 0x14c   : > { %v2811_v63 = vmax.f32 %v950_v51, %v1104_v24  ;;  %v951_v3 = vmax.f32 %v935_v52, %v869_v59 }
 0x14e   : > { %v1191_v34 = vmax.f32 %v2811_v63, %v2804_v30  ;;  %v2815_v40 = vmax.f32 %v951_v3, %v1108_v50 }
 0x14f   : > { %v873_v42 = vpop.f32.mrb[40].mxu0  ;;  %v1114_v12 = vpop.f32.mrb[40].mxu1 }
 0x150   : > { %v1192_v14 = vmax.f32 %v2815_v40, %v2809_v61  ;;  %v936_v39 = vmax.f32 %v711_v56, %v873_v42  ;;  %v875_v43 = vpop.f32.mrb[41].mxu0  ;;  %v2822_v44 = vpop.f32.mrb[41].mxu1 }
 0x151   : > { %v877_v19 = vpop.f32.mrb[42].mxu0  ;;  %v1118_v28 = vpop.f32.mrb[42].mxu1 }
 0x152   : > { %v952_v24 = vmax.f32 %v936_v39, %v875_v43  ;;  %v937_v25 = vmax.f32 %v712_v58, %v877_v19  ;;  %v879_v29 = vpop.f32.mrb[43].mxu0  ;;  %v2827_v35 = vpop.f32.mrb[43].mxu1 }
 0x154   : > { %v2829_v50 = vmax.f32 %v952_v24, %v1114_v12  ;;  %v953_v51 = vmax.f32 %v937_v25, %v879_v29 }
 0x156   : > { %v1193_v48 = vmax.f32 %v2829_v50, %v2822_v44  ;;  %v2833_v54 = vmax.f32 %v953_v51, %v1118_v28 }
 0x157   : > { %v883_v56 = vpop.f32.mrb[44].mxu0  ;;  %v1124_v52 = vpop.f32.mrb[44].mxu1 }
 0x158   : > { %v1194_v59 = vmax.f32 %v2833_v54, %v2827_v35  ;;  %v938_v53 = vmax.f32 %v713_v7, %v883_v56  ;;  %v885_v57 = vpop.f32.mrb[45].mxu0  ;;  %v2840_v58 = vpop.f32.mrb[45].mxu1 }
 0x159   : > { %v887_v3 = vpop.f32.mrb[46].mxu0  ;;  %v1128_v42 = vpop.f32.mrb[46].mxu1 }
 0x15a   : > { %v954_v12 = vmax.f32 %v938_v53, %v885_v57  ;;  %v939_v39 = vmax.f32 %v714_v9, %v887_v3  ;;  %v889_v43 = vpop.f32.mrb[47].mxu0  ;;  %v2845_v19 = vpop.f32.mrb[47].mxu1 }
 0x15c   : > { %v2847_v28 = vmax.f32 %v954_v12, %v1124_v52  ;;  %v955_v24 = vmax.f32 %v939_v39, %v889_v43 }
 0x15e   : > { %v1195_v62 = vmax.f32 %v2847_v28, %v2840_v58  ;;  %v2851_v5 = vmax.f32 %v955_v24, %v1128_v42 }
 0x15f   : > { %v893_v7 = vpop.f32.mrb[48].mxu0  ;;  %v1134_v25 = vpop.f32.mrb[48].mxu1 }
 0x160   : > { %v1196_v29 = vmax.f32 %v2851_v5, %v2845_v19  ;;  %v940_v4 = vmax.f32 %v715_v21, %v893_v7  ;;  %v895_v8 = vpop.f32.mrb[49].mxu0  ;;  %v2858_v9 = vpop.f32.mrb[49].mxu1 }
 0x161   : > { %v897_v51 = vpop.f32.mrb[50].mxu0  ;;  %v1138_v56 = vpop.f32.mrb[50].mxu1 }
 0x162   : > { %v956_v52 = vmax.f32 %v940_v4, %v895_v8  ;;  %v941_v53 = vmax.f32 %v716_v23, %v897_v51  ;;  %v899_v57 = vpop.f32.mrb[51].mxu0  ;;  %v2863_v3 = vpop.f32.mrb[51].mxu1 }
 0x164   : > { %v2865_v42 = vmax.f32 %v956_v52, %v1134_v25  ;;  %v957_v12 = vmax.f32 %v941_v53, %v899_v57 }
 0x166   : > { %v1197_v13 = vmax.f32 %v2865_v42, %v2858_v9  ;;  %v2869_v18 = vmax.f32 %v957_v12, %v1138_v56 }
 0x167   : > { %v903_v21 = vpop.f32.mrb[52].mxu0  ;;  %v1144_v39 = vpop.f32.mrb[52].mxu1 }
 0x168   : > { %v1198_v43 = vmax.f32 %v2869_v18, %v2863_v3  ;;  %v942_v2 = vmax.f32 %v717_v46, %v903_v21  ;;  %v905_v22 = vpop.f32.mrb[53].mxu0  ;;  %v1146_v23 = vpop.f32.mrb[53].mxu1 }
 0x169   : > { %v907_v24 = vpop.f32.mrb[54].mxu0  ;;  %v1148_v7 = vpop.f32.mrb[54].mxu1 }
 0x16a   : > { %v958_v25 = vmax.f32 %v942_v2, %v905_v22  ;;  %v943_v4 = vmax.f32 %v718_v49, %v907_v24  ;;  %v909_v8 = vpop.f32.mrb[55].mxu0  ;;  %v1150_v9 = vpop.f32.mrb[55].mxu1 }
 0x16c   : > { %v1183_v51 = vmax.f32 %v958_v25, %v1144_v39  ;;  %v959_v56 = vmax.f32 %v943_v4, %v909_v8 }
 0x16e   : > { %v1199_v52 = vmax.f32 %v1183_v51, %v1146_v23  ;;  %v1184_v53 = vmax.f32 %v959_v56, %v1148_v7 }
 0x16f   : > { %v913_v57 = vpop.f32.mrb[56].mxu0  ;;  %v1154_v42 = vpop.f32.mrb[56].mxu1 }
 0x170   : > { %v1200_v12 = vmax.f32 %v1184_v53, %v1150_v9  ;;  %v944_v32 = vmax.f32 %v719_v6, %v913_v57  ;;  %v915_v41 = vpop.f32.mrb[57].mxu0  ;;  %v2882_v46 = vpop.f32.mrb[57].mxu1 }
 0x171   : > { %v917_v21 = vpop.f32.mrb[58].mxu0  ;;  %v1158_v2 = vpop.f32.mrb[58].mxu1 }
 0x172   : > { %v960_v38 = vmax.f32 %v944_v32, %v915_v41  ;;  %v945_v47 = vmax.f32 %v720_v11, %v917_v21  ;;  %v919_v49 = vpop.f32.mrb[59].mxu0  ;;  %v2887_v39 = vpop.f32.mrb[59].mxu1 }
 0x174   : > { %v2889_v22 = vmax.f32 %v960_v38, %v1154_v42  ;;  %v961_v23 = vmax.f32 %v945_v47, %v919_v49 }
 0x176   : > { %v1201_v55 = vmax.f32 %v2889_v22, %v2882_v46  ;;  %v2893_v1 = vmax.f32 %v961_v23, %v1158_v2 }
 0x177   : > { %v923_v6 = vpop.f32.mrb[60].mxu0  ;;  %v1164_v24 = vpop.f32.mrb[60].mxu1 }
 0x178   : > { %v1202_v7 = vmax.f32 %v2893_v1, %v2887_v39  ;;  %v946_v0 = vmax.f32 %v721_v36, %v923_v6  ;;  %v925_v10 = vpop.f32.mrb[61].mxu0  ;;  %v1166_v11 = vpop.f32.mrb[61].mxu1 }
 0x179   : > { %v927_v25 = vpop.f32.mrb[62].mxu0  ;;  %v1168_v4 = vpop.f32.mrb[62].mxu1 }
 0x17a   : > { %v962_v8 = vmax.f32 %v946_v0, %v925_v10  ;;  %v947_v9 = vmax.f32 %v722_v45, %v927_v25  ;;  %v929_v51 = vpop.f32.mrb[63].mxu0  ;;  %v1170_v56 = vpop.f32.mrb[63].mxu1 }
 0x17c   : > { %v1187_v53 = vmax.f32 %v962_v8, %v1164_v24  ;;  %v963_v57 = vmax.f32 %v947_v9, %v929_v51 }
 0x17e   : > { %v1203_v42 = vmax.f32 %v1187_v53, %v1166_v11  ;;  %v1188_v32 = vmax.f32 %v963_v57, %v1168_v4 }
 0x17f   : > { %v1996_v41 = vpop.f32.mrb[64].mxu0  ;;  %v2004_v33 = vpop.f32.mrb[64].mxu1 }
 0x180   : > { %v1204_v36 = vmax.f32 %v1188_v32, %v1170_v56  ;;  %v1368_v31 = vmax.f32 %v1191_v34, %v1996_v41  ;;  %v1376_v37 = vmax.f32 %v1199_v52, %v2004_v33  ;;  %v1303_v45 = vpop.f32.mrb[65].mxu0  ;;  %v1335_v21 = vpop.f32.mrb[65].mxu1 }
 0x181   : > { %v1366_v2 = vmax.f32 %v1189_v20, %v1303_v45  ;;  %v1374_v38 = vmax.f32 %v1197_v13, %v1335_v21  ;;  %v1997_v47 = vpop.f32.mrb[66].mxu0  ;;  %v2005_v49 = vpop.f32.mrb[66].mxu1 }
 0x182   : > { %v1391_v23 = vadd.f32 %v2906_v16, %v1368_v31  ;;  %v1399_v6 = vadd.f32 %v2906_v16, %v1376_v37  ;;  %v1369_v30 = vmax.f32 %v1192_v14, %v1997_v47  ;;  %v1377_v63 = vmax.f32 %v1200_v12, %v2005_v49  ;;  %v1306_v34 = vpop.f32.mrb[67].mxu0  ;;  %v1338_v52 = vpop.f32.mrb[67].mxu1 }
 0x183   : > { %v1389_v24 = vadd.f32 %v2906_v16, %v1366_v2  ;;  %v1397_v0 = vadd.f32 %v2906_v16, %v1374_v38  ;;  %v1367_v60 = vmax.f32 %v1190_v27, %v1306_v34  ;;  %v1375_v17 = vmax.f32 %v1198_v43, %v1338_v52 }
 0x184   : > { %v1392_v20 = vadd.f32 %v2906_v16, %v1369_v30  ;;  %v1400_v61 = vadd.f32 %v2906_v16, %v1377_v63  ;;  %v1407_v13 = vmax.f32 %v1391_v23, 0.0  ;;  %v1415_v12 = vmax.f32 %v1399_v6, 0.0 }
 0x185   : > { %v1390_v40 = vadd.f32 %v2906_v16, %v1367_v60  ;;  %v1398_v14 = vadd.f32 %v2906_v16, %v1375_v17  ;;  %v1405_v25 = vmax.f32 %v1389_v24, 0.0  ;;  %v1413_v4 = vmax.f32 %v1397_v0, 0.0 }
 0x186   : > { %v1408_v10 = vmax.f32 %v1392_v20, 0.0  ;;  %v1416_v11 = vmax.f32 %v1400_v61, 0.0 }
 0x187   : > { %v1406_v15 = vmax.f32 %v1390_v40, 0.0  ;;  %v1414_v26 = vmax.f32 %v1398_v14, 0.0  ;;  %v2000_v27 = vpop.f32.mrb[68].mxu0  ;;  %v2008_v8 = vpop.f32.mrb[68].mxu1 }
 0x188   : > { %v1923_v3 = vpack.c.bf16 %v1408_v10, %v1407_v13  ;;  %v1943_v18 = vpack.c.bf16 %v1416_v11, %v1415_v12  ;;  %v1372_v43 = vmax.f32 %v1195_v62, %v2000_v27  ;;  %v1380_v9 = vmax.f32 %v1203_v42, %v2008_v8  ;;  %v1319_v51 = vpop.f32.mrb[69].mxu0  ;;  %v1351_v56 = vpop.f32.mrb[69].mxu1 }
 0x189   : > { %v1918_v53 = vpack.c.bf16 %v1406_v15, %v1405_v25  ;;  %v1938_v57 = vpack.c.bf16 %v1414_v26, %v1413_v4  ;;  %v1370_v32 = vmax.f32 %v1193_v48, %v1319_v51  ;;  %v1378_v41 = vmax.f32 %v1201_v55, %v1351_v56  ;;  %v2001_v33 = vpop.f32.mrb[70].mxu0  ;;  %v2009_v31 = vpop.f32.mrb[70].mxu1 }
 0x18a   : > { %1955 = vst [vmem:[%s2941_s10 + $0x8] sm:$0xff] %v1923_v3   ;;  %1959 = vst [vmem:[%s2941_s10 + $0x28] sm:$0xff] %v1943_v18   ;;  %v1395_v58 = vadd.f32 %v2906_v16, %v1372_v43  ;;  %v1403_v28 = vadd.f32 %v2906_v16, %v1380_v9  ;;  %v1373_v44 = vmax.f32 %v1196_v29, %v2001_v33  ;;  %v1322_v48 = vpop.f32.mrb[71].mxu0  ;;  %v1354_v62 = vpop.f32.mrb[71].mxu1 }
 0x18b   : > { %v1381_v50 = vmax.f32 %v1204_v36, %v2009_v31  ;;  %1919 = vst [vmem:[%s2941_s10] sm:$0xff] %v1918_v53   ;;  %1958 = vst [vmem:[%s2941_s10 + $0x20] sm:$0xff] %v1938_v57   ;;  %v1393_v46 = vadd.f32 %v2906_v16, %v1370_v32  ;;  %v1401_v22 = vadd.f32 %v2906_v16, %v1378_v41 }
 0x18c   : > { %v1371_v55 = vmax.f32 %v1194_v59, %v1322_v48  ;;  %v1379_v42 = vmax.f32 %v1202_v7, %v1354_v62  ;;  %v1396_v19 = vadd.f32 %v2906_v16, %v1373_v44  ;;  %v1411_v37 = vmax.f32 %v1395_v58, 0.0 }
 0x18d   : > { %v1404_v5 = vadd.f32 %v2906_v16, %v1381_v50  ;;  %v1419_v45 = vmax.f32 %v1403_v28, 0.0  ;;  %v1409_v59 = vmax.f32 %v1393_v46, 0.0  ;;  %v1417_v21 = vmax.f32 %v1401_v22, 0.0 }
 0x18e   : > { %v1394_v29 = vadd.f32 %v2906_v16, %v1371_v55  ;;  %v1402_v36 = vadd.f32 %v2906_v16, %v1379_v42  ;;  %v1412_v35 = vmax.f32 %v1396_v19, 0.0  ;;  %1507 = sbr.rel (!%p2361_p4) target bundleno = 464 (0x1d0), region = 36 }
 0x18f   : > { %v1420_v54 = vmax.f32 %v1404_v5, 0.0 }
 0x190   : > { %v1410_v39 = vmax.f32 %v1394_v29, 0.0  ;;  %v1418_v1 = vmax.f32 %v1402_v36, 0.0  ;;  %v1933_v7 = vpack.c.bf16 %v1412_v35, %v1411_v37 }
 0x191   : > { %v1953_v2 = vpack.c.bf16 %v1420_v54, %v1419_v45 }
 0x192   : > { %v1928_v38 = vpack.c.bf16 %v1410_v39, %v1409_v59  ;;  %v1948_v47 = vpack.c.bf16 %v1418_v1, %v1417_v21  ;;  %1957 = vst [vmem:[%s2941_s10 + $0x18] sm:$0xff] %v1933_v7  }
 0x193   : > { %1961 = vst [vmem:[%s2941_s10 + $0x38] sm:$0xff] %v1953_v2  }
 0x194   : > { %1956 = vst [vmem:[%s2941_s10 + $0x10] sm:$0xff] %v1928_v38   ;;  %1960 = vst [vmem:[%s2941_s10 + $0x30] sm:$0xff] %v1948_v47  }
 0x195   : > { %s3083_s11 = smov (!%p1510_p8, %s1509_s11), 16 }
 0x196   : > { %s1881_s22 = sshll.u32 %s3083_s11, 6 }
 0x197   : > { %p1884_p9 = scmp.eq.s32.totalorder %s1881_s22, 0 }
 0x198   : > { %s2981_s23 = sshrl.u32 (!%p1884_p9), %s3083_s11, 4 }
 0x199   : > { %1518 = sbr.rel (%p1884_p9) target bundleno = 464 (0x1d0), region = 40  ;;  %p1885_p10 = scmp.le.s32.totalorder (!%p1884_p9), %s2981_s23, 0 }
 0x1a0   : > { %1731 = sbr.rel (%p1885_p10) target bundleno = 443 (0x1bb), region = 112  ;;  %s3076_s15 = smov (!%p1885_p10), %s2975_s8 }
 0x1a1   : > { %s3077_s20 = smov (!%p1885_p10), %s2941_s10  ;;  %s2990_s14 = smov (!%p1885_p10), 0  }
 0x1a2   : > { %s2992_s24 = smov (!%p1885_p10), 0  }
 0x1a7 LB: >> { %v1534_v16 = vld [vmem:[%s2289_s20] sm:$0xf]  ;;  %v1536_v49 = vld [vmem:[%s2289_s20 + $0x4] sm:$0xf]  ;;  %v1538_v23 = vld [vmem:[%s2289_s20 + $0x8] sm:$0xf]  ;;  %s2297_s24 = sphi %s2992_s24, %s1528_s24   ;;  %s2293_s14 = sphi %s2990_s14, %s3078_s14   ;;  %s2289_s20 = sphi %s3077_s20, %s1571_s20   ;;  %s2285_s15 = sphi %s3076_s15, %s1572_s15  }
 0x1a8   : >> { %1535 = vst [vmem:[%s2285_s15] sm:$0xf] %v1534_v16  ;;  %1537 = vst [vmem:[%s2285_s15 + $0x4] sm:$0xf] %v1536_v49  ;;  %v1540_v6 = vld [vmem:[%s2289_s20 + $0xc] sm:$0xf]  ;;  %s1566_s25 = sadd.s32 1, %s2293_s14 }
 0x1a9   : >> { %1539 = vst [vmem:[%s2285_s15 + $0x8] sm:$0xf] %v1538_v23  ;;  %v1542_v30 = vld [vmem:[%s2289_s20 + $0x10] sm:$0xf]  ;;  %v1544_v63 = vld [vmem:[%s2289_s20 + $0x14] sm:$0xf]  ;;  %p1567_p11 = scmp.ge.s32.totalorder %s1566_s25, %s2981_s23 }
 0x1aa   : >> { %1541 = vst [vmem:[%s2285_s15 + $0xc] sm:$0xf] %v1540_v6  ;;  %1543 = vst [vmem:[%s2285_s15 + $0x10] sm:$0xf] %v1542_v30  ;;  %v1546_v34 = vld [vmem:[%s2289_s20 + $0x18] sm:$0xf] }
 0x1ab   : >> { %1545 = vst [vmem:[%s2285_s15 + $0x14] sm:$0xf] %v1544_v63  ;;  %v1548_v52 = vld [vmem:[%s2289_s20 + $0x1c] sm:$0xf]  ;;  %v1550_v24 = vld [vmem:[%s2289_s20 + $0x20] sm:$0xf] }
 0x1ac   : >> { %1547 = vst [vmem:[%s2285_s15 + $0x18] sm:$0xf] %v1546_v34  ;;  %1549 = vst [vmem:[%s2285_s15 + $0x1c] sm:$0xf] %v1548_v52  ;;  %v1552_v0 = vld [vmem:[%s2289_s20 + $0x24] sm:$0xf] }
 0x1ad   : >> { %1551 = vst [vmem:[%s2285_s15 + $0x20] sm:$0xf] %v1550_v24  ;;  %v1554_v60 = vld [vmem:[%s2289_s20 + $0x28] sm:$0xf]  ;;  %v1556_v17 = vld [vmem:[%s2289_s20 + $0x2c] sm:$0xf] }
 0x1ae   : >> { %1553 = vst [vmem:[%s2285_s15 + $0x24] sm:$0xf] %v1552_v0  ;;  %1555 = vst [vmem:[%s2285_s15 + $0x28] sm:$0xf] %v1554_v60  ;;  %v1558_v20 = vld [vmem:[%s2289_s20 + $0x30] sm:$0xf] }
 0x1af   : >> { %1557 = vst [vmem:[%s2285_s15 + $0x2c] sm:$0xf] %v1556_v17  ;;  %v1560_v61 = vld [vmem:[%s2289_s20 + $0x34] sm:$0xf]  ;;  %v1562_v40 = vld [vmem:[%s2289_s20 + $0x38] sm:$0xf] }
 0x1b0   : >> { %1559 = vst [vmem:[%s2285_s15 + $0x30] sm:$0xf] %v1558_v20  ;;  %1561 = vst [vmem:[%s2285_s15 + $0x34] sm:$0xf] %v1560_v61  ;;  %v1564_v14 = vld [vmem:[%s2289_s20 + $0x3c] sm:$0xf] }
 0x1b1   : >> { %1563 = vst [vmem:[%s2285_s15 + $0x38] sm:$0xf] %v1562_v40  ;;  %1565 = vst [vmem:[%s2285_s15 + $0x3c] sm:$0xf] %v1564_v14  ;;  %s3085_s25 = smov (%p1567_p11, %s1566_s25), 0  ;;  %s1528_s24 = sadd.s32 1, %s2297_s24  }
 0x1b2   : >> { %s1886_s26 = sshll.u32 %s3085_s25, 6  ;;  %p1527_p12 = scmp.ge.s32.totalorder %s1528_s24, %s2981_s23 }
 0x1b3   : >> { %s1571_s20 = scalar_lea.vmem %s2941_s10, %s1886_s26 [#allocation2]   ;;  %s1572_s15 = scalar_lea.vmem %s2975_s8, %s1886_s26  }
 0x1b4   : >> { %s3078_s14 = smov %s3085_s25  ;;  %1530 = sbr.rel (!%p1527_p12) target bundleno = 423 (0x1a7), region = 118 }
 0x1bb PF: > { %s3053_s27 = sand.u32 15, %s3083_s11   ;;  %s1913_s28 = sshll.u32 %s2981_s23, 6 }
 0x1bc   : > { %s1577_s29 = scalar_lea.vmem %s2941_s10, %s1913_s28 [#allocation2]   ;;  %s1579_s30 = scalar_lea.vmem %s2975_s8, %s1913_s28  }
 0x1bd   : > { %p1891_p13 = scmp.le.s32.totalorder %s3053_s27, 0 }
 0x1be   : > { %s2299_s4 = smov (!%p1891_p13), %s1579_s30   ;;  %s2303_s5 = smov (!%p1891_p13), %s1577_s29  }
 0x1bf   : > { %1745 = sbr.rel (%p1891_p13) target bundleno = 464 (0x1d0), region = 123  ;;  %s2307_s6 = smov (!%p1891_p13), 0  }
 0x1c0   : > { %s2311_s7 = smov (!%p1891_p13), 0  }
 0x1c6 LB: >> { %v1589_v13 = vld [vmem:[%s2305_s5] sm:$0xf]  ;;  %s1591_s9 = sadd.s32 1, %s2309_s6  ;;  %s1583_s7 = sadd.s32 1, %s2313_s7   ;;  %s2313_s7 = sphi %s2311_s7, %s1583_s7   ;;  %s2309_s6 = sphi %s2307_s6, %s2308_s6   ;;  %s2305_s5 = sphi %s2303_s5, %s1596_s5   ;;  %s2301_s4 = sphi %s2299_s4, %s1597_s4  }
 0x1c7   : >> { %1590 = vst [vmem:[%s2301_s4] sm:$0xf] %v1589_v13  ;;  %p1592_p0 = scmp.ge.s32.totalorder %s1591_s9, %s3053_s27  ;;  %p1582_p1 = scmp.ge.s32.totalorder %s1583_s7, %s3053_s27 }
 0x1c9   : >> { %s3087_s9 = smov (%p1592_p0, %s1591_s9), 0  ;;  %1585 = sbr.rel (!%p1582_p1) target bundleno = 454 (0x1c6), region = 129 }
 0x1ca   : >> { %s1892_s12 = sshll.u32 %s3087_s9, 2  ;;  %s2308_s6 = smov %s3087_s9  }
 0x1cb   : >> { %s1596_s5 = scalar_lea.vmem %s1577_s29, %s1892_s12 [#allocation2]   ;;  %s1597_s4 = scalar_lea.vmem %s1579_s30, %s1892_s12  }
 0x1d0 PF: > { %p10_p2 = scmp.ge.s32.totalorder %s2351_s16, 9   ;;  %s3079_s12 = smov %s2277_s13 }
 0x1d1   : > { %s3080_s13 = smov %s2359_s19  ;;  %s3081_s14 = smov %s2351_s16 }
 0x1d2   :  { %12 = sbr.rel (!%p10_p2) target bundleno = 2 (0x2), region = 140 }

// kernel: _lambda_.4
= control target key start
LH: loop header
LB: loop body
LE: loop exit
PB: predicated region body
PF: predicated region fallthrough
CT: control target
= control target key end

     0   :  { %s4766_s1 = inlined_call_operand.vmem [shape: bf16[512,1152], index: 1, kind: input, shape index: {}]   ;;  %s4767_s0 = inlined_call_operand.vmem [shape: bf16[50,512], index: 0, kind: input, shape index: {}]   ;;  %s4768_s2 = inlined_call_operand.vmem [shape: f32[1,128], index: 2, kind: input, shape index: {}]   ;;  %s4769_s3 = inlined_call_operand.vmem [shape: bf16[50,128], index: 3, kind: output, shape index: {}]  }
   0x1   :  { %v3188_v0 = vld [vmem:[%s4766_s1 + $0x4] ss:$36 sps:$4 sm:$0xff]   ;;  %v3190_v1 = vld [vmem:[%s4766_s1 + $0xc] ss:$36 sps:$4 sm:$0xff]   ;;  %v3196_v5 = vld [vmem:[%s4766_s1 + $0x54] ss:$36 sps:$4 sm:$0xff]  }
   0x2   :  { %487 = vmatprep.subr.bf16.mxu0 %v3188_v0  ;;  %v3192_v2 = vld [vmem:[%s4766_s1] ss:$36 sps:$4 sm:$0xff]   ;;  %v3193_v3 = vld [vmem:[%s4766_s1 + $0x8] ss:$36 sps:$4 sm:$0xff]   ;;  %1020 = vmatprep.subr.bf16.mxu1 %v3190_v1  ;;  %v3199_v7 = vld [vmem:[%s4766_s1 + $0x50] ss:$36 sps:$4 sm:$0xff]  }
   0x3   :  { %v3194_v4 = vld [vmem:[%s4766_s1 + $0x4c] ss:$36 sps:$4 sm:$0xff]   ;;  %488 = vmatpush1.bf16.msra.mxu0 %v3192_v2  ;;  %1021 = vmatpush1.bf16.msra.mxu1 %v3193_v3  ;;  %v3200_v8 = vld [vmem:[%s4766_s1 + $0x94] ss:$36 sps:$4 sm:$0xff]   ;;  %v3202_v9 = vld [vmem:[%s4766_s1 + $0x9c] ss:$36 sps:$4 sm:$0xff]  }
   0x4   :  { %v3198_v6 = vld [vmem:[%s4766_s1 + $0x48] ss:$36 sps:$4 sm:$0xff]   ;;  %489 = vmatprep.subr.bf16.mxu0 %v3194_v4  ;;  %1022 = vmatprep.subr.bf16.mxu1 %v3196_v5  ;;  %v3204_v10 = vld [vmem:[%s4766_s1 + $0x90] ss:$36 sps:$4 sm:$0xff]   ;;  %v3205_v11 = vld [vmem:[%s4766_s1 + $0x98] ss:$36 sps:$4 sm:$0xff]  }
   0x5   :  { %v3206_v12 = vld [vmem:[%s4766_s1 + $0xdc] ss:$36 sps:$4 sm:$0xff]   ;;  %v3208_v13 = vld [vmem:[%s4766_s1 + $0xe4] ss:$36 sps:$4 sm:$0xff]   ;;  %v3214_v17 = vld [vmem:[%s4766_s1 + $0x12c] ss:$36 sps:$4 sm:$0xff]  }
   0x6   :  { %v3210_v14 = vld [vmem:[%s4766_s1 + $0xd8] ss:$36 sps:$4 sm:$0xff]   ;;  %v3211_v15 = vld [vmem:[%s4766_s1 + $0xe0] ss:$36 sps:$4 sm:$0xff]   ;;  %v3217_v19 = vld [vmem:[%s4766_s1 + $0x128] ss:$36 sps:$4 sm:$0xff]  }
   0x7   :  { %490 = vmatpush1.bf16.msra.mxu0 %v3198_v6  ;;  %1023 = vmatpush1.bf16.msra.mxu1 %v3199_v7  ;;  %v3212_v16 = vld [vmem:[%s4766_s1 + $0x124] ss:$36 sps:$4 sm:$0xff]   ;;  %v3218_v20 = vld [vmem:[%s4766_s1 + $0x16c] ss:$36 sps:$4 sm:$0xff]   ;;  %v3220_v21 = vld [vmem:[%s4766_s1 + $0x174] ss:$36 sps:$4 sm:$0xff]  }
   0x8   :  { %491 = vmatprep.subr.bf16.mxu0 %v3200_v8  ;;  %1024 = vmatprep.subr.bf16.mxu1 %v3202_v9  ;;  %v3216_v18 = vld [vmem:[%s4766_s1 + $0x120] ss:$36 sps:$4 sm:$0xff]   ;;  %v3222_v22 = vld [vmem:[%s4766_s1 + $0x168] ss:$36 sps:$4 sm:$0xff]   ;;  %v3223_v23 = vld [vmem:[%s4766_s1 + $0x170] ss:$36 sps:$4 sm:$0xff]  }
   0x9   :  { %v3224_v24 = vld [vmem:[%s4766_s1 + $0x1b4] ss:$36 sps:$4 sm:$0xff]   ;;  %v3226_v25 = vld [vmem:[%s4766_s1 + $0x1bc] ss:$36 sps:$4 sm:$0xff]   ;;  %v3232_v29 = vld [vmem:[%s4766_s1 + $0x204] ss:$36 sps:$4 sm:$0xff]  }
   0xa   :  { %v3228_v26 = vld [vmem:[%s4766_s1 + $0x1b0] ss:$36 sps:$4 sm:$0xff]   ;;  %v3229_v27 = vld [vmem:[%s4766_s1 + $0x1b8] ss:$36 sps:$4 sm:$0xff]   ;;  %v3235_v31 = vld [vmem:[%s4766_s1 + $0x200] ss:$36 sps:$4 sm:$0xff]  }
   0xb   :  { %492 = vmatpush1.bf16.msra.mxu0 %v3204_v10  ;;  %1025 = vmatpush1.bf16.msra.mxu1 %v3205_v11  ;;  %v3230_v28 = vld [vmem:[%s4766_s1 + $0x1fc] ss:$36 sps:$4 sm:$0xff]   ;;  %v3236_v32 = vld [vmem:[%s4766_s1 + $0x244] ss:$36 sps:$4 sm:$0xff]   ;;  %v3238_v33 = vld [vmem:[%s4766_s1 + $0x24c] ss:$36 sps:$4 sm:$0xff]  }
   0xc   :  { %493 = vmatprep.subr.bf16.mxu0 %v3206_v12  ;;  %1026 = vmatprep.subr.bf16.mxu1 %v3208_v13  ;;  %v3234_v30 = vld [vmem:[%s4766_s1 + $0x1f8] ss:$36 sps:$4 sm:$0xff]   ;;  %v3240_v34 = vld [vmem:[%s4766_s1 + $0x240] ss:$36 sps:$4 sm:$0xff]   ;;  %v3241_v35 = vld [vmem:[%s4766_s1 + $0x248] ss:$36 sps:$4 sm:$0xff]  }
   0xd   :  { %v3242_v36 = vld [vmem:[%s4766_s1 + $0x28c] ss:$36 sps:$4 sm:$0xff]   ;;  %v3244_v37 = vld [vmem:[%s4766_s1 + $0x294] ss:$36 sps:$4 sm:$0xff]   ;;  %v3250_v41 = vld [vmem:[%s4766_s1 + $0x2dc] ss:$36 sps:$4 sm:$0xff]  }
   0xe   :  { %v3246_v38 = vld [vmem:[%s4766_s1 + $0x288] ss:$36 sps:$4 sm:$0xff]   ;;  %v3247_v39 = vld [vmem:[%s4766_s1 + $0x290] ss:$36 sps:$4 sm:$0xff]   ;;  %v3253_v43 = vld [vmem:[%s4766_s1 + $0x2d8] ss:$36 sps:$4 sm:$0xff]  }
   0xf   :  { %494 = vmatpush1.bf16.msra.mxu0 %v3210_v14  ;;  %1027 = vmatpush1.bf16.msra.mxu1 %v3211_v15  ;;  %v3248_v40 = vld [vmem:[%s4766_s1 + $0x2d4] ss:$36 sps:$4 sm:$0xff]   ;;  %v3254_v44 = vld [vmem:[%s4766_s1 + $0x31c] ss:$36 sps:$4 sm:$0xff]   ;;  %v3256_v45 = vld [vmem:[%s4766_s1 + $0x324] ss:$36 sps:$4 sm:$0xff]  }
  0x10   :  { %495 = vmatprep.subr.bf16.mxu0 %v3212_v16  ;;  %1028 = vmatprep.subr.bf16.mxu1 %v3214_v17  ;;  %v3252_v42 = vld [vmem:[%s4766_s1 + $0x2d0] ss:$36 sps:$4 sm:$0xff]   ;;  %v3258_v46 = vld [vmem:[%s4766_s1 + $0x318] ss:$36 sps:$4 sm:$0xff]   ;;  %v3259_v48 = vld [vmem:[%s4766_s1 + $0x320] ss:$36 sps:$4 sm:$0xff]  }
  0x11   :  { %v3798_v47 = vld [vmem:[%s4767_s0 + $0x4] ss:$16 sps:$4 sm:$0xff]   ;;  %v3262_v50 = vld [vmem:[%s4766_s1 + $0x36c] ss:$36 sps:$4 sm:$0xff]   ;;  %v3274_v58 = vld [vmem:[%s4766_s1 + $0x3fc] ss:$36 sps:$4 sm:$0xff]  }
  0x12   :  { %v3260_v49 = vld [vmem:[%s4766_s1 + $0x364] ss:$36 sps:$4 sm:$0xff]   ;;  %519 = vmatprep.mubr.bf16.mxu0 %v3798_v47  ;;  %1052 = vmatprep.mubr.bf16.mxu1 %v3798_v47  ;;  %v3266_v53 = vld [vmem:[%s4766_s1 + $0x3ac] ss:$36 sps:$4 sm:$0xff]   ;;  %v3268_v54 = vld [vmem:[%s4766_s1 + $0x3b4] ss:$36 sps:$4 sm:$0xff]  }
  0x13   :  { %496 = vmatpush1.bf16.msra.mxu0 %v3216_v18  ;;  %1029 = vmatpush1.bf16.msra.mxu1 %v3217_v19  ;;  %v3264_v51 = vld [vmem:[%s4766_s1 + $0x360] ss:$36 sps:$4 sm:$0xff]   ;;  %v3265_v52 = vld [vmem:[%s4766_s1 + $0x368] ss:$36 sps:$4 sm:$0xff]   ;;  %v3271_v56 = vld [vmem:[%s4766_s1 + $0x3b0] ss:$36 sps:$4 sm:$0xff]  }
  0x14   :  { %497 = vmatprep.subr.bf16.mxu0 %v3218_v20  ;;  %1030 = vmatprep.subr.bf16.mxu1 %v3220_v21  ;;  %v3270_v55 = vld [vmem:[%s4766_s1 + $0x3a8] ss:$36 sps:$4 sm:$0xff]   ;;  %v3272_v57 = vld [vmem:[%s4766_s1 + $0x3f4] ss:$36 sps:$4 sm:$0xff]   ;;  %v3278_v61 = vld [vmem:[%s4766_s1 + $0x43c] ss:$36 sps:$4 sm:$0xff]  }
  0x15   :  { %v3276_v59 = vld [vmem:[%s4766_s1 + $0x3f0] ss:$36 sps:$4 sm:$0xff]   ;;  %v3277_v60 = vld [vmem:[%s4766_s1 + $0x3f8] ss:$36 sps:$4 sm:$0xff]   ;;  %v3280_v62 = vld [vmem:[%s4766_s1 + $0x444] ss:$36 sps:$4 sm:$0xff]  }
  0x16   :  { %v3282_v63 = vld [vmem:[%s4766_s1 + $0x438] ss:$36 sps:$4 sm:$0xff]   ;;  %v3283_v0 = vld [vmem:[%s4766_s1 + $0x440] ss:$36 sps:$4 sm:$0xff]   ;;  %v3291_v2 = vld [vmem:[%s4766_s1 + $0x48c] ss:$36 sps:$4 sm:$0xff]  }
  0x17   :  { %498 = vmatpush1.bf16.msra.mxu0 %v3222_v22  ;;  %1031 = vmatpush1.bf16.msra.mxu1 %v3223_v23  ;;  %v3288_v1 = vld [vmem:[%s4766_s1 + $0x484] ss:$36 sps:$4 sm:$0xff]   ;;  %v3292_v5 = vld [vmem:[%s4767_s0] ss:$16 sps:$4 sm:$0xff]   ;;  %v3298_v7 = vld [vmem:[%s4766_s1 + $0x4d4] ss:$36 sps:$4 sm:$0xff]  }
  0x18   :  { %499 = vmatprep.subr.bf16.mxu0 %v3224_v24  ;;  %1032 = vmatprep.subr.bf16.mxu1 %v3226_v25  ;;  %v3286_v3 = vld [vmem:[%s4766_s1 + $0x480] ss:$36 sps:$4 sm:$0xff]   ;;  %v3289_v4 = vld [vmem:[%s4766_s1 + $0x488] ss:$36 sps:$4 sm:$0xff]   ;;  %v3296_v9 = vld [vmem:[%s4766_s1 + $0x4d0] ss:$36 sps:$4 sm:$0xff]  }
  0x19   :  { %v3295_v6 = vld [vmem:[%s4766_s1 + $0x4cc] ss:$36 sps:$4 sm:$0xff]   ;;  %v3301_v10 = vld [vmem:[%s4766_s1 + $0x514] ss:$36 sps:$4 sm:$0xff]   ;;  %v3304_v11 = vld [vmem:[%s4766_s1 + $0x51c] ss:$36 sps:$4 sm:$0xff]  }
  0x1a   :  { %v3293_v8 = vld [vmem:[%s4766_s1 + $0x4c8] ss:$36 sps:$4 sm:$0xff]   ;;  %v3299_v12 = vld [vmem:[%s4766_s1 + $0x510] ss:$36 sps:$4 sm:$0xff]   ;;  %v3302_v13 = vld [vmem:[%s4766_s1 + $0x518] ss:$36 sps:$4 sm:$0xff]  }
  0x1b   :  { %500 = vmatpush1.bf16.msra.mxu0 %v3228_v26  ;;  %1033 = vmatpush1.bf16.msra.mxu1 %v3229_v27  ;;  %v3895_v14 = vld [vmem:[%s4767_s0 + $0x24] ss:$16 sps:$4 sm:$0xff]   ;;  %v3349_v15 = vld [vmem:[%s4767_s0 + $0x20] ss:$16 sps:$4 sm:$0xff]   ;;  %v3305_v18 = vld [vmem:[%s4766_s1 + $0x558] ss:$36 sps:$4 sm:$0xff]  }
  0x1c   :  { %501 = vmatprep.subr.bf16.mxu0 %v3230_v28  ;;  %1034 = vmatprep.subr.bf16.mxu1 %v3232_v29  ;;  %v3307_v16 = vld [vmem:[%s4766_s1 + $0x55c] ss:$36 sps:$4 sm:$0xff]   ;;  %v3310_v17 = vld [vmem:[%s4766_s1 + $0x564] ss:$36 sps:$4 sm:$0xff]   ;;  %v3316_v21 = vld [vmem:[%s4766_s1 + $0x5ac] ss:$36 sps:$4 sm:$0xff]  }
  0x1d   :  { %v3308_v19 = vld [vmem:[%s4766_s1 + $0x560] ss:$36 sps:$4 sm:$0xff]   ;;  %v3314_v24 = vld [vmem:[%s4766_s1 + $0x5a8] ss:$36 sps:$4 sm:$0xff]   ;;  %v3322_v27 = vld [vmem:[%s4766_s1 + $0x5f4] ss:$36 sps:$4 sm:$0xff]  }
  0x1e   :  { %v3313_v20 = vld [vmem:[%s4766_s1 + $0x5a4] ss:$36 sps:$4 sm:$0xff]   ;;  %v3364_v25 = vld [vmem:[%s4767_s0 + $0x40] ss:$16 sps:$4 sm:$0xff]  }
  0x1f   :  { %502 = vmatpush1.bf16.msra.mxu0 %v3234_v30  ;;  %1035 = vmatpush1.bf16.msra.mxu1 %v3235_v31  ;;  %v3311_v22 = vld [vmem:[%s4766_s1 + $0x5a0] ss:$36 sps:$4 sm:$0xff]   ;;  %v3319_v26 = vld [vmem:[%s4766_s1 + $0x5ec] ss:$36 sps:$4 sm:$0xff]   ;;  %v3325_v31 = vld [vmem:[%s4766_s1 + $0x634] ss:$36 sps:$4 sm:$0xff]  }
  0x20   :  { %503 = vmatprep.subr.bf16.mxu0 %v3236_v32  ;;  %1036 = vmatprep.subr.bf16.mxu1 %v3238_v33  ;;  %v3926_v23 = vld [vmem:[%s4767_s0 + $0x44] ss:$16 sps:$4 sm:$0xff]   ;;  %v3317_v28 = vld [vmem:[%s4766_s1 + $0x5e8] ss:$36 sps:$4 sm:$0xff]   ;;  %v3328_v32 = vld [vmem:[%s4766_s1 + $0x63c] ss:$36 sps:$4 sm:$0xff]  }
  0x21   :  { %v3320_v29 = vld [vmem:[%s4766_s1 + $0x5f0] ss:$36 sps:$4 sm:$0xff]   ;;  %v27_v30 = vld [vmem:[%s4767_s0 + $0x60] sm:$0x11] }
  0x22   :  { %v3957_v33 = vcombine.high %v27_v30, %v27_v30 }
  0x23   :  { %504 = vmatpush1.bf16.msra.mxu0 %v3240_v34  ;;  %1037 = vmatpush1.bf16.msra.mxu1 %v3241_v35  ;;  %v3323_v34 = vld [vmem:[%s4766_s1 + $0x630] ss:$36 sps:$4 sm:$0xff]   ;;  %v3964_v35 = vcombine.low %v27_v30, %v27_v30  ;;  %v4150_v30 = vld [vmem:[%s4767_s0 + $0x4c] ss:$16 sps:$4 sm:$0xff]  }
  0x24   :  { %505 = vmatprep.subr.bf16.mxu0 %v3242_v36  ;;  %1038 = vmatprep.subr.bf16.mxu1 %v3244_v37  ;;  %v3326_v36 = vld [vmem:[%s4766_s1 + $0x638] ss:$36 sps:$4 sm:$0xff]  }
  0x25   :  { %v3331_v37 = vld [vmem:[%s4766_s1 + $0x67c] ss:$36 sps:$4 sm:$0xff]  }
  0x27   :  { %506 = vmatpush1.bf16.msra.mxu0 %v3246_v38  ;;  %1039 = vmatpush1.bf16.msra.mxu1 %v3247_v39  ;;  %v3334_v38 = vld [vmem:[%s4766_s1 + $0x684] ss:$36 sps:$4 sm:$0xff]   ;;  %v3978_v39 = vld [vmem:[%s4767_s0 + $0xc] ss:$16 sps:$4 sm:$0xff]  }
  0x28   :  { %507 = vmatprep.subr.bf16.mxu0 %v3248_v40  ;;  %1040 = vmatprep.subr.bf16.mxu1 %v3250_v41  ;;  %v3329_v40 = vld [vmem:[%s4766_s1 + $0x678] ss:$36 sps:$4 sm:$0xff]   ;;  %v3332_v41 = vld [vmem:[%s4766_s1 + $0x680] ss:$36 sps:$4 sm:$0xff]  }
  0x2b   :  { %508 = vmatpush1.bf16.msra.mxu0 %v3252_v42  ;;  %1041 = vmatpush1.bf16.msra.mxu1 %v3253_v43  ;;  %v3337_v42 = vld [vmem:[%s4766_s1 + $0x6c4] ss:$36 sps:$4 sm:$0xff]   ;;  %v3340_v43 = vld [vmem:[%s4766_s1 + $0x6cc] ss:$36 sps:$4 sm:$0xff]  }
  0x2c   :  { %509 = vmatprep.subr.bf16.mxu0 %v3254_v44  ;;  %1042 = vmatprep.subr.bf16.mxu1 %v3256_v45  ;;  %v3335_v44 = vld [vmem:[%s4766_s1 + $0x6c0] ss:$36 sps:$4 sm:$0xff]   ;;  %v3338_v45 = vld [vmem:[%s4766_s1 + $0x6c8] ss:$36 sps:$4 sm:$0xff]  }
  0x2f   :  { %510 = vmatpush1.bf16.msra.mxu0 %v3258_v46  ;;  %1043 = vmatpush1.bf16.msra.mxu1 %v3259_v48  ;;  %v3343_v46 = vld [vmem:[%s4766_s1 + $0x70c] ss:$36 sps:$4 sm:$0xff]   ;;  %v3346_v48 = vld [vmem:[%s4766_s1 + $0x714] ss:$36 sps:$4 sm:$0xff]  }
  0x30   :  { %511 = vmatprep.subr.bf16.mxu0 %v3260_v49  ;;  %1044 = vmatprep.subr.bf16.mxu1 %v3262_v50  ;;  %v3341_v49 = vld [vmem:[%s4766_s1 + $0x708] ss:$36 sps:$4 sm:$0xff]   ;;  %v3344_v50 = vld [vmem:[%s4766_s1 + $0x710] ss:$36 sps:$4 sm:$0xff]  }
  0x33   :  { %512 = vmatpush1.bf16.msra.mxu0 %v3264_v51  ;;  %1045 = vmatpush1.bf16.msra.mxu1 %v3265_v52  ;;  %v3352_v51 = vld [vmem:[%s4766_s1 + $0x754] ss:$36 sps:$4 sm:$0xff]   ;;  %v3355_v52 = vld [vmem:[%s4766_s1 + $0x75c] ss:$36 sps:$4 sm:$0xff]  }
  0x34   :  { %513 = vmatprep.subr.bf16.mxu0 %v3266_v53  ;;  %1046 = vmatprep.subr.bf16.mxu1 %v3268_v54  ;;  %v3350_v53 = vld [vmem:[%s4766_s1 + $0x750] ss:$36 sps:$4 sm:$0xff]   ;;  %v3353_v54 = vld [vmem:[%s4766_s1 + $0x758] ss:$36 sps:$4 sm:$0xff]  }
  0x37   :  { %514 = vmatpush1.bf16.msra.mxu0 %v3270_v55  ;;  %1047 = vmatpush1.bf16.msra.mxu1 %v3271_v56  ;;  %v3358_v55 = vld [vmem:[%s4766_s1 + $0x79c] ss:$36 sps:$4 sm:$0xff]   ;;  %v3361_v56 = vld [vmem:[%s4766_s1 + $0x7a4] ss:$36 sps:$4 sm:$0xff]  }
  0x38   :  { %515 = vmatprep.subr.bf16.mxu0 %v3272_v57  ;;  %1048 = vmatprep.subr.bf16.mxu1 %v3274_v58  ;;  %v3356_v57 = vld [vmem:[%s4766_s1 + $0x798] ss:$36 sps:$4 sm:$0xff]   ;;  %v3359_v58 = vld [vmem:[%s4766_s1 + $0x7a0] ss:$36 sps:$4 sm:$0xff]  }
  0x3b   :  { %516 = vmatpush1.bf16.msra.mxu0 %v3276_v59  ;;  %1049 = vmatpush1.bf16.msra.mxu1 %v3277_v60  ;;  %v3367_v59 = vld [vmem:[%s4766_s1 + $0x7e4] ss:$36 sps:$4 sm:$0xff]   ;;  %v3370_v60 = vld [vmem:[%s4766_s1 + $0x7ec] ss:$36 sps:$4 sm:$0xff]  }
  0x3c   :  { %517 = vmatprep.subr.bf16.mxu0 %v3278_v61  ;;  %1050 = vmatprep.subr.bf16.mxu1 %v3280_v62  ;;  %v3365_v61 = vld [vmem:[%s4766_s1 + $0x7e0] ss:$36 sps:$4 sm:$0xff]   ;;  %v3368_v62 = vld [vmem:[%s4766_s1 + $0x7e8] ss:$36 sps:$4 sm:$0xff]  }
  0x3f   :  { %518 = vmatpush1.bf16.msra.mxu0 %v3282_v63  ;;  %1051 = vmatpush1.bf16.msra.mxu1 %v3283_v0  ;;  %v3373_v63 = vld [vmem:[%s4766_s1 + $0x82c] ss:$36 sps:$4 sm:$0xff]   ;;  %v3376_v0 = vld [vmem:[%s4766_s1 + $0x834] ss:$36 sps:$4 sm:$0xff]  }
  0x40   :  { %558 = vmatprep.subr.bf16.mxu0 %v3288_v1  ;;  %1091 = vmatprep.subr.bf16.mxu1 %v3291_v2  ;;  %v3371_v1 = vld [vmem:[%s4766_s1 + $0x828] ss:$36 sps:$4 sm:$0xff]   ;;  %v3374_v2 = vld [vmem:[%s4766_s1 + $0x830] ss:$36 sps:$4 sm:$0xff]  }
  0x42   :  { %520 = vmatmul.mubr.bf16.vlgmr.msra.gmra.mrb[0].mxu0 %v3292_v5  ;;  %1053 = vmatmul.mubr.bf16.vlgmr.msra.gmra.mrb[0].mxu1 %v3292_v5  ;;  %v3379_v5 = vld [vmem:[%s4766_s1 + $0x870] ss:$36 sps:$4 sm:$0xff]  }
  0x43   :  { %559 = vmatpush1.bf16.msra.mxu0 %v3286_v3  ;;  %1092 = vmatpush1.bf16.msra.mxu1 %v3289_v4  ;;  %v3381_v3 = vld [vmem:[%s4766_s1 + $0x874] ss:$36 sps:$4 sm:$0xff]   ;;  %v3384_v4 = vld [vmem:[%s4766_s1 + $0x87c] ss:$36 sps:$4 sm:$0xff]  }
  0x44   :  { %560 = vmatprep.subr.bf16.mxu0 %v3295_v6  ;;  %1093 = vmatprep.subr.bf16.mxu1 %v3298_v7  ;;  %v3382_v6 = vld [vmem:[%s4766_s1 + $0x878] ss:$36 sps:$4 sm:$0xff]  }
  0x45   :  { %529 = vmatprep.mubr.bf16.mxu0 %v3895_v14  ;;  %1062 = vmatprep.mubr.bf16.mxu1 %v3895_v14  ;;  %v3387_v7 = vld [vmem:[%s4766_s1 + $0x8bc] ss:$36 sps:$4 sm:$0xff]  }
  0x47   :  { %561 = vmatpush1.bf16.msra.mxu0 %v3293_v8  ;;  %1094 = vmatpush1.bf16.msra.mxu1 %v3296_v9  ;;  %v3390_v8 = vld [vmem:[%s4766_s1 + $0x8c4] ss:$36 sps:$4 sm:$0xff]   ;;  %v3385_v9 = vld [vmem:[%s4766_s1 + $0x8b8] ss:$36 sps:$4 sm:$0xff]  }
  0x48   :  { %562 = vmatprep.subr.bf16.mxu0 %v3301_v10  ;;  %1095 = vmatprep.subr.bf16.mxu1 %v3304_v11  ;;  %v3388_v10 = vld [vmem:[%s4766_s1 + $0x8c0] ss:$36 sps:$4 sm:$0xff]   ;;  %v3396_v11 = vld [vmem:[%s4766_s1 + $0x14] ss:$36 sps:$4 sm:$0xff]  }
  0x4a   :  { %530 = vmatmul.mubr.bf16.gmra.mrb[4].mxu0 %v3349_v15  ;;  %1063 = vmatmul.mubr.bf16.gmra.mrb[4].mxu1 %v3349_v15  ;;  %v3394_v15 = vld [vmem:[%s4766_s1 + $0x10] ss:$36 sps:$4 sm:$0xff]  }
  0x4b   :  { %563 = vmatpush1.bf16.msra.mxu0 %v3299_v12  ;;  %1096 = vmatpush1.bf16.msra.mxu1 %v3302_v13  ;;  %v3399_v12 = vld [vmem:[%s4766_s1 + $0x1c] ss:$36 sps:$4 sm:$0xff]   ;;  %v4095_v13 = vld [vmem:[%s4767_s0 + $0x8] ss:$16 sps:$4 sm:$0xff]  }
  0x4c   :  { %564 = vmatprep.subr.bf16.mxu0 %v3307_v16  ;;  %1097 = vmatprep.subr.bf16.mxu1 %v3310_v17  ;;  %v3397_v16 = vld [vmem:[%s4766_s1 + $0x18] ss:$36 sps:$4 sm:$0xff]  }
  0x4d   :  { %539 = vmatprep.mubr.bf16.mxu0 %v3926_v23  ;;  %1072 = vmatprep.mubr.bf16.mxu1 %v3926_v23  ;;  %v3402_v17 = vld [vmem:[%s4766_s1 + $0x5c] ss:$36 sps:$4 sm:$0xff]  }
  0x4f   :  { %565 = vmatpush1.bf16.msra.mxu0 %v3305_v18  ;;  %1098 = vmatpush1.bf16.msra.mxu1 %v3308_v19  ;;  %v3405_v18 = vld [vmem:[%s4766_s1 + $0x64] ss:$36 sps:$4 sm:$0xff]   ;;  %v4112_v19 = vld [vmem:[%s4767_s0 + $0x2c] ss:$16 sps:$4 sm:$0xff]  }
  0x50   :  { %566 = vmatprep.subr.bf16.mxu0 %v3313_v20  ;;  %1099 = vmatprep.subr.bf16.mxu1 %v3316_v21  ;;  %v3400_v20 = vld [vmem:[%s4766_s1 + $0x58] ss:$36 sps:$4 sm:$0xff]   ;;  %v3403_v21 = vld [vmem:[%s4766_s1 + $0x60] ss:$36 sps:$4 sm:$0xff]  }
  0x52   :  { %540 = vmatmul.mubr.bf16.gmra.mrb[8].mxu0 %v3364_v25  ;;  %1073 = vmatmul.mubr.bf16.gmra.mrb[8].mxu1 %v3364_v25  ;;  %v4133_v25 = vld [vmem:[%s4767_s0 + $0x28] ss:$16 sps:$4 sm:$0xff]  }
  0x53   :  { %567 = vmatpush1.bf16.msra.mxu0 %v3311_v22  ;;  %1100 = vmatpush1.bf16.msra.mxu1 %v3314_v24  ;;  %v3411_v22 = vld [vmem:[%s4766_s1 + $0xa4] ss:$36 sps:$4 sm:$0xff]   ;;  %v3414_v24 = vld [vmem:[%s4766_s1 + $0xac] ss:$36 sps:$4 sm:$0xff]  }
  0x54   :  { %568 = vmatprep.subr.bf16.mxu0 %v3319_v26  ;;  %1101 = vmatprep.subr.bf16.mxu1 %v3322_v27  ;;  %v3409_v26 = vld [vmem:[%s4766_s1 + $0xa0] ss:$36 sps:$4 sm:$0xff]   ;;  %v3412_v27 = vld [vmem:[%s4766_s1 + $0xa8] ss:$36 sps:$4 sm:$0xff]  }
  0x55   :  { %549 = vmatprep.mubr.bf16.mxu0 %v3957_v33  ;;  %1082 = vmatprep.mubr.bf16.mxu1 %v3957_v33 }
  0x57   :  { %569 = vmatpush1.bf16.msra.mxu0 %v3317_v28  ;;  %1102 = vmatpush1.bf16.msra.mxu1 %v3320_v29  ;;  %v3417_v28 = vld [vmem:[%s4766_s1 + $0xec] ss:$36 sps:$4 sm:$0xff]   ;;  %v3420_v29 = vld [vmem:[%s4766_s1 + $0xf4] ss:$36 sps:$4 sm:$0xff]  }
  0x58   :  { %570 = vmatprep.subr.bf16.mxu0 %v3325_v31  ;;  %1103 = vmatprep.subr.bf16.mxu1 %v3328_v32  ;;  %v3415_v31 = vld [vmem:[%s4766_s1 + $0xe8] ss:$36 sps:$4 sm:$0xff]   ;;  %v3418_v32 = vld [vmem:[%s4766_s1 + $0xf0] ss:$36 sps:$4 sm:$0xff]  }
  0x5a   :  { %550 = vmatmul.mubr.bf16.gmra.mrb[12].mxu0 %v3964_v35  ;;  %1083 = vmatmul.mubr.bf16.gmra.mrb[12].mxu1 %v3964_v35 }
  0x5b   :  { %571 = vmatpush1.bf16.msra.mxu0 %v3323_v34  ;;  %1104 = vmatpush1.bf16.msra.mxu1 %v3326_v36  ;;  %v3426_v34 = vld [vmem:[%s4766_s1 + $0x134] ss:$36 sps:$4 sm:$0xff]   ;;  %v3429_v36 = vld [vmem:[%s4766_s1 + $0x13c] ss:$36 sps:$4 sm:$0xff]  }
  0x5c   :  { %572 = vmatprep.subr.bf16.mxu0 %v3331_v37  ;;  %1105 = vmatprep.subr.bf16.mxu1 %v3334_v38  ;;  %v4171_v37 = vld [vmem:[%s4767_s0 + $0x48] ss:$16 sps:$4 sm:$0xff]  }
  0x5d   :  { %590 = vmatprep.mubr.bf16.mxu0 %v3978_v39  ;;  %1123 = vmatprep.mubr.bf16.mxu1 %v3978_v39  ;;  %v28_v38 = vld [vmem:[%s4767_s0 + $0x68] sm:$0x11] }
  0x5f   :  { %573 = vmatpush1.bf16.msra.mxu0 %v3329_v40  ;;  %1106 = vmatpush1.bf16.msra.mxu1 %v3332_v41  ;;  %v3424_v40 = vld [vmem:[%s4766_s1 + $0x130] ss:$36 sps:$4 sm:$0xff]   ;;  %v3427_v41 = vld [vmem:[%s4766_s1 + $0x138] ss:$36 sps:$4 sm:$0xff]  }
  0x60   :  { %574 = vmatprep.subr.bf16.mxu0 %v3337_v42  ;;  %1107 = vmatprep.subr.bf16.mxu1 %v3340_v43  ;;  %v3432_v42 = vld [vmem:[%s4766_s1 + $0x17c] ss:$36 sps:$4 sm:$0xff]   ;;  %v3435_v43 = vld [vmem:[%s4766_s1 + $0x184] ss:$36 sps:$4 sm:$0xff]  }
  0x63   :  { %575 = vmatpush1.bf16.msra.mxu0 %v3335_v44  ;;  %1108 = vmatpush1.bf16.msra.mxu1 %v3338_v45  ;;  %v4188_v44 = vcombine.high %v28_v38, %v28_v38  ;;  %v3430_v45 = vld [vmem:[%s4766_s1 + $0x178] ss:$36 sps:$4 sm:$0xff]  }
  0x64   :  { %576 = vmatprep.subr.bf16.mxu0 %v3343_v46  ;;  %1109 = vmatprep.subr.bf16.mxu1 %v3346_v48  ;;  %v3433_v46 = vld [vmem:[%s4766_s1 + $0x180] ss:$36 sps:$4 sm:$0xff]  }
  0x65   :  { %v3440_v48 = vld [vmem:[%s4766_s1 + $0x1c4] ss:$36 sps:$4 sm:$0xff]  }
  0x67   :  { %577 = vmatpush1.bf16.msra.mxu0 %v3341_v49  ;;  %1110 = vmatpush1.bf16.msra.mxu1 %v3344_v50  ;;  %v3443_v49 = vld [vmem:[%s4766_s1 + $0x1cc] ss:$36 sps:$4 sm:$0xff]   ;;  %v4206_v50 = vcombine.low %v28_v38, %v28_v38  ;;  %v3509_v38 = vld [vmem:[%s4766_s1 + $0x4e4] ss:$36 sps:$4 sm:$0xff]  }
  0x68   :  { %578 = vmatprep.subr.bf16.mxu0 %v3352_v51  ;;  %1111 = vmatprep.subr.bf16.mxu1 %v3355_v52  ;;  %v3438_v51 = vld [vmem:[%s4766_s1 + $0x1c0] ss:$36 sps:$4 sm:$0xff]   ;;  %v3441_v52 = vld [vmem:[%s4766_s1 + $0x1c8] ss:$36 sps:$4 sm:$0xff]  }
  0x6b   :  { %579 = vmatpush1.bf16.msra.mxu0 %v3350_v53  ;;  %1112 = vmatpush1.bf16.msra.mxu1 %v3353_v54  ;;  %v3446_v53 = vld [vmem:[%s4766_s1 + $0x20c] ss:$36 sps:$4 sm:$0xff]   ;;  %v3449_v54 = vld [vmem:[%s4766_s1 + $0x214] ss:$36 sps:$4 sm:$0xff]  }
  0x6c   :  { %580 = vmatprep.subr.bf16.mxu0 %v3358_v55  ;;  %1113 = vmatprep.subr.bf16.mxu1 %v3361_v56  ;;  %v3444_v55 = vld [vmem:[%s4766_s1 + $0x208] ss:$36 sps:$4 sm:$0xff]   ;;  %v3447_v56 = vld [vmem:[%s4766_s1 + $0x210] ss:$36 sps:$4 sm:$0xff]  }
  0x6f   :  { %581 = vmatpush1.bf16.msra.mxu0 %v3356_v57  ;;  %1114 = vmatpush1.bf16.msra.mxu1 %v3359_v58  ;;  %v3452_v57 = vld [vmem:[%s4766_s1 + $0x254] ss:$36 sps:$4 sm:$0xff]   ;;  %v3455_v58 = vld [vmem:[%s4766_s1 + $0x25c] ss:$36 sps:$4 sm:$0xff]  }
  0x70   :  { %582 = vmatprep.subr.bf16.mxu0 %v3367_v59  ;;  %1115 = vmatprep.subr.bf16.mxu1 %v3370_v60  ;;  %v3450_v59 = vld [vmem:[%s4766_s1 + $0x250] ss:$36 sps:$4 sm:$0xff]   ;;  %v3453_v60 = vld [vmem:[%s4766_s1 + $0x258] ss:$36 sps:$4 sm:$0xff]  }
  0x73   :  { %583 = vmatpush1.bf16.msra.mxu0 %v3365_v61  ;;  %1116 = vmatpush1.bf16.msra.mxu1 %v3368_v62  ;;  %v3458_v61 = vld [vmem:[%s4766_s1 + $0x29c] ss:$36 sps:$4 sm:$0xff]  }
  0x74   :  { %584 = vmatprep.subr.bf16.mxu0 %v3373_v63  ;;  %1117 = vmatprep.subr.bf16.mxu1 %v3376_v0  ;;  %v3456_v62 = vld [vmem:[%s4766_s1 + $0x298] ss:$36 sps:$4 sm:$0xff]   ;;  %v3459_v63 = vld [vmem:[%s4766_s1 + $0x2a0] ss:$36 sps:$4 sm:$0xff]  }
  0x75   :  { %v3464_v0 = vld [vmem:[%s4766_s1 + $0x2e4] ss:$36 sps:$4 sm:$0xff]  }
  0x77   :  { %585 = vmatpush1.bf16.msra.mxu0 %v3371_v1  ;;  %1118 = vmatpush1.bf16.msra.mxu1 %v3374_v2  ;;  %v3467_v1 = vld [vmem:[%s4766_s1 + $0x2ec] ss:$36 sps:$4 sm:$0xff]   ;;  %v3462_v2 = vld [vmem:[%s4766_s1 + $0x2e0] ss:$36 sps:$4 sm:$0xff]  }
  0x78   :  { %586 = vmatprep.subr.bf16.mxu0 %v3381_v3  ;;  %1119 = vmatprep.subr.bf16.mxu1 %v3384_v4  ;;  %v3465_v3 = vld [vmem:[%s4766_s1 + $0x2e8] ss:$36 sps:$4 sm:$0xff]  }
  0x79   :  { %v3470_v4 = vld [vmem:[%s4766_s1 + $0x32c] ss:$36 sps:$4 sm:$0xff]  }
  0x7b   :  { %587 = vmatpush1.bf16.msra.mxu0 %v3379_v5  ;;  %1120 = vmatpush1.bf16.msra.mxu1 %v3382_v6  ;;  %v3473_v5 = vld [vmem:[%s4766_s1 + $0x334] ss:$36 sps:$4 sm:$0xff]   ;;  %v3468_v6 = vld [vmem:[%s4766_s1 + $0x328] ss:$36 sps:$4 sm:$0xff]  }
  0x7c   :  { %588 = vmatprep.subr.bf16.mxu0 %v3387_v7  ;;  %1121 = vmatprep.subr.bf16.mxu1 %v3390_v8  ;;  %v3471_v7 = vld [vmem:[%s4766_s1 + $0x330] ss:$36 sps:$4 sm:$0xff]  }
  0x7d   :  { %v3476_v8 = vld [vmem:[%s4766_s1 + $0x374] ss:$36 sps:$4 sm:$0xff]  }
  0x7f   :  { %589 = vmatpush1.bf16.msra.mxu0 %v3385_v9  ;;  %1122 = vmatpush1.bf16.msra.mxu1 %v3388_v10  ;;  %v3479_v9 = vld [vmem:[%s4766_s1 + $0x37c] ss:$36 sps:$4 sm:$0xff]   ;;  %v3474_v10 = vld [vmem:[%s4766_s1 + $0x370] ss:$36 sps:$4 sm:$0xff]  }
  0x80   :  { %1560 = vmatprep.subr.bf16.mxu0 %v3396_v11  ;;  %2100 = vmatprep.subr.bf16.mxu1 %v3399_v12  ;;  %v3477_v11 = vld [vmem:[%s4766_s1 + $0x378] ss:$36 sps:$4 sm:$0xff]  }
  0x81   :  { %v3482_v12 = vld [vmem:[%s4766_s1 + $0x3bc] ss:$36 sps:$4 sm:$0xff]  }
  0x82   :  { %591 = vmatmul.mubr.bf16.vlgmr.msra.gmra.mrb[0].mxu0 %v4095_v13  ;;  %1124 = vmatmul.mubr.bf16.vlgmr.msra.gmra.mrb[0].mxu1 %v4095_v13 }
  0x83   :  { %1561 = vmatpush1.bf16.msra.mxu0 %v3394_v15  ;;  %2101 = vmatpush1.bf16.msra.mxu1 %v3397_v16  ;;  %v3485_v15 = vld [vmem:[%s4766_s1 + $0x3c4] ss:$36 sps:$4 sm:$0xff]   ;;  %v3480_v16 = vld [vmem:[%s4766_s1 + $0x3b8] ss:$36 sps:$4 sm:$0xff]  }
  0x84   :  { %1562 = vmatprep.subr.bf16.mxu0 %v3402_v17  ;;  %2102 = vmatprep.subr.bf16.mxu1 %v3405_v18  ;;  %v3483_v17 = vld [vmem:[%s4766_s1 + $0x3c0] ss:$36 sps:$4 sm:$0xff]  }
  0x85   :  { %600 = vmatprep.mubr.bf16.mxu0 %v4112_v19  ;;  %1133 = vmatprep.mubr.bf16.mxu1 %v4112_v19  ;;  %v3488_v18 = vld [vmem:[%s4766_s1 + $0x404] ss:$36 sps:$4 sm:$0xff]  }
  0x87   :  { %1563 = vmatpush1.bf16.msra.mxu0 %v3400_v20  ;;  %2103 = vmatpush1.bf16.msra.mxu1 %v3403_v21  ;;  %v3491_v20 = vld [vmem:[%s4766_s1 + $0x40c] ss:$36 sps:$4 sm:$0xff]   ;;  %v3486_v21 = vld [vmem:[%s4766_s1 + $0x400] ss:$36 sps:$4 sm:$0xff]  }
  0x88   :  { %1564 = vmatprep.subr.bf16.mxu0 %v3411_v22  ;;  %2104 = vmatprep.subr.bf16.mxu1 %v3414_v24  ;;  %v3489_v22 = vld [vmem:[%s4766_s1 + $0x408] ss:$36 sps:$4 sm:$0xff]  }
  0x89   :  { %v3494_v24 = vld [vmem:[%s4766_s1 + $0x44c] ss:$36 sps:$4 sm:$0xff]  }
  0x8a   :  { %601 = vmatmul.mubr.bf16.gmra.mrb[4].mxu0 %v4133_v25  ;;  %1134 = vmatmul.mubr.bf16.gmra.mrb[4].mxu1 %v4133_v25 }
  0x8b   :  { %1565 = vmatpush1.bf16.msra.mxu0 %v3409_v26  ;;  %2105 = vmatpush1.bf16.msra.mxu1 %v3412_v27  ;;  %v3497_v26 = vld [vmem:[%s4766_s1 + $0x454] ss:$36 sps:$4 sm:$0xff]   ;;  %v3492_v27 = vld [vmem:[%s4766_s1 + $0x448] ss:$36 sps:$4 sm:$0xff]  }
  0x8c   :  { %1566 = vmatprep.subr.bf16.mxu0 %v3417_v28  ;;  %2106 = vmatprep.subr.bf16.mxu1 %v3420_v29  ;;  %v3495_v28 = vld [vmem:[%s4766_s1 + $0x450] ss:$36 sps:$4 sm:$0xff]  }
  0x8d   :  { %610 = vmatprep.mubr.bf16.mxu0 %v4150_v30  ;;  %1143 = vmatprep.mubr.bf16.mxu1 %v4150_v30  ;;  %v3500_v29 = vld [vmem:[%s4766_s1 + $0x494] ss:$36 sps:$4 sm:$0xff]  }
  0x8f   :  { %1567 = vmatpush1.bf16.msra.mxu0 %v3415_v31  ;;  %2107 = vmatpush1.bf16.msra.mxu1 %v3418_v32  ;;  %v3503_v31 = vld [vmem:[%s4766_s1 + $0x49c] ss:$36 sps:$4 sm:$0xff]   ;;  %v3498_v32 = vld [vmem:[%s4766_s1 + $0x490] ss:$36 sps:$4 sm:$0xff]  }
  0x90   :  { %1568 = vmatprep.subr.bf16.mxu0 %v3426_v34  ;;  %2108 = vmatprep.subr.bf16.mxu1 %v3429_v36  ;;  %v3501_v34 = vld [vmem:[%s4766_s1 + $0x498] ss:$36 sps:$4 sm:$0xff]  }
  0x91   :  { %v3506_v36 = vld [vmem:[%s4766_s1 + $0x4dc] ss:$36 sps:$4 sm:$0xff]  }
  0x92   :  { %611 = vmatmul.mubr.bf16.gmra.mrb[8].mxu0 %v4171_v37  ;;  %1144 = vmatmul.mubr.bf16.gmra.mrb[8].mxu1 %v4171_v37 }
  0x93   :  { %1569 = vmatpush1.bf16.msra.mxu0 %v3424_v40  ;;  %2109 = vmatpush1.bf16.msra.mxu1 %v3427_v41  ;;  %v3504_v40 = vld [vmem:[%s4766_s1 + $0x4d8] ss:$36 sps:$4 sm:$0xff]   ;;  %v4350_v41 = vld [vmem:[%s4767_s0] ss:$16 sps:$4 sm:$0xff]  }
  0x94   :  { %1570 = vmatprep.subr.bf16.mxu0 %v3432_v42  ;;  %2110 = vmatprep.subr.bf16.mxu1 %v3435_v43  ;;  %v3507_v42 = vld [vmem:[%s4766_s1 + $0x4e0] ss:$36 sps:$4 sm:$0xff]  }
  0x95   :  { %620 = vmatprep.mubr.bf16.mxu0 %v4188_v44  ;;  %1153 = vmatprep.mubr.bf16.mxu1 %v4188_v44  ;;  %v3512_v43 = vld [vmem:[%s4766_s1 + $0x524] ss:$36 sps:$4 sm:$0xff]  }
  0x97   :  { %1571 = vmatpush1.bf16.msra.mxu0 %v3430_v45  ;;  %2111 = vmatpush1.bf16.msra.mxu1 %v3433_v46  ;;  %v3515_v45 = vld [vmem:[%s4766_s1 + $0x52c] ss:$36 sps:$4 sm:$0xff]   ;;  %v3510_v46 = vld [vmem:[%s4766_s1 + $0x520] ss:$36 sps:$4 sm:$0xff]  }
  0x98   :  { %1572 = vmatprep.subr.bf16.mxu0 %v3440_v48  ;;  %2112 = vmatprep.subr.bf16.mxu1 %v3443_v49  ;;  %v3513_v48 = vld [vmem:[%s4766_s1 + $0x528] ss:$36 sps:$4 sm:$0xff]  }
  0x99   :  { %v3518_v49 = vld [vmem:[%s4766_s1 + $0x56c] ss:$36 sps:$4 sm:$0xff]  }
  0x9a   :  { %621 = vmatmul.mubr.bf16.gmra.mrb[12].mxu0 %v4206_v50  ;;  %1154 = vmatmul.mubr.bf16.gmra.mrb[12].mxu1 %v4206_v50 }
  0x9b   :  { %1573 = vmatpush1.bf16.msra.mxu0 %v3438_v51  ;;  %2113 = vmatpush1.bf16.msra.mxu1 %v3441_v52  ;;  %v3521_v51 = vld [vmem:[%s4766_s1 + $0x574] ss:$36 sps:$4 sm:$0xff]  }
  0x9c   :  { %1574 = vmatprep.subr.bf16.mxu0 %v3446_v53  ;;  %2114 = vmatprep.subr.bf16.mxu1 %v3449_v54  ;;  %v3519_v52 = vld [vmem:[%s4766_s1 + $0x570] ss:$36 sps:$4 sm:$0xff]  }
  0x9d   :  { %1592 = vmatprep.mubr.bf16.mxu0 %v3798_v47  ;;  %2132 = vmatprep.mubr.bf16.mxu1 %v3798_v47  ;;  %v3461_v47 = vld [vmem:[%s4766_s1 + $0x2a4] ss:$36 sps:$4 sm:$0xff]   ;;  %v4386_v53 = vld [vmem:[%s4767_s0 + $0x20] ss:$16 sps:$4 sm:$0xff]   ;;  %v3524_v54 = vld [vmem:[%s4766_s1 + $0x5b4] ss:$36 sps:$4 sm:$0xff]  }
  0x9f   :  { %1575 = vmatpush1.bf16.msra.mxu0 %v3444_v55  ;;  %2115 = vmatpush1.bf16.msra.mxu1 %v3447_v56  ;;  %v3527_v55 = vld [vmem:[%s4766_s1 + $0x5bc] ss:$36 sps:$4 sm:$0xff]   ;;  %v3522_v56 = vld [vmem:[%s4766_s1 + $0x5b0] ss:$36 sps:$4 sm:$0xff]  }
  0xa0   :  { %1576 = vmatprep.subr.bf16.mxu0 %v3452_v57  ;;  %2116 = vmatprep.subr.bf16.mxu1 %v3455_v58  ;;  %v3525_v57 = vld [vmem:[%s4766_s1 + $0x5b8] ss:$36 sps:$4 sm:$0xff]  }
  0xa1   :  { %v3530_v58 = vld [vmem:[%s4766_s1 + $0x5fc] ss:$36 sps:$4 sm:$0xff]  }
  0xa3   :  { %1577 = vmatpush1.bf16.msra.mxu0 %v3450_v59  ;;  %2117 = vmatpush1.bf16.msra.mxu1 %v3453_v60  ;;  %v3533_v59 = vld [vmem:[%s4766_s1 + $0x604] ss:$36 sps:$4 sm:$0xff]   ;;  %v3528_v60 = vld [vmem:[%s4766_s1 + $0x5f8] ss:$36 sps:$4 sm:$0xff]  }
  0xa4   :  { %1578 = vmatprep.subr.bf16.mxu0 %v3458_v61  ;;  %2118 = vmatprep.subr.bf16.mxu1 %v3461_v47  ;;  %v3531_v61 = vld [vmem:[%s4766_s1 + $0x600] ss:$36 sps:$4 sm:$0xff]  }
  0xa5   :  { %v3536_v47 = vld [vmem:[%s4766_s1 + $0x644] ss:$36 sps:$4 sm:$0xff]  }
  0xa7   :  { %1579 = vmatpush1.bf16.msra.mxu0 %v3456_v62  ;;  %2119 = vmatpush1.bf16.msra.mxu1 %v3459_v63  ;;  %v3539_v62 = vld [vmem:[%s4766_s1 + $0x64c] ss:$36 sps:$4 sm:$0xff]   ;;  %v3534_v63 = vld [vmem:[%s4766_s1 + $0x640] ss:$36 sps:$4 sm:$0xff]  }
  0xa8   :  { %1580 = vmatprep.subr.bf16.mxu0 %v3464_v0  ;;  %2120 = vmatprep.subr.bf16.mxu1 %v3467_v1  ;;  %v3537_v0 = vld [vmem:[%s4766_s1 + $0x648] ss:$36 sps:$4 sm:$0xff]  }
  0xa9   :  { %v3542_v1 = vld [vmem:[%s4766_s1 + $0x68c] ss:$36 sps:$4 sm:$0xff]  }
  0xab   :  { %1581 = vmatpush1.bf16.msra.mxu0 %v3462_v2  ;;  %2121 = vmatpush1.bf16.msra.mxu1 %v3465_v3  ;;  %v3545_v2 = vld [vmem:[%s4766_s1 + $0x694] ss:$36 sps:$4 sm:$0xff]   ;;  %v3540_v3 = vld [vmem:[%s4766_s1 + $0x688] ss:$36 sps:$4 sm:$0xff]  }
  0xac   :  { %1582 = vmatprep.subr.bf16.mxu0 %v3470_v4  ;;  %2122 = vmatprep.subr.bf16.mxu1 %v3473_v5  ;;  %v3543_v4 = vld [vmem:[%s4766_s1 + $0x690] ss:$36 sps:$4 sm:$0xff]  }
  0xad   :  { %v3548_v5 = vld [vmem:[%s4766_s1 + $0x6d4] ss:$36 sps:$4 sm:$0xff]  }
  0xaf   :  { %1583 = vmatpush1.bf16.msra.mxu0 %v3468_v6  ;;  %2123 = vmatpush1.bf16.msra.mxu1 %v3471_v7  ;;  %v3551_v6 = vld [vmem:[%s4766_s1 + $0x6dc] ss:$36 sps:$4 sm:$0xff]   ;;  %v3546_v7 = vld [vmem:[%s4766_s1 + $0x6d0] ss:$36 sps:$4 sm:$0xff]  }
  0xb0   :  { %1584 = vmatprep.subr.bf16.mxu0 %v3476_v8  ;;  %2124 = vmatprep.subr.bf16.mxu1 %v3479_v9  ;;  %v3549_v8 = vld [vmem:[%s4766_s1 + $0x6d8] ss:$36 sps:$4 sm:$0xff]  }
  0xb1   :  { %v3554_v9 = vld [vmem:[%s4766_s1 + $0x71c] ss:$36 sps:$4 sm:$0xff]  }
  0xb3   :  { %1585 = vmatpush1.bf16.msra.mxu0 %v3474_v10  ;;  %2125 = vmatpush1.bf16.msra.mxu1 %v3477_v11  ;;  %v3552_v10 = vld [vmem:[%s4766_s1 + $0x718] ss:$36 sps:$4 sm:$0xff]   ;;  %v3555_v11 = vld [vmem:[%s4766_s1 + $0x720] ss:$36 sps:$4 sm:$0xff]  }
  0xb4   :  { %1586 = vmatprep.subr.bf16.mxu0 %v3482_v12  ;;  %2126 = vmatprep.subr.bf16.mxu1 %v3485_v15  ;;  %v3560_v12 = vld [vmem:[%s4766_s1 + $0x764] ss:$36 sps:$4 sm:$0xff]   ;;  %v3563_v15 = vld [vmem:[%s4766_s1 + $0x76c] ss:$36 sps:$4 sm:$0xff]  }
  0xb7   :  { %1587 = vmatpush1.bf16.msra.mxu0 %v3480_v16  ;;  %2127 = vmatpush1.bf16.msra.mxu1 %v3483_v17  ;;  %v3558_v16 = vld [vmem:[%s4766_s1 + $0x760] ss:$36 sps:$4 sm:$0xff]   ;;  %v3561_v17 = vld [vmem:[%s4766_s1 + $0x768] ss:$36 sps:$4 sm:$0xff]  }
  0xb8   :  { %1588 = vmatprep.subr.bf16.mxu0 %v3488_v18  ;;  %2128 = vmatprep.subr.bf16.mxu1 %v3491_v20  ;;  %v3566_v18 = vld [vmem:[%s4766_s1 + $0x7ac] ss:$36 sps:$4 sm:$0xff]   ;;  %v3569_v20 = vld [vmem:[%s4766_s1 + $0x7b4] ss:$36 sps:$4 sm:$0xff]  }
  0xbb   :  { %1589 = vmatpush1.bf16.msra.mxu0 %v3486_v21  ;;  %2129 = vmatpush1.bf16.msra.mxu1 %v3489_v22  ;;  %v3564_v21 = vld [vmem:[%s4766_s1 + $0x7a8] ss:$36 sps:$4 sm:$0xff]   ;;  %v3567_v22 = vld [vmem:[%s4766_s1 + $0x7b0] ss:$36 sps:$4 sm:$0xff]  }
  0xbc   :  { %1590 = vmatprep.subr.bf16.mxu0 %v3494_v24  ;;  %2130 = vmatprep.subr.bf16.mxu1 %v3497_v26  ;;  %v3572_v24 = vld [vmem:[%s4766_s1 + $0x7f4] ss:$36 sps:$4 sm:$0xff]   ;;  %v3575_v26 = vld [vmem:[%s4766_s1 + $0x7fc] ss:$36 sps:$4 sm:$0xff]  }
  0xbf   :  { %1591 = vmatpush1.bf16.msra.mxu0 %v3492_v27  ;;  %2131 = vmatpush1.bf16.msra.mxu1 %v3495_v28  ;;  %v3570_v27 = vld [vmem:[%s4766_s1 + $0x7f0] ss:$36 sps:$4 sm:$0xff]   ;;  %v3573_v28 = vld [vmem:[%s4766_s1 + $0x7f8] ss:$36 sps:$4 sm:$0xff]  }
  0xc0   :  { %1631 = vmatprep.subr.bf16.mxu0 %v3500_v29  ;;  %2171 = vmatprep.subr.bf16.mxu1 %v3503_v31  ;;  %v3578_v29 = vld [vmem:[%s4766_s1 + $0x83c] ss:$36 sps:$4 sm:$0xff]   ;;  %v3581_v31 = vld [vmem:[%s4766_s1 + $0x844] ss:$36 sps:$4 sm:$0xff]  }
  0xc2   :  { %1593 = vmatmul.mubr.bf16.vlgmr.msra.gmra.mrb[16].mxu0 %v4350_v41  ;;  %2133 = vmatmul.mubr.bf16.vlgmr.msra.gmra.mrb[16].mxu1 %v4350_v41 }
  0xc3   :  { %1632 = vmatpush1.bf16.msra.mxu0 %v3498_v32  ;;  %2172 = vmatpush1.bf16.msra.mxu1 %v3501_v34  ;;  %v3576_v32 = vld [vmem:[%s4766_s1 + $0x838] ss:$36 sps:$4 sm:$0xff]   ;;  %v3579_v34 = vld [vmem:[%s4766_s1 + $0x840] ss:$36 sps:$4 sm:$0xff]  }
  0xc4   :  { %1633 = vmatprep.subr.bf16.mxu0 %v3506_v36  ;;  %2173 = vmatprep.subr.bf16.mxu1 %v3509_v38  ;;  %v3584_v36 = vld [vmem:[%s4766_s1 + $0x884] ss:$36 sps:$4 sm:$0xff]   ;;  %v3587_v38 = vld [vmem:[%s4766_s1 + $0x88c] ss:$36 sps:$4 sm:$0xff]  }
  0xc5   :  { %1602 = vmatprep.mubr.bf16.mxu0 %v3895_v14  ;;  %2142 = vmatprep.mubr.bf16.mxu1 %v3895_v14  ;;  %v3516_v14 = vld [vmem:[%s4766_s1 + $0x568] ss:$36 sps:$4 sm:$0xff]  }
  0xc7   :  { %1634 = vmatpush1.bf16.msra.mxu0 %v3504_v40  ;;  %2174 = vmatpush1.bf16.msra.mxu1 %v3507_v42  ;;  %v3582_v40 = vld [vmem:[%s4766_s1 + $0x880] ss:$36 sps:$4 sm:$0xff]   ;;  %v3585_v42 = vld [vmem:[%s4766_s1 + $0x888] ss:$36 sps:$4 sm:$0xff]  }
  0xc8   :  { %1635 = vmatprep.subr.bf16.mxu0 %v3512_v43  ;;  %2175 = vmatprep.subr.bf16.mxu1 %v3515_v45  ;;  %v3590_v43 = vld [vmem:[%s4766_s1 + $0x8cc] ss:$36 sps:$4 sm:$0xff]   ;;  %v3593_v45 = vld [vmem:[%s4766_s1 + $0x8d4] ss:$36 sps:$4 sm:$0xff]  }
  0xca   :  { %1603 = vmatmul.mubr.bf16.gmra.mrb[20].mxu0 %v4386_v53  ;;  %2143 = vmatmul.mubr.bf16.gmra.mrb[20].mxu1 %v4386_v53 }
  0xcb   :  { %1636 = vmatpush1.bf16.msra.mxu0 %v3510_v46  ;;  %2176 = vmatpush1.bf16.msra.mxu1 %v3513_v48  ;;  %v3588_v46 = vld [vmem:[%s4766_s1 + $0x8c8] ss:$36 sps:$4 sm:$0xff]   ;;  %v3591_v48 = vld [vmem:[%s4766_s1 + $0x8d0] ss:$36 sps:$4 sm:$0xff]  }
  0xcc   :  { %1637 = vmatprep.subr.bf16.mxu0 %v3518_v49  ;;  %2177 = vmatprep.subr.bf16.mxu1 %v3521_v51  ;;  %v3594_v49 = vld [vmem:[%s4766_s1 + $0x260] ss:$36 sps:$4 sm:$0xff]  }
  0xcd   :  { %1612 = vmatprep.mubr.bf16.mxu0 %v3926_v23  ;;  %2152 = vmatprep.mubr.bf16.mxu1 %v3926_v23  ;;  %v4413_v23 = vld [vmem:[%s4767_s0 + $0x40] ss:$16 sps:$4 sm:$0xff]  }
  0xce   :  { %v3595_v51 = vld [vmem:[%s4766_s1 + $0x6e0] ss:$36 sps:$4 sm:$0xff]  }
  0xcf   :  { %1638 = vmatpush1.bf16.msra.mxu0 %v3516_v14  ;;  %2178 = vmatpush1.bf16.msra.mxu1 %v3519_v52  ;;  %v3596_v14 = vld [vmem:[%s4766_s1 + $0x20] ss:$36 sps:$4 sm:$0xff]  }
  0xd0   :  { %1639 = vmatprep.subr.bf16.mxu0 %v3524_v54  ;;  %2179 = vmatprep.subr.bf16.mxu1 %v3527_v55  ;;  %v3597_v52 = vld [vmem:[%s4766_s1 + $0x4a0] ss:$36 sps:$4 sm:$0xff]   ;;  %v3598_v54 = vld [vmem:[%s4766_s1 + $0x2a8] ss:$36 sps:$4 sm:$0xff]  }
  0xd1   :  { %v3599_v55 = vld [vmem:[%s4766_s1 + $0x728] ss:$36 sps:$4 sm:$0xff]  }
  0xd2   :  { %1613 = vmatmul.mubr.bf16.gmra.mrb[24].mxu0 %v4413_v23  ;;  %2153 = vmatmul.mubr.bf16.gmra.mrb[24].mxu1 %v4413_v23 }
  0xd3   :  { %1640 = vmatpush1.bf16.msra.mxu0 %v3522_v56  ;;  %2180 = vmatpush1.bf16.msra.mxu1 %v3525_v57  ;;  %v3600_v56 = vld [vmem:[%s4766_s1 + $0x68] ss:$36 sps:$4 sm:$0xff]  }
  0xd4   :  { %1641 = vmatprep.subr.bf16.mxu0 %v3530_v58  ;;  %2181 = vmatprep.subr.bf16.mxu1 %v3533_v59  ;;  %v3601_v57 = vld [vmem:[%s4766_s1 + $0x4e8] ss:$36 sps:$4 sm:$0xff]   ;;  %v3602_v58 = vld [vmem:[%s4766_s1 + $0x2f0] ss:$36 sps:$4 sm:$0xff]  }
  0xd5   :  { %1622 = vmatprep.mubr.bf16.mxu0 %v3957_v33  ;;  %2162 = vmatprep.mubr.bf16.mxu1 %v3957_v33  ;;  %v3604_v59 = vld [vmem:[%s4766_s1 + $0xb0] ss:$36 sps:$4 sm:$0xff]  }
  0xd7   :  { %1642 = vmatpush1.bf16.msra.mxu0 %v3528_v60  ;;  %2182 = vmatpush1.bf16.msra.mxu1 %v3531_v61  ;;  %v3605_v60 = vld [vmem:[%s4766_s1 + $0x530] ss:$36 sps:$4 sm:$0xff]   ;;  %v3606_v61 = vld [vmem:[%s4766_s1 + $0x338] ss:$36 sps:$4 sm:$0xff]  }
  0xd8   :  { %1643 = vmatprep.subr.bf16.mxu0 %v3536_v47  ;;  %2183 = vmatprep.subr.bf16.mxu1 %v3539_v62  ;;  %v3607_v47 = vld [vmem:[%s4766_s1 + $0x7b8] ss:$36 sps:$4 sm:$0xff]  }
  0xd9   :  { %v3608_v62 = vld [vmem:[%s4766_s1 + $0xf8] ss:$36 sps:$4 sm:$0xff]  }
  0xda   :  { %1623 = vmatmul.mubr.bf16.gmra.mrb[28].mxu0 %v3964_v35  ;;  %2163 = vmatmul.mubr.bf16.gmra.mrb[28].mxu1 %v3964_v35 }
  0xdb   :  { %1644 = vmatpush1.bf16.msra.mxu0 %v3534_v63  ;;  %2184 = vmatpush1.bf16.msra.mxu1 %v3537_v0  ;;  %v3609_v63 = vld [vmem:[%s4766_s1 + $0x578] ss:$36 sps:$4 sm:$0xff]   ;;  %v3610_v0 = vld [vmem:[%s4766_s1 + $0x380] ss:$36 sps:$4 sm:$0xff]  }
  0xdc   :  { %1645 = vmatprep.subr.bf16.mxu0 %v3542_v1  ;;  %2185 = vmatprep.subr.bf16.mxu1 %v3545_v2  ;;  %v3611_v1 = vld [vmem:[%s4766_s1 + $0x800] ss:$36 sps:$4 sm:$0xff]  }
  0xdd   :  { %1663 = vmatprep.mubr.bf16.mxu0 %v3978_v39  ;;  %2203 = vmatprep.mubr.bf16.mxu1 %v3978_v39  ;;  %v3557_v39 = vld [vmem:[%s4766_s1 + $0x724] ss:$36 sps:$4 sm:$0xff]  }
  0xde   :  { %v3612_v2 = vld [vmem:[%s4766_s1 + $0x140] ss:$36 sps:$4 sm:$0xff]  }
  0xdf   :  { %1646 = vmatpush1.bf16.msra.mxu0 %v3540_v3  ;;  %2186 = vmatpush1.bf16.msra.mxu1 %v3543_v4  ;;  %v3613_v3 = vld [vmem:[%s4766_s1 + $0x5c0] ss:$36 sps:$4 sm:$0xff]   ;;  %v3614_v4 = vld [vmem:[%s4766_s1 + $0x3c8] ss:$36 sps:$4 sm:$0xff]  }
  0xe0   :  { %1647 = vmatprep.subr.bf16.mxu0 %v3548_v5  ;;  %2187 = vmatprep.subr.bf16.mxu1 %v3551_v6  ;;  %v3615_v5 = vld [vmem:[%s4766_s1 + $0x848] ss:$36 sps:$4 sm:$0xff]  }
  0xe1   :  { %v3616_v6 = vld [vmem:[%s4766_s1 + $0x188] ss:$36 sps:$4 sm:$0xff]  }
  0xe3   :  { %1648 = vmatpush1.bf16.msra.mxu0 %v3546_v7  ;;  %2188 = vmatpush1.bf16.msra.mxu1 %v3549_v8  ;;  %v3617_v7 = vld [vmem:[%s4766_s1 + $0x608] ss:$36 sps:$4 sm:$0xff]   ;;  %v3618_v8 = vld [vmem:[%s4766_s1 + $0x410] ss:$36 sps:$4 sm:$0xff]  }
  0xe4   :  { %1649 = vmatprep.subr.bf16.mxu0 %v3554_v9  ;;  %2189 = vmatprep.subr.bf16.mxu1 %v3557_v39  ;;  %v3619_v9 = vld [vmem:[%s4766_s1 + $0x890] ss:$36 sps:$4 sm:$0xff]  }
  0xe5   :  { %v3620_v39 = vld [vmem:[%s4766_s1 + $0x1d0] ss:$36 sps:$4 sm:$0xff]  }
  0xe7   :  { %1650 = vmatpush1.bf16.msra.mxu0 %v3552_v10  ;;  %2190 = vmatpush1.bf16.msra.mxu1 %v3555_v11  ;;  %v3621_v10 = vld [vmem:[%s4766_s1 + $0x650] ss:$36 sps:$4 sm:$0xff]   ;;  %v3622_v11 = vld [vmem:[%s4766_s1 + $0x458] ss:$36 sps:$4 sm:$0xff]  }
  0xe8   :  { %1651 = vmatprep.subr.bf16.mxu0 %v3560_v12  ;;  %2191 = vmatprep.subr.bf16.mxu1 %v3563_v15  ;;  %v3623_v12 = vld [vmem:[%s4766_s1 + $0x8d8] ss:$36 sps:$4 sm:$0xff]  }
  0xe9   :  { %v3624_v15 = vld [vmem:[%s4766_s1 + $0x218] ss:$36 sps:$4 sm:$0xff]  }
  0xeb   :  { %1652 = vmatpush1.bf16.msra.mxu0 %v3558_v16  ;;  %2192 = vmatpush1.bf16.msra.mxu1 %v3561_v17  ;;  %v3625_v16 = vld [vmem:[%s4766_s1 + $0x698] ss:$36 sps:$4 sm:$0xff]   ;;  %v3629_v17 = vld [vmem:[%s4767_s0 + $0x4] ss:$16 sps:$4 sm:$0xff]  }
  0xec   :  { %1653 = vmatprep.subr.bf16.mxu0 %v3566_v18  ;;  %2193 = vmatprep.subr.bf16.mxu1 %v3569_v20  ;;  %v3630_v18 = vld [vmem:[%s4767_s0 + $0xc] ss:$16 sps:$4 sm:$0xff]   ;;  %v3631_v20 = vld [vmem:[%s4767_s0 + $0x8] ss:$16 sps:$4 sm:$0xff]  }
  0xef   :  { %1654 = vmatpush1.bf16.msra.mxu0 %v3564_v21  ;;  %2194 = vmatpush1.bf16.msra.mxu1 %v3567_v22  ;;  %v3632_v21 = vld [vmem:[%s4767_s0 + $0x24] ss:$16 sps:$4 sm:$0xff]  }
  0xf0   :  { %1655 = vmatprep.subr.bf16.mxu0 %v3572_v24  ;;  %2195 = vmatprep.subr.bf16.mxu1 %v3575_v26 }
  0xf3   :  { %1656 = vmatpush1.bf16.msra.mxu0 %v3570_v27  ;;  %2196 = vmatpush1.bf16.msra.mxu1 %v3573_v28 }
  0xf4   :  { %1657 = vmatprep.subr.bf16.mxu0 %v3578_v29  ;;  %2197 = vmatprep.subr.bf16.mxu1 %v3581_v31 }
  0xf7   :  { %1658 = vmatpush1.bf16.msra.mxu0 %v3576_v32  ;;  %2198 = vmatpush1.bf16.msra.mxu1 %v3579_v34 }
  0xf8   :  { %1659 = vmatprep.subr.bf16.mxu0 %v3584_v36  ;;  %2199 = vmatprep.subr.bf16.mxu1 %v3587_v38 }
  0xfb   :  { %1660 = vmatpush1.bf16.msra.mxu0 %v3582_v40  ;;  %2200 = vmatpush1.bf16.msra.mxu1 %v3585_v42 }
  0xfc   :  { %1661 = vmatprep.subr.bf16.mxu0 %v3590_v43  ;;  %2201 = vmatprep.subr.bf16.mxu1 %v3593_v45 }
  0xff   :  { %1662 = vmatpush1.bf16.msra.mxu0 %v3588_v46  ;;  %2202 = vmatpush1.bf16.msra.mxu1 %v3591_v48 }
 0x100   :  { %3044 = vmatprep.subr.bf16.mxu0 %v3594_v49  ;;  %3084 = vmatprep.subr.bf16.mxu1 %v3595_v51 }
 0x102   :  { %1664 = vmatmul.mubr.bf16.vlgmr.msra.gmra.mrb[16].mxu0 %v4095_v13  ;;  %2204 = vmatmul.mubr.bf16.vlgmr.msra.gmra.mrb[16].mxu1 %v4095_v13  ;;  %v3603_v13 = vld [vmem:[%s4766_s1 + $0x770] ss:$36 sps:$4 sm:$0xff]  }
 0x103   :  { %3045 = vmatpush3.bf16.msra.mxu0 %v3596_v14  ;;  %3085 = vmatpush3.bf16.msra.mxu1 %v3597_v52 }
 0x104   :  { %3046 = vmatprep.subr.bf16.mxu0 %v3598_v54  ;;  %3086 = vmatprep.subr.bf16.mxu1 %v3599_v55 }
 0x105   :  { %1673 = vmatprep.mubr.bf16.mxu0 %v4112_v19  ;;  %2213 = vmatprep.mubr.bf16.mxu1 %v4112_v19 }
 0x107   :  { %3047 = vmatpush3.bf16.msra.mxu0 %v3600_v56  ;;  %3087 = vmatpush3.bf16.msra.mxu1 %v3601_v57 }
 0x108   :  { %3048 = vmatprep.subr.bf16.mxu0 %v3602_v58  ;;  %3088 = vmatprep.subr.bf16.mxu1 %v3603_v13 }
 0x10a   :  { %1674 = vmatmul.mubr.bf16.gmra.mrb[20].mxu0 %v4133_v25  ;;  %2214 = vmatmul.mubr.bf16.gmra.mrb[20].mxu1 %v4133_v25 }
 0x10b   :  { %3049 = vmatpush3.bf16.msra.mxu0 %v3604_v59  ;;  %3089 = vmatpush3.bf16.msra.mxu1 %v3605_v60 }
 0x10c   :  { %3050 = vmatprep.subr.bf16.mxu0 %v3606_v61  ;;  %3090 = vmatprep.subr.bf16.mxu1 %v3607_v47 }
 0x10d   :  { %1683 = vmatprep.mubr.bf16.mxu0 %v4150_v30  ;;  %2223 = vmatprep.mubr.bf16.mxu1 %v4150_v30 }
 0x10f   :  { %3051 = vmatpush3.bf16.msra.mxu0 %v3608_v62  ;;  %3091 = vmatpush3.bf16.msra.mxu1 %v3609_v63 }
 0x110   :  { %3052 = vmatprep.subr.bf16.mxu0 %v3610_v0  ;;  %3092 = vmatprep.subr.bf16.mxu1 %v3611_v1 }
 0x112   :  { %1684 = vmatmul.mubr.bf16.gmra.mrb[24].mxu0 %v4171_v37  ;;  %2224 = vmatmul.mubr.bf16.gmra.mrb[24].mxu1 %v4171_v37 }
 0x113   :  { %3053 = vmatpush3.bf16.msra.mxu0 %v3612_v2  ;;  %3093 = vmatpush3.bf16.msra.mxu1 %v3613_v3 }
 0x114   :  { %3054 = vmatprep.subr.bf16.mxu0 %v3614_v4  ;;  %3094 = vmatprep.subr.bf16.mxu1 %v3615_v5 }
 0x115   :  { %1693 = vmatprep.mubr.bf16.mxu0 %v4188_v44  ;;  %2233 = vmatprep.mubr.bf16.mxu1 %v4188_v44 }
 0x117   :  { %3055 = vmatpush3.bf16.msra.mxu0 %v3616_v6  ;;  %3095 = vmatpush3.bf16.msra.mxu1 %v3617_v7 }
 0x118   :  { %3056 = vmatprep.subr.bf16.mxu0 %v3618_v8  ;;  %3096 = vmatprep.subr.bf16.mxu1 %v3619_v9 }
 0x11a   :  { %1694 = vmatmul.mubr.bf16.gmra.mrb[28].mxu0 %v4206_v50  ;;  %2234 = vmatmul.mubr.bf16.gmra.mrb[28].mxu1 %v4206_v50 }
 0x11b   :  { %3057 = vmatpush3.bf16.msra.mxu0 %v3620_v39  ;;  %3097 = vmatpush3.bf16.msra.mxu1 %v3621_v10 }
 0x11c   :  { %3058 = vmatprep.subr.bf16.mxu0 %v3622_v11  ;;  %3098 = vmatprep.subr.bf16.mxu1 %v3623_v12 }
 0x11d   :  { %2544 = vmatprep.mubr.bf16.mxu0 %v3629_v17  ;;  %2608 = vmatprep.mubr.bf16.mxu1 %v3630_v18 }
 0x11f   :  { %3059 = vmatpush3.bf16.msra.mxu0 %v3624_v15  ;;  %3099 = vmatpush3.bf16.msra.mxu1 %v3625_v16 }
 0x122   :  { %2545 = vmatmul.mubr.bf16.vlgmr.msra.gmra.mrb[32].mxu0 %v4350_v41  ;;  %2609 = vmatmul.mubr.bf16.vlgmr.msra.gmra.mrb[32].mxu1 %v3631_v20  ;;  %v3633_v41 = vld [vmem:[%s4767_s0 + $0x44] ss:$16 sps:$4 sm:$0xff]  }
 0x123   :  { %2552 = vmatprep.mubr.bf16.mxu0 %v3632_v21  ;;  %2616 = vmatprep.mubr.bf16.mxu1 %v4112_v19 }
 0x12a   :  { %2553 = vmatmul.mubr.bf16.gmra.mrb[36].mxu0 %v4386_v53  ;;  %2617 = vmatmul.mubr.bf16.gmra.mrb[36].mxu1 %v4133_v25 }
 0x12b   :  { %2560 = vmatprep.mubr.bf16.mxu0 %v3633_v41  ;;  %2624 = vmatprep.mubr.bf16.mxu1 %v4150_v30 }
 0x132   :  { %2561 = vmatmul.mubr.bf16.gmra.mrb[40].mxu0 %v4413_v23  ;;  %2625 = vmatmul.mubr.bf16.gmra.mrb[40].mxu1 %v4171_v37 }
 0x133   :  { %2568 = vmatprep.mubr.bf16.mxu0 %v3957_v33  ;;  %2632 = vmatprep.mubr.bf16.mxu1 %v4188_v44 }
 0x13a   :  { %2569 = vmatmul.mubr.bf16.gmra.mrb[44].mxu0 %v3964_v35  ;;  %2633 = vmatmul.mubr.bf16.gmra.mrb[44].mxu1 %v4206_v50 }
 0x155   :  { %v592_v19 = vpop.f32.mrb[0].mxu0  ;;  %v1125_v25 = vpop.f32.mrb[0].mxu1 }
 0x156   :  { %v594_v53 = vpop.f32.mrb[1].mxu0  ;;  %v1127_v22 = vpop.f32.mrb[1].mxu1 }
 0x157   :  { %v629_v24 = vmax.f32 %v592_v19, %v594_v53  ;;  %v596_v26 = vpop.f32.mrb[2].mxu0  ;;  %v1129_v27 = vpop.f32.mrb[2].mxu1 }
 0x158   :  { %v598_v30 = vpop.f32.mrb[3].mxu0  ;;  %v1131_v28 = vpop.f32.mrb[3].mxu1 }
 0x159   :  { %v1162_v23 = vmax.f32 %v629_v24, %v1125_v25  ;;  %v630_v29 = vmax.f32 %v596_v26, %v598_v30 }
 0x15b   :  { %v1169_v37 = vmax.f32 %v1162_v23, %v1127_v22  ;;  %v1163_v31 = vmax.f32 %v630_v29, %v1129_v27 }
 0x15d   :  { %v1170_v33 = vmax.f32 %v1163_v31, %v1131_v28  ;;  %v602_v32 = vpop.f32.mrb[4].mxu0  ;;  %v1135_v44 = vpop.f32.mrb[4].mxu1 }
 0x15e   :  { %v604_v34 = vpop.f32.mrb[5].mxu0  ;;  %v1137_v35 = vpop.f32.mrb[5].mxu1 }
 0x15f   :  { %v631_v36 = vmax.f32 %v602_v32, %v604_v34  ;;  %v606_v50 = vpop.f32.mrb[6].mxu0  ;;  %v1139_v38 = vpop.f32.mrb[6].mxu1 }
 0x160   :  { %v608_v40 = vpop.f32.mrb[7].mxu0  ;;  %v1141_v42 = vpop.f32.mrb[7].mxu1 }
 0x161   :  { %v1164_v43 = vmax.f32 %v631_v36, %v1135_v44  ;;  %v632_v45 = vmax.f32 %v606_v50, %v608_v40 }
 0x163   :  { %v1171_v46 = vmax.f32 %v1164_v43, %v1137_v35  ;;  %v1165_v48 = vmax.f32 %v632_v45, %v1139_v38 }
 0x165   :  { %v1172_v49 = vmax.f32 %v1165_v48, %v1141_v42  ;;  %v612_v51 = vpop.f32.mrb[8].mxu0  ;;  %v1145_v14 = vpop.f32.mrb[8].mxu1 }
 0x166   :  { %v614_v52 = vpop.f32.mrb[9].mxu0  ;;  %v1147_v54 = vpop.f32.mrb[9].mxu1 }
 0x167   :  { %v633_v55 = vmax.f32 %v612_v51, %v614_v52  ;;  %v616_v56 = vpop.f32.mrb[10].mxu0  ;;  %v1149_v57 = vpop.f32.mrb[10].mxu1 }
 0x168   :  { %v618_v58 = vpop.f32.mrb[11].mxu0  ;;  %v1151_v13 = vpop.f32.mrb[11].mxu1 }
 0x169   :  { %v1166_v59 = vmax.f32 %v633_v55, %v1145_v14  ;;  %v634_v60 = vmax.f32 %v616_v56, %v618_v58 }
 0x16b   :  { %v1173_v61 = vmax.f32 %v1166_v59, %v1147_v54  ;;  %v1167_v47 = vmax.f32 %v634_v60, %v1149_v57 }
 0x16d   :  { %v1174_v62 = vmax.f32 %v1167_v47, %v1151_v13  ;;  %v622_v63 = vpop.f32.mrb[12].mxu0  ;;  %v1155_v0 = vpop.f32.mrb[12].mxu1 }
 0x16e   :  { %v624_v1 = vpop.f32.mrb[13].mxu0  ;;  %v1157_v2 = vpop.f32.mrb[13].mxu1 }
 0x16f   :  { %v635_v3 = vmax.f32 %v622_v63, %v624_v1  ;;  %v626_v4 = vpop.f32.mrb[14].mxu0  ;;  %v1159_v5 = vpop.f32.mrb[14].mxu1 }
 0x170   :  { %v627_v6 = vpop.f32.mrb[15].mxu0  ;;  %v1160_v7 = vpop.f32.mrb[15].mxu1 }
 0x171   :  { %v1168_v8 = vmax.f32 %v635_v3, %v1155_v0 }
 0x173   :  { %v1175_v9 = vmax.f32 %v1168_v8, %v1157_v2 }
 0x1d5   :  { %v1665_v39 = vpop.f32.mrb[16].mxu0  ;;  %v2205_v10 = vpop.f32.mrb[16].mxu1 }
 0x1d6   :  { %v1702_v11 = vmax.f32 %v1169_v37, %v1665_v39  ;;  %v1667_v12 = vpop.f32.mrb[17].mxu0  ;;  %v4685_v15 = vpop.f32.mrb[17].mxu1 }
 0x1d7   :  { %v1669_v16 = vpop.f32.mrb[18].mxu0  ;;  %v2209_v17 = vpop.f32.mrb[18].mxu1 }
 0x1d8   :  { %v1709_v18 = vmax.f32 %v1702_v11, %v1667_v12  ;;  %v1703_v20 = vmax.f32 %v1170_v33, %v1669_v16  ;;  %v1671_v21 = vpop.f32.mrb[19].mxu0  ;;  %v4687_v41 = vpop.f32.mrb[19].mxu1 }
 0x1da   :  { %v4689_v19 = vmax.f32 %v1709_v18, %v2205_v10  ;;  %v1710_v25 = vmax.f32 %v1703_v20, %v1671_v21  ;;  %v4730_v21 = vld [vmem:[%s4768_s2] ss:$0 sm:$0xff] }
 0x1dc   :  { %v2249_v53 = vmax.f32 %v4689_v19, %v4685_v15  ;;  %v4693_v22 = vmax.f32 %v1710_v25, %v2209_v17 }
 0x1dd   :  { %v1675_v24 = vpop.f32.mrb[20].mxu0  ;;  %v2215_v26 = vpop.f32.mrb[20].mxu1 }
 0x1de   :  { %v2250_v27 = vmax.f32 %v4693_v22, %v4687_v41  ;;  %v1704_v30 = vmax.f32 %v1171_v46, %v1675_v24  ;;  %v1677_v28 = vpop.f32.mrb[21].mxu0  ;;  %v4697_v23 = vpop.f32.mrb[21].mxu1 }
 0x1df   :  { %v1679_v29 = vpop.f32.mrb[22].mxu0  ;;  %v2219_v37 = vpop.f32.mrb[22].mxu1 }
 0x1e0   :  { %v1711_v31 = vmax.f32 %v1704_v30, %v1677_v28  ;;  %v1705_v33 = vmax.f32 %v1172_v49, %v1679_v29  ;;  %v1681_v32 = vpop.f32.mrb[23].mxu0  ;;  %v4699_v44 = vpop.f32.mrb[23].mxu1 }
 0x1e2   :  { %v4701_v34 = vmax.f32 %v1711_v31, %v2215_v26  ;;  %v1712_v35 = vmax.f32 %v1705_v33, %v1681_v32 }
 0x1e4   :  { %v2251_v36 = vmax.f32 %v4701_v34, %v4697_v23  ;;  %v4705_v50 = vmax.f32 %v1712_v35, %v2219_v37 }
 0x1e5   :  { %v1685_v38 = vpop.f32.mrb[24].mxu0  ;;  %v2225_v40 = vpop.f32.mrb[24].mxu1 }
 0x1e6   :  { %v2252_v42 = vmax.f32 %v4705_v50, %v4699_v44  ;;  %v1706_v43 = vmax.f32 %v1173_v61, %v1685_v38  ;;  %v1687_v45 = vpop.f32.mrb[25].mxu0  ;;  %v4709_v46 = vpop.f32.mrb[25].mxu1 }
 0x1e7   :  { %v1689_v48 = vpop.f32.mrb[26].mxu0  ;;  %v2229_v49 = vpop.f32.mrb[26].mxu1 }
 0x1e8   :  { %v1713_v51 = vmax.f32 %v1706_v43, %v1687_v45  ;;  %v1707_v14 = vmax.f32 %v1174_v62, %v1689_v48  ;;  %v1691_v52 = vpop.f32.mrb[27].mxu0  ;;  %v4711_v54 = vpop.f32.mrb[27].mxu1 }
 0x1ea   :  { %v4713_v55 = vmax.f32 %v1713_v51, %v2225_v40  ;;  %v1714_v56 = vmax.f32 %v1707_v14, %v1691_v52 }
 0x1ec   :  { %v2253_v57 = vmax.f32 %v4713_v55, %v4709_v46  ;;  %v4717_v58 = vmax.f32 %v1714_v56, %v2229_v49 }
 0x1ed   :  { %v1695_v13 = vpop.f32.mrb[28].mxu0  ;;  %v2235_v59 = vpop.f32.mrb[28].mxu1 }
 0x1ee   :  { %v2254_v60 = vmax.f32 %v4717_v58, %v4711_v54  ;;  %v1708_v61 = vmax.f32 %v1175_v9, %v1695_v13  ;;  %v1697_v47 = vpop.f32.mrb[29].mxu0  ;;  %v4721_v63 = vpop.f32.mrb[29].mxu1 }
 0x1ef   :  { %v1699_v62 = vpop.f32.mrb[30].mxu0  ;;  %v2239_v0 = vpop.f32.mrb[30].mxu1 }
 0x1f0   :  { %v1715_v1 = vmax.f32 %v1708_v61, %v1697_v47  ;;  %v1700_v2 = vpop.f32.mrb[31].mxu0  ;;  %v2240_v3 = vpop.f32.mrb[31].mxu1 }
 0x1f2   :  { %v4723_v4 = vmax.f32 %v1715_v1, %v2235_v59 }
 0x1f4   :  { %v2255_v5 = vmax.f32 %v4723_v4, %v4721_v63 }
 0x1f5   :  { %v3060_v6 = vpop.f32.mrb[32].mxu0  ;;  %v3100_v7 = vpop.f32.mrb[32].mxu1 }
 0x1f6   :  { %v3061_v8 = vpop.f32.mrb[33].mxu0  ;;  %v3101_v39 = vpop.f32.mrb[33].mxu1 }
 0x1f7   :  { %v3062_v10 = vadd.f32 %v3061_v8, %v3060_v6  ;;  %v3102_v11 = vadd.f32 %v3101_v39, %v3100_v7  ;;  %v3063_v9 = vpop.f32.mrb[34].mxu0  ;;  %v3103_v12 = vpop.f32.mrb[34].mxu1 }
 0x1f8   :  { %v3064_v15 = vpop.f32.mrb[35].mxu0  ;;  %v3104_v16 = vpop.f32.mrb[35].mxu1 }
 0x1f9   :  { %v2611_v17 = vadd.f32 %v3102_v11, %v3062_v10  ;;  %v3065_v18 = vadd.f32 %v3064_v15, %v3063_v9  ;;  %v3105_v20 = vadd.f32 %v3104_v16, %v3103_v12 }
 0x1fb   :  { %v2640_v41 = vmax.f32 %v2249_v53, %v2611_v17  ;;  %v2614_v19 = vadd.f32 %v3105_v20, %v3065_v18 }
 0x1fd   :  { %v2654_v25 = vadd.f32 %v4730_v21, %v2640_v41  ;;  %v2641_v22 = vmax.f32 %v2250_v27, %v2614_v19  ;;  %v3066_v24 = vpop.f32.mrb[36].mxu0  ;;  %v3106_v26 = vpop.f32.mrb[36].mxu1 }
 0x1fe   :  { %v3067_v30 = vpop.f32.mrb[37].mxu0  ;;  %v3107_v28 = vpop.f32.mrb[37].mxu1 }
 0x1ff   :  { %v2655_v29 = vadd.f32 %v4730_v21, %v2641_v22  ;;  %v3068_v37 = vadd.f32 %v3067_v30, %v3066_v24  ;;  %v3108_v31 = vadd.f32 %v3107_v28, %v3106_v26  ;;  %v3069_v33 = vpop.f32.mrb[38].mxu0  ;;  %v3109_v32 = vpop.f32.mrb[38].mxu1  ;;  %v2661_v35 = vmax.f32 %v2654_v25, 0.0 }
 0x200   :  { %v3070_v38 = vpop.f32.mrb[39].mxu0  ;;  %v3110_v40 = vpop.f32.mrb[39].mxu1 }
 0x201   :  { %v2662_v43 = vmax.f32 %v2655_v29, 0.0  ;;  %v2619_v45 = vadd.f32 %v3108_v31, %v3068_v37  ;;  %v3071_v53 = vadd.f32 %v3070_v38, %v3069_v33  ;;  %v3111_v48 = vadd.f32 %v3110_v40, %v3109_v32 }
 0x203   :  { %v3030_v49 = vpack.c.bf16 %v2662_v43, %v2661_v35  ;;  %v2642_v27 = vmax.f32 %v2251_v36, %v2619_v45  ;;  %v2622_v51 = vadd.f32 %v3111_v48, %v3071_v53 }
 0x205   :  { %3031 = vst [vmem:[%s4769_s3] sm:$0xff] %v3030_v49   ;;  %v2656_v14 = vadd.f32 %v4730_v21, %v2642_v27  ;;  %v2643_v52 = vmax.f32 %v2252_v42, %v2622_v51  ;;  %v3072_v56 = vpop.f32.mrb[40].mxu0  ;;  %v3112_v13 = vpop.f32.mrb[40].mxu1 }
 0x206   :  { %v3073_v59 = vpop.f32.mrb[41].mxu0  ;;  %v3113_v61 = vpop.f32.mrb[41].mxu1 }
 0x207   :  { %v2657_v47 = vadd.f32 %v4730_v21, %v2643_v52  ;;  %v3074_v62 = vadd.f32 %v3073_v59, %v3072_v56  ;;  %v3114_v23 = vadd.f32 %v3113_v61, %v3112_v13  ;;  %v3075_v34 = vpop.f32.mrb[42].mxu0  ;;  %v3115_v36 = vpop.f32.mrb[42].mxu1  ;;  %v2663_v0 = vmax.f32 %v2656_v14, 0.0 }
 0x208   :  { %v3076_v1 = vpop.f32.mrb[43].mxu0  ;;  %v3116_v2 = vpop.f32.mrb[43].mxu1 }
 0x209   :  { %v2664_v3 = vmax.f32 %v2657_v47, 0.0  ;;  %v2627_v6 = vadd.f32 %v3114_v23, %v3074_v62  ;;  %v3077_v7 = vadd.f32 %v3076_v1, %v3075_v34  ;;  %v3117_v8 = vadd.f32 %v3116_v2, %v3115_v36 }
 0x20b   :  { %v3035_v39 = vpack.c.bf16 %v2664_v3, %v2663_v0  ;;  %v2644_v44 = vmax.f32 %v2253_v57, %v2627_v6  ;;  %v2630_v50 = vadd.f32 %v3117_v8, %v3077_v7 }
 0x20d   :  { %3042 = vst [vmem:[%s4769_s3 + $0x8] sm:$0xff] %v3035_v39   ;;  %v2658_v42 = vadd.f32 %v4730_v21, %v2644_v44  ;;  %v2645_v10 = vmax.f32 %v2254_v60, %v2630_v50  ;;  %v3078_v11 = vpop.f32.mrb[44].mxu0  ;;  %v3118_v9 = vpop.f32.mrb[44].mxu1 }
 0x20e   :  { %v3079_v12 = vpop.f32.mrb[45].mxu0  ;;  %v3119_v15 = vpop.f32.mrb[45].mxu1 }
 0x20f   :  { %v2659_v16 = vadd.f32 %v4730_v21, %v2645_v10  ;;  %v3080_v17 = vadd.f32 %v3079_v12, %v3078_v11  ;;  %v3120_v46 = vadd.f32 %v3119_v15, %v3118_v9  ;;  %v3081_v55 = vpop.f32.mrb[46].mxu0  ;;  %v3121_v57 = vpop.f32.mrb[46].mxu1  ;;  %v2665_v41 = vmax.f32 %v2658_v42, 0.0 }
 0x210   :  { %v3082_v18 = vpop.f32.mrb[47].mxu0  ;;  %v3122_v20 = vpop.f32.mrb[47].mxu1 }
 0x211   :  { %v2666_v19 = vmax.f32 %v2659_v16, 0.0  ;;  %v2635_v25 = vadd.f32 %v3120_v46, %v3080_v17 }
 0x213   :  { %v3040_v22 = vpack.c.bf16 %v2666_v19, %v2665_v41  ;;  %v2646_v54 = vmax.f32 %v2255_v5, %v2635_v25 }
 0x215   :  { %3043 = vst [vmem:[%s4769_s3 + $0x10] sm:$0xff] %v3040_v22   ;;  %v2660_v58 = vadd.f32 %v4730_v21, %v2646_v54 }
 0x217   :  { %v2667_v60 = vmax.f32 %v2660_v58, 0.0 }
 0x219   :  { %v3026_v24 = vpack.c.bf16 %v2667_v60, %v2667_v60 }
 0x21b   :  { %2703 = vst [vmem:[%s4769_s3 + $0x18] sm:$0x1] %v3026_v24 }

// kernel: _lambda_.5
= control target key start
LH: loop header
LB: loop body
LE: loop exit
PB: predicated region body
PF: predicated region fallthrough
CT: control target
= control target key end

     0   :  { %v435_v27 = vlaneseq  ;;  %v3078_v35 = vmov 1966171168   ;;  %s3765_s0 = inlined_call_operand.vmem [shape: bf16[2,3200], index: 0, kind: input, shape index: {}]   ;;  %s3766_s1 = inlined_call_operand.vmem [shape: bf16[3200,128], index: 1, kind: input, shape index: {}]   ;;  %s3767_s2 = inlined_call_operand.vmem [shape: f32[1,128], index: 2, kind: input, shape index: {}]   ;;  %s3768_s3 = inlined_call_operand.hbm [shape: f32[2,128], index: 3, kind: output, shape index: {}]  }
   0x1   :  { %v2851_v0 = vld [vmem:[%s3766_s1 + $0x40] sm:$0xff]   ;;  %v2855_v4 = vld [vmem:[%s3766_s1 + $0x48] sm:$0xff]   ;;  %v2859_v8 = vld [vmem:[%s3766_s1 + $0x50] sm:$0xff]   ;;  %v433_v36 = vunpack.c.l.s4 %v3078_v35 }
   0x2   :  { %v2852_v1 = vld [vmem:[%s3766_s1] sm:$0xff]   ;;  %2554 = vmatprep.subr.bf16.mxu0 %v2851_v0  ;;  %v2856_v5 = vld [vmem:[%s3766_s1 + $0x8] sm:$0xff]   ;;  %v2860_v9 = vld [vmem:[%s3766_s1 + $0x10] sm:$0xff]   ;;  %v436_v32 = vshrl.u32 %v435_v27, 7 }
   0x3   :  { %v2853_v2 = vld [vmem:[%s3766_s1 + $0xc0] sm:$0xff]   ;;  %2555 = vmatpush3.bf16.msra.mxu0 %v2852_v1  ;;  %v2857_v6 = vld [vmem:[%s3766_s1 + $0xc8] sm:$0xff]   ;;  %v2861_v10 = vld [vmem:[%s3766_s1 + $0xd0] sm:$0xff]   ;;  %v434_v39 = vunpack.c.0.s8 %v433_v36 }
   0x4   :  { %v2854_v3 = vld [vmem:[%s3766_s1 + $0x80] sm:$0xff]   ;;  %2576 = vmatprep.subr.bf16.mxu1 %v2853_v2  ;;  %2556 = vmatprep.subr.bf16.mxu0 %v2855_v4  ;;  %v2858_v7 = vld [vmem:[%s3766_s1 + $0x88] sm:$0xff]   ;;  %v2862_v11 = vld [vmem:[%s3766_s1 + $0x90] sm:$0xff]  }
   0x5   :  { %2577 = vmatpush3.bf16.msra.mxu1 %v2854_v3  ;;  %v2863_v12 = vld [vmem:[%s3766_s1 + $0x58] sm:$0xff]   ;;  %v2867_v16 = vld [vmem:[%s3766_s1 + $0x60] sm:$0xff]   ;;  %v2871_v20 = vld [vmem:[%s3766_s1 + $0x68] sm:$0xff]   ;;  %v3207_v41 = vsub.s32 %v434_v39, %v436_v32 }
   0x6   :  { %2578 = vmatprep.subr.bf16.mxu1 %v2857_v6  ;;  %v2864_v13 = vld [vmem:[%s3766_s1 + $0x18] sm:$0xff]   ;;  %v2868_v17 = vld [vmem:[%s3766_s1 + $0x20] sm:$0xff]   ;;  %v2872_v21 = vld [vmem:[%s3766_s1 + $0x28] sm:$0xff]  }
   0x7   :  { %2557 = vmatpush3.bf16.msra.mxu0 %v2856_v5  ;;  %v2865_v14 = vld [vmem:[%s3766_s1 + $0xd8] sm:$0xff]   ;;  %v2869_v18 = vld [vmem:[%s3766_s1 + $0xe0] sm:$0xff]   ;;  %v2873_v22 = vld [vmem:[%s3766_s1 + $0xe8] sm:$0xff]  }
   0x8   :  { %2558 = vmatprep.subr.bf16.mxu0 %v2859_v8  ;;  %v2866_v15 = vld [vmem:[%s3766_s1 + $0x98] sm:$0xff]   ;;  %v2870_v19 = vld [vmem:[%s3766_s1 + $0xa0] sm:$0xff]   ;;  %v2874_v23 = vld [vmem:[%s3766_s1 + $0xa8] sm:$0xff]  }
   0x9   :  { %2579 = vmatpush3.bf16.msra.mxu1 %v2858_v7  ;;  %v2875_v24 = vld [vmem:[%s3766_s1 + $0x70] sm:$0xff]   ;;  %v2879_v29 = vld [vmem:[%s3766_s1 + $0x78] sm:$0xff]   ;;  %v16_v33 = vld [vmem:[%s3765_s0] sm:$0xff] }
   0xa   :  { %2580 = vmatprep.subr.bf16.mxu1 %v2861_v10  ;;  %v2876_v25 = vld [vmem:[%s3766_s1 + $0x30] sm:$0xff]   ;;  %v2880_v30 = vld [vmem:[%s3766_s1 + $0x38] sm:$0xff]   ;;  %v2884_v37 = vld [vmem:[%s3766_s1 + $0x140] sm:$0xff]   ;;  %v431_v38 = vcombine.high %v16_v33, %v16_v33  ;;  %v438_v42 = vrot.slane %v16_v33, %v3207_v41 }
   0xb   :  { %2559 = vmatpush3.bf16.msra.mxu0 %v2860_v9  ;;  %v2877_v26 = vld [vmem:[%s3766_s1 + $0xf0] sm:$0xff]   ;;  %v2881_v31 = vld [vmem:[%s3766_s1 + $0xf8] sm:$0xff]   ;;  %v2886_v40 = vld [vmem:[%s3766_s1 + $0x1c0] sm:$0xff]  }
   0xc   :  { %2560 = vmatprep.subr.bf16.mxu0 %v2863_v12  ;;  %v2878_v28 = vld [vmem:[%s3766_s1 + $0xb0] sm:$0xff]   ;;  %v2883_v34 = vld [vmem:[%s3766_s1 + $0xb8] sm:$0xff]   ;;  %v3211_v43 = vrot.slane %v431_v38, %v3207_v41  ;;  %v446_v44 = vcombine.high %v438_v42, %v438_v42  ;;  %v454_v45 = vrot.slane %v438_v42, %v3207_v41  ;;  %v2885_v48 = vld [vmem:[%s3766_s1 + $0x100] sm:$0xff]  }
   0xd   :  { %2581 = vmatpush3.bf16.msra.mxu1 %v2862_v11  ;;  %v2888_v51 = vld [vmem:[%s3766_s1 + $0x148] sm:$0xff]   ;;  %v2887_v53 = vld [vmem:[%s3766_s1 + $0x180] sm:$0xff]   ;;  %v2892_v57 = vld [vmem:[%s3766_s1 + $0x150] sm:$0xff]  }
   0xe   :  { %2582 = vmatprep.subr.bf16.mxu1 %v2865_v14  ;;  %v447_v46 = vcombine.high %v3211_v43, %v3211_v43  ;;  %v468_v47 = vrot.slane %v446_v44, %v3207_v41  ;;  %v476_v50 = vcombine.high %v454_v45, %v454_v45  ;;  %v2890_v54 = vld [vmem:[%s3766_s1 + $0x1c8] sm:$0xff]   ;;  %v2894_v59 = vld [vmem:[%s3766_s1 + $0x1d0] sm:$0xff]   ;;  %v2896_v61 = vld [vmem:[%s3766_s1 + $0x158] sm:$0xff]  }
   0xf   :  { %2561 = vmatpush3.bf16.msra.mxu0 %v2864_v13  ;;  %v2889_v56 = vld [vmem:[%s3766_s1 + $0x108] sm:$0xff]   ;;  %v2893_v60 = vld [vmem:[%s3766_s1 + $0x110] sm:$0xff]   ;;  %v2898_v63 = vld [vmem:[%s3766_s1 + $0x1d8] sm:$0xff]  }
  0x10   :  { %2562 = vmatprep.subr.bf16.mxu0 %v2867_v16  ;;  %v475_v49 = vrot.slane %v447_v46, %v3207_v41  ;;  %1849 = vmatprep.mubr.bf16.mxu0 %v468_v47  ;;  %v478_v52 = vcombine.high %v468_v47, %v468_v47  ;;  %v2891_v58 = vld [vmem:[%s3766_s1 + $0x188] sm:$0xff]   ;;  %v2895_v62 = vld [vmem:[%s3766_s1 + $0x190] sm:$0xff]   ;;  %v2897_v0 = vld [vmem:[%s3766_s1 + $0x118] sm:$0xff]  }
  0x11   :  { %2583 = vmatpush3.bf16.msra.mxu1 %v2866_v15  ;;  %v2900_v1 = vld [vmem:[%s3766_s1 + $0x160] sm:$0xff]   ;;  %v2899_v2 = vld [vmem:[%s3766_s1 + $0x198] sm:$0xff]   ;;  %v2904_v5 = vld [vmem:[%s3766_s1 + $0x168] sm:$0xff]  }
  0x12   :  { %2584 = vmatprep.subr.bf16.mxu1 %v2869_v18  ;;  %v479_v55 = vcombine.high %v475_v49, %v475_v49  ;;  %1889 = vmatprep.mubr.bf16.mxu1 %v478_v52  ;;  %v2902_v3 = vld [vmem:[%s3766_s1 + $0x1e0] sm:$0xff]   ;;  %v2906_v7 = vld [vmem:[%s3766_s1 + $0x1e8] sm:$0xff]   ;;  %v2908_v9 = vld [vmem:[%s3766_s1 + $0x170] sm:$0xff]  }
  0x13   :  { %2563 = vmatpush3.bf16.msra.mxu0 %v2868_v17  ;;  %v2901_v4 = vld [vmem:[%s3766_s1 + $0x120] sm:$0xff]   ;;  %v2905_v8 = vld [vmem:[%s3766_s1 + $0x128] sm:$0xff]   ;;  %v2910_v11 = vld [vmem:[%s3766_s1 + $0x1f0] sm:$0xff]   ;;  %v461_v17 = vrot.slane %v3211_v43, %v3207_v41 }
  0x14   :  { %2564 = vmatprep.subr.bf16.mxu0 %v2871_v20  ;;  %v2903_v6 = vld [vmem:[%s3766_s1 + $0x1a0] sm:$0xff]   ;;  %v2907_v10 = vld [vmem:[%s3766_s1 + $0x1a8] sm:$0xff]   ;;  %v2909_v12 = vld [vmem:[%s3766_s1 + $0x130] sm:$0xff]  }
  0x15   :  { %2585 = vmatpush3.bf16.msra.mxu1 %v2870_v19  ;;  %v2912_v13 = vld [vmem:[%s3766_s1 + $0x178] sm:$0xff]   ;;  %v2911_v14 = vld [vmem:[%s3766_s1 + $0x1b0] sm:$0xff]   ;;  %v2916_v18 = vld [vmem:[%s3766_s1 + $0x240] sm:$0xff]  }
  0x16   :  { %2586 = vmatprep.subr.bf16.mxu1 %v2873_v22  ;;  %v2914_v15 = vld [vmem:[%s3766_s1 + $0x1f8] sm:$0xff]   ;;  %v2918_v20 = vld [vmem:[%s3766_s1 + $0x2c0] sm:$0xff]   ;;  %v477_v22 = vcombine.high %v461_v17, %v461_v17  ;;  %v2924_v27 = vld [vmem:[%s3766_s1 + $0x250] sm:$0xff]  }
  0x17   :  { %2565 = vmatpush3.bf16.msra.mxu0 %v2872_v21  ;;  %v2913_v16 = vld [vmem:[%s3766_s1 + $0x138] sm:$0xff]   ;;  %v2917_v21 = vld [vmem:[%s3766_s1 + $0x200] sm:$0xff]   ;;  %v2927_v32 = vld [vmem:[%s3766_s1 + $0x290] sm:$0xff]  }
  0x18   :  { %2566 = vmatprep.subr.bf16.mxu0 %v2875_v24  ;;  %v2915_v19 = vld [vmem:[%s3766_s1 + $0x1b8] sm:$0xff]   ;;  %v2919_v24 = vld [vmem:[%s3766_s1 + $0x280] sm:$0xff]   ;;  %v2936_v39 = vld [vmem:[%s3766_s1 + $0x268] sm:$0xff]  }
  0x19   :  { %2587 = vmatpush3.bf16.msra.mxu1 %v2874_v23  ;;  %v2920_v23 = vld [vmem:[%s3766_s1 + $0x248] sm:$0xff]   ;;  %v2930_v33 = vld [vmem:[%s3766_s1 + $0x2d8] sm:$0xff]   ;;  %v2932_v35 = vld [vmem:[%s3766_s1 + $0x260] sm:$0xff]  }
  0x1a   :  { %2588 = vmatprep.subr.bf16.mxu1 %v2877_v26  ;;  %v2921_v26 = vld [vmem:[%s3766_s1 + $0x208] sm:$0xff]   ;;  %v2931_v36 = vld [vmem:[%s3766_s1 + $0x298] sm:$0xff]   ;;  %v2933_v38 = vld [vmem:[%s3766_s1 + $0x220] sm:$0xff]  }
  0x1b   :  { %2567 = vmatpush3.bf16.msra.mxu0 %v2876_v25  ;;  %v2922_v25 = vld [vmem:[%s3766_s1 + $0x2c8] sm:$0xff]   ;;  %v2940_v44 = vld [vmem:[%s3766_s1 + $0x270] sm:$0xff]  }
  0x1c   :  { %2568 = vmatprep.subr.bf16.mxu0 %v2879_v29  ;;  %v2926_v29 = vld [vmem:[%s3766_s1 + $0x2d0] sm:$0xff]   ;;  %v2938_v42 = vld [vmem:[%s3766_s1 + $0x2e8] sm:$0xff]  }
  0x1d   :  { %2589 = vmatpush3.bf16.msra.mxu1 %v2878_v28  ;;  %v2923_v28 = vld [vmem:[%s3766_s1 + $0x288] sm:$0xff]  }
  0x1e   :  { %2590 = vmatprep.subr.bf16.mxu1 %v2881_v31  ;;  %v2928_v31 = vld [vmem:[%s3766_s1 + $0x258] sm:$0xff]   ;;  %v2937_v43 = vld [vmem:[%s3766_s1 + $0x228] sm:$0xff]  }
  0x1f   :  { %2569 = vmatpush3.bf16.msra.mxu0 %v2880_v30  ;;  %v2925_v30 = vld [vmem:[%s3766_s1 + $0x210] sm:$0xff]   ;;  %v2939_v46 = vld [vmem:[%s3766_s1 + $0x2a8] sm:$0xff]  }
  0x20   :  { %2598 = vmatprep.subr.bf16.mxu0 %v2884_v37  ;;  %v2934_v37 = vld [vmem:[%s3766_s1 + $0x2e0] sm:$0xff]  }
  0x21   :  { %2591 = vmatpush3.bf16.msra.mxu1 %v2883_v34  ;;  %v2929_v34 = vld [vmem:[%s3766_s1 + $0x218] sm:$0xff]  }
  0x22   :  { %2620 = vmatprep.subr.bf16.mxu1 %v2886_v40  ;;  %1850 = vmatmul.mubr.bf16.vlgmr.msra.gmra.mrb[0].mxu0 %v454_v45  ;;  %v2935_v40 = vld [vmem:[%s3766_s1 + $0x2a0] sm:$0xff]   ;;  %v17_v45 = vld [vmem:[%s3765_s0 + $0x8] sm:$0xff] }
  0x23   :  { %2599 = vmatpush3.bf16.msra.mxu0 %v2885_v48  ;;  %1929 = vmatprep.mubr.bf16.mxu0 %v475_v49  ;;  %v487_v47 = vrot.slane %v17_v45, %v3207_v41  ;;  %v480_v48 = vcombine.high %v17_v45, %v17_v45  ;;  %v2942_v49 = vld [vmem:[%s3766_s1 + $0x2f0] sm:$0xff]  }
  0x24   :  { %1890 = vmatmul.mubr.bf16.vlgmr.msra.gmra.mrb[0].mxu1 %v476_v50  ;;  %2600 = vmatprep.subr.bf16.mxu0 %v2888_v51  ;;  %v2941_v50 = vld [vmem:[%s3766_s1 + $0x230] sm:$0xff]  }
  0x25   :  { %2621 = vmatpush3.bf16.msra.mxu1 %v2887_v53  ;;  %1969 = vmatprep.mubr.bf16.mxu1 %v479_v55  ;;  %v495_v51 = vcombine.high %v487_v47, %v487_v47  ;;  %v3396_v52 = vrot.slane %v480_v48, %v3207_v41  ;;  %v2944_v53 = vld [vmem:[%s3766_s1 + $0x278] sm:$0xff]   ;;  %v2991_v45 = vld [vmem:[%s3766_s1 + $0x4d0] sm:$0xff]  }
  0x26   :  { %2622 = vmatprep.subr.bf16.mxu1 %v2890_v54  ;;  %v2943_v54 = vld [vmem:[%s3766_s1 + $0x2b0] sm:$0xff]  }
  0x27   :  { %2601 = vmatpush3.bf16.msra.mxu0 %v2889_v56  ;;  %v517_v55 = vrot.slane %v495_v51, %v3207_v41  ;;  %v496_v56 = vcombine.high %v3396_v52, %v3396_v52  ;;  %v2992_v48 = vld [vmem:[%s3766_s1 + $0x490] sm:$0xff]   ;;  %v2997_v51 = vld [vmem:[%s3766_s1 + $0x460] sm:$0xff]  }
  0x28   :  { %2602 = vmatprep.subr.bf16.mxu0 %v2892_v57  ;;  %v2946_v57 = vld [vmem:[%s3766_s1 + $0x2f8] sm:$0xff]  }
  0x29   :  { %2623 = vmatpush3.bf16.msra.mxu1 %v2891_v58  ;;  %v2945_v58 = vld [vmem:[%s3766_s1 + $0x238] sm:$0xff]  }
  0x2a   :  { %2624 = vmatprep.subr.bf16.mxu1 %v2894_v59  ;;  %v527_v59 = vcombine.high %v517_v55, %v517_v55 }
  0x2b   :  { %2603 = vmatpush3.bf16.msra.mxu0 %v2893_v60  ;;  %v503_v60 = vrot.slane %v487_v47, %v3207_v41  ;;  %v2993_v47 = vld [vmem:[%s3766_s1 + $0x458] sm:$0xff]  }
  0x2c   :  { %2604 = vmatprep.subr.bf16.mxu0 %v2896_v61  ;;  %v2948_v61 = vld [vmem:[%s3766_s1 + $0x340] sm:$0xff]  }
  0x2d   :  { %2625 = vmatpush3.bf16.msra.mxu1 %v2895_v62  ;;  %v2947_v62 = vld [vmem:[%s3766_s1 + $0x2b8] sm:$0xff]  }
  0x2e   :  { %2626 = vmatprep.subr.bf16.mxu1 %v2898_v63  ;;  %v524_v63 = vrot.slane %v496_v56, %v3207_v41  ;;  %v3000_v56 = vld [vmem:[%s3766_s1 + $0x4a0] sm:$0xff]  }
  0x2f   :  { %2605 = vmatpush3.bf16.msra.mxu0 %v2897_v0  ;;  %v2950_v0 = vld [vmem:[%s3766_s1 + $0x3c0] sm:$0xff]  }
  0x30   :  { %2606 = vmatprep.subr.bf16.mxu0 %v2900_v1  ;;  %v2949_v1 = vld [vmem:[%s3766_s1 + $0x300] sm:$0xff]  }
  0x31   :  { %2627 = vmatpush3.bf16.msra.mxu1 %v2899_v2  ;;  %v525_v2 = vcombine.high %v503_v60, %v503_v60 }
  0x32   :  { %2628 = vmatprep.subr.bf16.mxu1 %v2902_v3  ;;  %v2952_v3 = vld [vmem:[%s3766_s1 + $0x348] sm:$0xff]  }
  0x33   :  { %2607 = vmatpush3.bf16.msra.mxu0 %v2901_v4  ;;  %v2951_v4 = vld [vmem:[%s3766_s1 + $0x380] sm:$0xff]  }
  0x34   :  { %2608 = vmatprep.subr.bf16.mxu0 %v2904_v5  ;;  %v528_v5 = vcombine.high %v524_v63, %v524_v63 }
  0x35   :  { %2629 = vmatpush3.bf16.msra.mxu1 %v2903_v6  ;;  %v2954_v6 = vld [vmem:[%s3766_s1 + $0x3c8] sm:$0xff]  }
  0x36   :  { %2630 = vmatprep.subr.bf16.mxu1 %v2906_v7  ;;  %v2953_v7 = vld [vmem:[%s3766_s1 + $0x308] sm:$0xff]  }
  0x37   :  { %2609 = vmatpush3.bf16.msra.mxu0 %v2905_v8  ;;  %v2956_v8 = vld [vmem:[%s3766_s1 + $0x350] sm:$0xff]  }
  0x38   :  { %2610 = vmatprep.subr.bf16.mxu0 %v2908_v9  ;;  %v2955_v9 = vld [vmem:[%s3766_s1 + $0x388] sm:$0xff]  }
  0x39   :  { %2631 = vmatpush3.bf16.msra.mxu1 %v2907_v10  ;;  %v2958_v10 = vld [vmem:[%s3766_s1 + $0x3d0] sm:$0xff]  }
  0x3a   :  { %2632 = vmatprep.subr.bf16.mxu1 %v2910_v11  ;;  %v2957_v11 = vld [vmem:[%s3766_s1 + $0x310] sm:$0xff]  }
  0x3b   :  { %2611 = vmatpush3.bf16.msra.mxu0 %v2909_v12  ;;  %v2960_v12 = vld [vmem:[%s3766_s1 + $0x358] sm:$0xff]  }
  0x3c   :  { %2612 = vmatprep.subr.bf16.mxu0 %v2912_v13  ;;  %v2959_v13 = vld [vmem:[%s3766_s1 + $0x390] sm:$0xff]  }
  0x3d   :  { %2633 = vmatpush3.bf16.msra.mxu1 %v2911_v14  ;;  %v2962_v14 = vld [vmem:[%s3766_s1 + $0x3d8] sm:$0xff]  }
  0x3e   :  { %2634 = vmatprep.subr.bf16.mxu1 %v2914_v15  ;;  %v2961_v15 = vld [vmem:[%s3766_s1 + $0x318] sm:$0xff]  }
  0x3f   :  { %2613 = vmatpush3.bf16.msra.mxu0 %v2913_v16  ;;  %v2964_v16 = vld [vmem:[%s3766_s1 + $0x360] sm:$0xff]  }
  0x40   :  { %2642 = vmatprep.subr.bf16.mxu0 %v2916_v18  ;;  %v2966_v18 = vld [vmem:[%s3766_s1 + $0x3e0] sm:$0xff]  }
  0x41   :  { %2635 = vmatpush3.bf16.msra.mxu1 %v2915_v19  ;;  %v2965_v19 = vld [vmem:[%s3766_s1 + $0x320] sm:$0xff]  }
  0x42   :  { %1930 = vmatmul.mubr.bf16.vlgmr.msra.gmra.mrb[4].mxu0 %v461_v17  ;;  %2664 = vmatprep.subr.bf16.mxu1 %v2918_v20  ;;  %v2963_v17 = vld [vmem:[%s3766_s1 + $0x398] sm:$0xff]   ;;  %v2968_v20 = vld [vmem:[%s3766_s1 + $0x368] sm:$0xff]  }
  0x43   :  { %2643 = vmatpush3.bf16.msra.mxu0 %v2917_v21  ;;  %2009 = vmatprep.mubr.bf16.mxu0 %v517_v55  ;;  %v2967_v21 = vld [vmem:[%s3766_s1 + $0x3a0] sm:$0xff]   ;;  %v3001_v55 = vld [vmem:[%s3766_s1 + $0x468] sm:$0xff]  }
  0x44   :  { %1970 = vmatmul.mubr.bf16.vlgmr.msra.gmra.mrb[4].mxu1 %v477_v22  ;;  %2644 = vmatprep.subr.bf16.mxu0 %v2920_v23  ;;  %v2970_v22 = vld [vmem:[%s3766_s1 + $0x3e8] sm:$0xff]  }
  0x45   :  { %2665 = vmatpush3.bf16.msra.mxu1 %v2919_v24  ;;  %2049 = vmatprep.mubr.bf16.mxu1 %v527_v59  ;;  %v2969_v23 = vld [vmem:[%s3766_s1 + $0x328] sm:$0xff]   ;;  %v2972_v24 = vld [vmem:[%s3766_s1 + $0x370] sm:$0xff]  }
  0x46   :  { %2666 = vmatprep.subr.bf16.mxu1 %v2922_v25  ;;  %v2971_v25 = vld [vmem:[%s3766_s1 + $0x3a8] sm:$0xff]   ;;  %v3005_v59 = vld [vmem:[%s3766_s1 + $0x470] sm:$0xff]  }
  0x47   :  { %2645 = vmatpush3.bf16.msra.mxu0 %v2921_v26  ;;  %v2974_v26 = vld [vmem:[%s3766_s1 + $0x3f0] sm:$0xff]  }
  0x48   :  { %2646 = vmatprep.subr.bf16.mxu0 %v2924_v27  ;;  %v2973_v27 = vld [vmem:[%s3766_s1 + $0x330] sm:$0xff]  }
  0x49   :  { %2667 = vmatpush3.bf16.msra.mxu1 %v2923_v28  ;;  %v2976_v28 = vld [vmem:[%s3766_s1 + $0x378] sm:$0xff]  }
  0x4a   :  { %2668 = vmatprep.subr.bf16.mxu1 %v2926_v29  ;;  %v2975_v29 = vld [vmem:[%s3766_s1 + $0x3b0] sm:$0xff]  }
  0x4b   :  { %2647 = vmatpush3.bf16.msra.mxu0 %v2925_v30  ;;  %v2978_v30 = vld [vmem:[%s3766_s1 + $0x3f8] sm:$0xff]  }
  0x4c   :  { %2648 = vmatprep.subr.bf16.mxu0 %v2928_v31  ;;  %v2977_v31 = vld [vmem:[%s3766_s1 + $0x338] sm:$0xff]  }
  0x4d   :  { %2669 = vmatpush3.bf16.msra.mxu1 %v2927_v32  ;;  %v510_v32 = vrot.slane %v3396_v52, %v3207_v41  ;;  %v2996_v52 = vld [vmem:[%s3766_s1 + $0x498] sm:$0xff]  }
  0x4e   :  { %2670 = vmatprep.subr.bf16.mxu1 %v2930_v33  ;;  %v2981_v33 = vld [vmem:[%s3766_s1 + $0x440] sm:$0xff]  }
  0x4f   :  { %2649 = vmatpush3.bf16.msra.mxu0 %v2929_v34  ;;  %v2980_v34 = vld [vmem:[%s3766_s1 + $0x3b8] sm:$0xff]  }
  0x50   :  { %2650 = vmatprep.subr.bf16.mxu0 %v2932_v35  ;;  %v2983_v35 = vld [vmem:[%s3766_s1 + $0x4c0] sm:$0xff]  }
  0x51   :  { %2671 = vmatpush3.bf16.msra.mxu1 %v2931_v36  ;;  %v2982_v36 = vld [vmem:[%s3766_s1 + $0x400] sm:$0xff]  }
  0x52   :  { %2672 = vmatprep.subr.bf16.mxu1 %v2934_v37  ;;  %v526_v37 = vcombine.high %v510_v32, %v510_v32 }
  0x53   :  { %2651 = vmatpush3.bf16.msra.mxu0 %v2933_v38  ;;  %v2985_v38 = vld [vmem:[%s3766_s1 + $0x448] sm:$0xff]  }
  0x54   :  { %2652 = vmatprep.subr.bf16.mxu0 %v2936_v39  ;;  %v2984_v39 = vld [vmem:[%s3766_s1 + $0x480] sm:$0xff]  }
  0x55   :  { %2673 = vmatpush3.bf16.msra.mxu1 %v2935_v40  ;;  %v2987_v40 = vld [vmem:[%s3766_s1 + $0x4c8] sm:$0xff]  }
  0x56   :  { %2674 = vmatprep.subr.bf16.mxu1 %v2938_v42  ;;  %v2986_v42 = vld [vmem:[%s3766_s1 + $0x408] sm:$0xff]  }
  0x57   :  { %2653 = vmatpush3.bf16.msra.mxu0 %v2937_v43  ;;  %v2989_v43 = vld [vmem:[%s3766_s1 + $0x450] sm:$0xff]  }
  0x58   :  { %2654 = vmatprep.subr.bf16.mxu0 %v2940_v44  ;;  %v2988_v44 = vld [vmem:[%s3766_s1 + $0x488] sm:$0xff]  }
  0x59   :  { %2675 = vmatpush3.bf16.msra.mxu1 %v2939_v46  ;;  %v2990_v46 = vld [vmem:[%s3766_s1 + $0x410] sm:$0xff]  }
  0x5a   :  { %2676 = vmatprep.subr.bf16.mxu1 %v2942_v49  ;;  %v2995_v49 = vld [vmem:[%s3766_s1 + $0x4d8] sm:$0xff]  }
  0x5b   :  { %2655 = vmatpush3.bf16.msra.mxu0 %v2941_v50  ;;  %v2994_v50 = vld [vmem:[%s3766_s1 + $0x418] sm:$0xff]  }
  0x5c   :  { %2656 = vmatprep.subr.bf16.mxu0 %v2944_v53  ;;  %v2999_v53 = vld [vmem:[%s3766_s1 + $0x4e0] sm:$0xff]  }
  0x5d   :  { %2677 = vmatpush3.bf16.msra.mxu1 %v2943_v54  ;;  %v2998_v54 = vld [vmem:[%s3766_s1 + $0x420] sm:$0xff]  }
  0x5e   :  { %2678 = vmatprep.subr.bf16.mxu1 %v2946_v57  ;;  %v3003_v57 = vld [vmem:[%s3766_s1 + $0x4e8] sm:$0xff]  }
  0x5f   :  { %2657 = vmatpush3.bf16.msra.mxu0 %v2945_v58  ;;  %v3002_v58 = vld [vmem:[%s3766_s1 + $0x428] sm:$0xff]  }
  0x60   :  { %2686 = vmatprep.subr.bf16.mxu0 %v2948_v61  ;;  %v3004_v61 = vld [vmem:[%s3766_s1 + $0x4a8] sm:$0xff]  }
  0x61   :  { %2679 = vmatpush3.bf16.msra.mxu1 %v2947_v62 }
  0x62   :  { %2010 = vmatmul.mubr.bf16.vlgmr.msra.gmra.mrb[8].mxu0 %v503_v60  ;;  %2708 = vmatprep.subr.bf16.mxu1 %v2950_v0  ;;  %v18_v60 = vld [vmem:[%s3765_s0 + $0x10] sm:$0xff] }
  0x63   :  { %2687 = vmatpush3.bf16.msra.mxu0 %v2949_v1  ;;  %2089 = vmatprep.mubr.bf16.mxu0 %v524_v63  ;;  %v536_v62 = vrot.slane %v18_v60, %v3207_v41  ;;  %v529_v63 = vcombine.high %v18_v60, %v18_v60  ;;  %v3007_v0 = vld [vmem:[%s3766_s1 + $0x4f0] sm:$0xff]  }
  0x64   :  { %2050 = vmatmul.mubr.bf16.vlgmr.msra.gmra.mrb[8].mxu1 %v525_v2  ;;  %2688 = vmatprep.subr.bf16.mxu0 %v2952_v3  ;;  %v3006_v1 = vld [vmem:[%s3766_s1 + $0x430] sm:$0xff]  }
  0x65   :  { %2709 = vmatpush3.bf16.msra.mxu1 %v2951_v4  ;;  %2129 = vmatprep.mubr.bf16.mxu1 %v528_v5  ;;  %v544_v2 = vcombine.high %v536_v62, %v536_v62  ;;  %v3602_v3 = vrot.slane %v529_v63, %v3207_v41  ;;  %v3009_v4 = vld [vmem:[%s3766_s1 + $0x478] sm:$0xff]   ;;  %v3008_v5 = vld [vmem:[%s3766_s1 + $0x4b0] sm:$0xff]  }
  0x66   :  { %2710 = vmatprep.subr.bf16.mxu1 %v2954_v6 }
  0x67   :  { %2689 = vmatpush3.bf16.msra.mxu0 %v2953_v7  ;;  %v566_v6 = vrot.slane %v544_v2, %v3207_v41  ;;  %v545_v7 = vcombine.high %v3602_v3, %v3602_v3 }
  0x68   :  { %2690 = vmatprep.subr.bf16.mxu0 %v2956_v8  ;;  %v3011_v8 = vld [vmem:[%s3766_s1 + $0x4f8] sm:$0xff]  }
  0x69   :  { %2711 = vmatpush3.bf16.msra.mxu1 %v2955_v9  ;;  %v3010_v9 = vld [vmem:[%s3766_s1 + $0x438] sm:$0xff]  }
  0x6a   :  { %2712 = vmatprep.subr.bf16.mxu1 %v2958_v10  ;;  %v576_v10 = vcombine.high %v566_v6, %v566_v6 }
  0x6b   :  { %2691 = vmatpush3.bf16.msra.mxu0 %v2957_v11  ;;  %v552_v11 = vrot.slane %v536_v62, %v3207_v41 }
  0x6c   :  { %2692 = vmatprep.subr.bf16.mxu0 %v2960_v12  ;;  %v3013_v12 = vld [vmem:[%s3766_s1 + $0x540] sm:$0xff]  }
  0x6d   :  { %2713 = vmatpush3.bf16.msra.mxu1 %v2959_v13  ;;  %v3012_v13 = vld [vmem:[%s3766_s1 + $0x4b8] sm:$0xff]  }
  0x6e   :  { %2714 = vmatprep.subr.bf16.mxu1 %v2962_v14  ;;  %v573_v14 = vrot.slane %v545_v7, %v3207_v41 }
  0x6f   :  { %2693 = vmatpush3.bf16.msra.mxu0 %v2961_v15  ;;  %v3015_v15 = vld [vmem:[%s3766_s1 + $0x5c0] sm:$0xff]  }
  0x70   :  { %2694 = vmatprep.subr.bf16.mxu0 %v2964_v16  ;;  %v3014_v16 = vld [vmem:[%s3766_s1 + $0x500] sm:$0xff]  }
  0x71   :  { %2715 = vmatpush3.bf16.msra.mxu1 %v2963_v17  ;;  %v574_v17 = vcombine.high %v552_v11, %v552_v11 }
  0x72   :  { %2716 = vmatprep.subr.bf16.mxu1 %v2966_v18  ;;  %v3017_v18 = vld [vmem:[%s3766_s1 + $0x548] sm:$0xff]  }
  0x73   :  { %2695 = vmatpush3.bf16.msra.mxu0 %v2965_v19  ;;  %v3016_v19 = vld [vmem:[%s3766_s1 + $0x580] sm:$0xff]  }
  0x74   :  { %2696 = vmatprep.subr.bf16.mxu0 %v2968_v20  ;;  %v577_v20 = vcombine.high %v573_v14, %v573_v14 }
  0x75   :  { %2717 = vmatpush3.bf16.msra.mxu1 %v2967_v21  ;;  %v3019_v21 = vld [vmem:[%s3766_s1 + $0x5c8] sm:$0xff]  }
  0x76   :  { %2718 = vmatprep.subr.bf16.mxu1 %v2970_v22  ;;  %v3018_v22 = vld [vmem:[%s3766_s1 + $0x508] sm:$0xff]  }
  0x77   :  { %2697 = vmatpush3.bf16.msra.mxu0 %v2969_v23  ;;  %v3021_v23 = vld [vmem:[%s3766_s1 + $0x550] sm:$0xff]  }
  0x78   :  { %2698 = vmatprep.subr.bf16.mxu0 %v2972_v24  ;;  %v3020_v24 = vld [vmem:[%s3766_s1 + $0x588] sm:$0xff]  }
  0x79   :  { %2719 = vmatpush3.bf16.msra.mxu1 %v2971_v25  ;;  %v3023_v25 = vld [vmem:[%s3766_s1 + $0x5d0] sm:$0xff]  }
  0x7a   :  { %2720 = vmatprep.subr.bf16.mxu1 %v2974_v26  ;;  %v3022_v26 = vld [vmem:[%s3766_s1 + $0x510] sm:$0xff]  }
  0x7b   :  { %2699 = vmatpush3.bf16.msra.mxu0 %v2973_v27  ;;  %v3025_v27 = vld [vmem:[%s3766_s1 + $0x558] sm:$0xff]  }
  0x7c   :  { %2700 = vmatprep.subr.bf16.mxu0 %v2976_v28  ;;  %v3024_v28 = vld [vmem:[%s3766_s1 + $0x590] sm:$0xff]  }
  0x7d   :  { %2721 = vmatpush3.bf16.msra.mxu1 %v2975_v29  ;;  %v3027_v29 = vld [vmem:[%s3766_s1 + $0x5d8] sm:$0xff]  }
  0x7e   :  { %2722 = vmatprep.subr.bf16.mxu1 %v2978_v30  ;;  %v3026_v30 = vld [vmem:[%s3766_s1 + $0x518] sm:$0xff]  }
  0x7f   :  { %2701 = vmatpush3.bf16.msra.mxu0 %v2977_v31  ;;  %v3029_v31 = vld [vmem:[%s3766_s1 + $0x560] sm:$0xff]  }
  0x80   :  { %2730 = vmatprep.subr.bf16.mxu0 %v2981_v33  ;;  %v3031_v33 = vld [vmem:[%s3766_s1 + $0x5e0] sm:$0xff]  }
  0x81   :  { %2723 = vmatpush3.bf16.msra.mxu1 %v2980_v34  ;;  %v3030_v34 = vld [vmem:[%s3766_s1 + $0x520] sm:$0xff]  }
  0x82   :  { %2090 = vmatmul.mubr.bf16.vlgmr.msra.gmra.mrb[12].mxu0 %v510_v32  ;;  %2752 = vmatprep.subr.bf16.mxu1 %v2983_v35  ;;  %v3028_v32 = vld [vmem:[%s3766_s1 + $0x598] sm:$0xff]   ;;  %v3033_v35 = vld [vmem:[%s3766_s1 + $0x568] sm:$0xff]  }
  0x83   :  { %2731 = vmatpush3.bf16.msra.mxu0 %v2982_v36  ;;  %2169 = vmatprep.mubr.bf16.mxu0 %v566_v6  ;;  %v3032_v36 = vld [vmem:[%s3766_s1 + $0x5a0] sm:$0xff]  }
  0x84   :  { %2130 = vmatmul.mubr.bf16.vlgmr.msra.gmra.mrb[12].mxu1 %v526_v37  ;;  %2732 = vmatprep.subr.bf16.mxu0 %v2985_v38  ;;  %v3035_v37 = vld [vmem:[%s3766_s1 + $0x5e8] sm:$0xff]  }
  0x85   :  { %2753 = vmatpush3.bf16.msra.mxu1 %v2984_v39  ;;  %2209 = vmatprep.mubr.bf16.mxu1 %v576_v10  ;;  %v3034_v38 = vld [vmem:[%s3766_s1 + $0x528] sm:$0xff]   ;;  %v3037_v39 = vld [vmem:[%s3766_s1 + $0x570] sm:$0xff]  }
  0x86   :  { %2754 = vmatprep.subr.bf16.mxu1 %v2987_v40  ;;  %v3036_v40 = vld [vmem:[%s3766_s1 + $0x5a8] sm:$0xff]  }
  0x87   :  { %2733 = vmatpush3.bf16.msra.mxu0 %v2986_v42  ;;  %v3039_v42 = vld [vmem:[%s3766_s1 + $0x5f0] sm:$0xff]  }
  0x88   :  { %2734 = vmatprep.subr.bf16.mxu0 %v2989_v43  ;;  %v3038_v43 = vld [vmem:[%s3766_s1 + $0x530] sm:$0xff]  }
  0x89   :  { %2755 = vmatpush3.bf16.msra.mxu1 %v2988_v44  ;;  %v3041_v44 = vld [vmem:[%s3766_s1 + $0x578] sm:$0xff]  }
  0x8a   :  { %2756 = vmatprep.subr.bf16.mxu1 %v2991_v45  ;;  %v3040_v45 = vld [vmem:[%s3766_s1 + $0x5b0] sm:$0xff]  }
  0x8b   :  { %2735 = vmatpush3.bf16.msra.mxu0 %v2990_v46  ;;  %v3043_v46 = vld [vmem:[%s3766_s1 + $0x5f8] sm:$0xff]  }
  0x8c   :  { %2736 = vmatprep.subr.bf16.mxu0 %v2993_v47  ;;  %v3042_v47 = vld [vmem:[%s3766_s1 + $0x538] sm:$0xff]  }
  0x8d   :  { %2757 = vmatpush3.bf16.msra.mxu1 %v2992_v48  ;;  %v559_v48 = vrot.slane %v3602_v3, %v3207_v41 }
  0x8e   :  { %2758 = vmatprep.subr.bf16.mxu1 %v2995_v49  ;;  %v3045_v49 = vld [vmem:[%s3766_s1 + $0x5b8] sm:$0xff]  }
  0x8f   :  { %2737 = vmatpush3.bf16.msra.mxu0 %v2994_v50  ;;  %v3046_v50 = vld [vmem:[%s3766_s1 + $0x600] sm:$0xff]  }
  0x90   :  { %2738 = vmatprep.subr.bf16.mxu0 %v2997_v51 }
  0x91   :  { %2759 = vmatpush3.bf16.msra.mxu1 %v2996_v52 }
  0x92   :  { %2760 = vmatprep.subr.bf16.mxu1 %v2999_v53 }
  0x93   :  { %2739 = vmatpush3.bf16.msra.mxu0 %v2998_v54 }
  0x94   :  { %2740 = vmatprep.subr.bf16.mxu0 %v3001_v55 }
  0x95   :  { %2761 = vmatpush3.bf16.msra.mxu1 %v3000_v56 }
  0x96   :  { %2762 = vmatprep.subr.bf16.mxu1 %v3003_v57 }
  0x97   :  { %2741 = vmatpush3.bf16.msra.mxu0 %v3002_v58 }
  0x98   :  { %2742 = vmatprep.subr.bf16.mxu0 %v3005_v59 }
  0x99   :  { %2763 = vmatpush3.bf16.msra.mxu1 %v3004_v61 }
  0x9a   :  { %2764 = vmatprep.subr.bf16.mxu1 %v3007_v0 }
  0x9b   :  { %2743 = vmatpush3.bf16.msra.mxu0 %v3006_v1 }
  0x9c   :  { %2744 = vmatprep.subr.bf16.mxu0 %v3009_v4 }
  0x9d   :  { %2765 = vmatpush3.bf16.msra.mxu1 %v3008_v5 }
  0x9e   :  { %2766 = vmatprep.subr.bf16.mxu1 %v3011_v8 }
  0x9f   :  { %2745 = vmatpush3.bf16.msra.mxu0 %v3010_v9 }
  0xa0   :  { %2774 = vmatprep.subr.bf16.mxu0 %v3013_v12 }
  0xa1   :  { %2767 = vmatpush3.bf16.msra.mxu1 %v3012_v13 }
  0xa2   :  { %2170 = vmatmul.mubr.bf16.vlgmr.msra.gmra.mrb[16].mxu0 %v552_v11  ;;  %2796 = vmatprep.subr.bf16.mxu1 %v3015_v15 }
  0xa3   :  { %2775 = vmatpush3.bf16.msra.mxu0 %v3014_v16  ;;  %2249 = vmatprep.mubr.bf16.mxu0 %v573_v14 }
  0xa4   :  { %2210 = vmatmul.mubr.bf16.vlgmr.msra.gmra.mrb[16].mxu1 %v574_v17  ;;  %2776 = vmatprep.subr.bf16.mxu0 %v3017_v18 }
  0xa5   :  { %2797 = vmatpush3.bf16.msra.mxu1 %v3016_v19  ;;  %2289 = vmatprep.mubr.bf16.mxu1 %v577_v20 }
  0xa6   :  { %2798 = vmatprep.subr.bf16.mxu1 %v3019_v21 }
  0xa7   :  { %2777 = vmatpush3.bf16.msra.mxu0 %v3018_v22 }
  0xa8   :  { %2778 = vmatprep.subr.bf16.mxu0 %v3021_v23 }
  0xa9   :  { %2799 = vmatpush3.bf16.msra.mxu1 %v3020_v24 }
  0xaa   :  { %2800 = vmatprep.subr.bf16.mxu1 %v3023_v25 }
  0xab   :  { %2779 = vmatpush3.bf16.msra.mxu0 %v3022_v26 }
  0xac   :  { %2780 = vmatprep.subr.bf16.mxu0 %v3025_v27 }
  0xad   :  { %2801 = vmatpush3.bf16.msra.mxu1 %v3024_v28 }
  0xae   :  { %2802 = vmatprep.subr.bf16.mxu1 %v3027_v29 }
  0xaf   :  { %2781 = vmatpush3.bf16.msra.mxu0 %v3026_v30 }
  0xb0   :  { %2782 = vmatprep.subr.bf16.mxu0 %v3029_v31 }
  0xb1   :  { %2803 = vmatpush3.bf16.msra.mxu1 %v3028_v32 }
  0xb2   :  { %2804 = vmatprep.subr.bf16.mxu1 %v3031_v33 }
  0xb3   :  { %2783 = vmatpush3.bf16.msra.mxu0 %v3030_v34 }
  0xb4   :  { %2784 = vmatprep.subr.bf16.mxu0 %v3033_v35 }
  0xb5   :  { %2805 = vmatpush3.bf16.msra.mxu1 %v3032_v36 }
  0xb6   :  { %2806 = vmatprep.subr.bf16.mxu1 %v3035_v37 }
  0xb7   :  { %2785 = vmatpush3.bf16.msra.mxu0 %v3034_v38 }
  0xb8   :  { %2786 = vmatprep.subr.bf16.mxu0 %v3037_v39 }
  0xb9   :  { %2807 = vmatpush3.bf16.msra.mxu1 %v3036_v40 }
  0xba   :  { %2808 = vmatprep.subr.bf16.mxu1 %v3039_v42 }
  0xbb   :  { %2787 = vmatpush3.bf16.msra.mxu0 %v3038_v43 }
  0xbc   :  { %2788 = vmatprep.subr.bf16.mxu0 %v3041_v44 }
  0xbd   :  { %2809 = vmatpush3.bf16.msra.mxu1 %v3040_v45 }
  0xbe   :  { %2810 = vmatprep.subr.bf16.mxu1 %v3043_v46 }
  0xbf   :  { %2789 = vmatpush3.bf16.msra.mxu0 %v3042_v47 }
  0xc0   :  { %8 = vsyncpa [#allocation3], 0  ;;  %v3079_v51 = vmov 0.0   ;;  %v575_v52 = vcombine.high %v559_v48, %v559_v48  ;;  %v3047_v53 = vld [vmem:[%s3766_s1 + $0x608] sm:$0xff]   ;;  %vm3080_vm0 = vmmov 0   ;;  %v3048_v54 = vld [vmem:[%s3766_s1 + $0x610] sm:$0xff]  }
  0xc1   :  { %2827 = vmatprep.subr.bf16.mxu0 %v3079_v51  ;;  %2811 = vmatpush3.bf16.msra.mxu1 %v3045_v49  ;;  %v3049_v55 = vld [vmem:[%s3766_s1 + $0x618] sm:$0xff]   ;;  %v3050_v56 = vld [vmem:[%s3766_s1 + $0x620] sm:$0xff]   ;;  %v3051_v57 = vld [vmem:[%s3766_s1 + $0x628] sm:$0xff]  }
  0xc2   :  { %2250 = vmatmul.mubr.bf16.vlgmr.msra.gmra.mrb[20].mxu0 %v559_v48  ;;  %v3052_v58 = vld [vmem:[%s3766_s1 + $0x630] sm:$0xff]   ;;  %v3053_v59 = vld [vmem:[%s3766_s1 + $0x638] sm:$0xff]   ;;  %v2352_v63 = vld [vmem:[%s3767_s2] ss:$0 sm:$0xff] }
  0xc3   :  { %2828 = vmatpush3.bf16.msra.mxu0 %v3046_v50  ;;  %2843 = vmatprep.mubr.msk.bf16.mxu0 %vm3080_vm0, %v3079_v51  ;;  %v2353_v60 = vld.sshfl [vmem:[%s3765_s0 + $0x18] sm:$0x1 pattern:$0x75316420]  ;;  %s3081_s0 = smov [#allocation2]  }
  0xc4   :  { %2290 = vmatmul.mubr.bf16.vlgmr.msra.gmra.mrb[20].mxu1 %v575_v52  ;;  %2829 = vmatprep.subr.bf16.mxu0 %v3079_v51  ;;  %v591_v61 = vrot.slane %v2353_v60, %v3207_v41  ;;  %s2344_s1 = sshll.u32 %s3081_s0, 4  ;;  %s2345_s1 = int_to_ptr.vmem [resolvable:$true] %s2344_s1 }
  0xc5   :  { %s3054_s2 = scalar_lea.vmem %s2345_s1, 32  ;;  %p3059_p1 = scmp.lt.s32.totalorder %s2345_s1, %s2345_s1 }
  0xc6   :  { %p3055_p0 = scmp.ne.s32.totalorder %s2345_s1, %s3054_s2  ;;  %p3060_p2 = scmp.lt.s32.totalorder %s3054_s2, %s3054_s2 }
  0xc7   :  { %2830 = vmatpush3.bf16.msra.mxu0 %v3047_v53 }
  0xc8   :  { %2831 = vmatprep.subr.bf16.mxu0 %v3079_v51  ;;  %p3061_p3 = por %p3060_p2, %p3059_p1 }
  0xca   :  { %p3062_p4 = pnand %p3061_p3, %p3055_p0 }
  0xcb   :  { %2832 = vmatpush3.bf16.msra.mxu0 %v3048_v54 }
  0xcc   :  { %2833 = vmatprep.subr.bf16.mxu0 %v3079_v51 }
  0xcf   :  { %2834 = vmatpush3.bf16.msra.mxu0 %v3049_v55 }
  0xd0   :  { %2835 = vmatprep.subr.bf16.mxu0 %v3079_v51 }
  0xd3   :  { %2836 = vmatpush3.bf16.msra.mxu0 %v3050_v56 }
  0xd4   :  { %2837 = vmatprep.subr.bf16.mxu0 %v3079_v51 }
  0xd7   :  { %2838 = vmatpush3.bf16.msra.mxu0 %v3051_v57 }
  0xd8   :  { %2839 = vmatprep.subr.bf16.mxu0 %v3079_v51 }
  0xdb   :  { %2840 = vmatpush3.bf16.msra.mxu0 %v3052_v58 }
  0xdc   :  { %2841 = vmatprep.subr.bf16.mxu0 %v3079_v51 }
  0xdf   :  { %2842 = vmatpush3.bf16.msra.mxu0 %v3053_v59 }
  0xe2   :  { %2844 = vmatmul.mubr.bf16.vlgmr.msra.gmra.mrb[24].mxu0 %v591_v61 }
  0xf5   :  { %v2570_v62 = vpop.f32.mrb[0].mxu0 }
  0xf6   :  { %v2571_v0 = vpop.f32.mrb[1].mxu0 }
  0xf7   :  { %v2572_v1 = vadd.f32 %v2571_v0, %v2570_v62  ;;  %v2573_v2 = vpop.f32.mrb[2].mxu0  ;;  %v2592_v3 = vpop.f32.mrb[0].mxu1 }
  0xf8   :  { %v2574_v4 = vpop.f32.mrb[3].mxu0  ;;  %v2593_v5 = vpop.f32.mrb[1].mxu1 }
  0xf9   :  { %v1852_v6 = vadd.f32 %v2572_v1, %v2352_v63  ;;  %v2594_v7 = vadd.f32 %v2593_v5, %v2592_v3  ;;  %v2595_v8 = vpop.f32.mrb[2].mxu1 }
  0xfa   :  { %v2596_v9 = vpop.f32.mrb[3].mxu1 }
  0xfb   :  { %v1892_v10 = vadd.f32 %v2594_v7, %v1852_v6 }
 0x115   :  { %v2614_v11 = vpop.f32.mrb[4].mxu0 }
 0x116   :  { %v2615_v41 = vpop.f32.mrb[5].mxu0 }
 0x117   :  { %v2616_v12 = vadd.f32 %v2615_v41, %v2614_v11  ;;  %v2617_v13 = vpop.f32.mrb[6].mxu0  ;;  %v2636_v14 = vpop.f32.mrb[4].mxu1 }
 0x118   :  { %v2618_v15 = vpop.f32.mrb[7].mxu0  ;;  %v2637_v16 = vpop.f32.mrb[5].mxu1 }
 0x119   :  { %v1932_v17 = vadd.f32 %v2616_v12, %v1892_v10  ;;  %v2638_v18 = vadd.f32 %v2637_v16, %v2636_v14  ;;  %v2639_v19 = vpop.f32.mrb[6].mxu1 }
 0x11a   :  { %v2640_v20 = vpop.f32.mrb[7].mxu1 }
 0x11b   :  { %v1972_v21 = vadd.f32 %v2638_v18, %v1932_v17 }
 0x135   :  { %v2658_v22 = vpop.f32.mrb[8].mxu0 }
 0x136   :  { %v2659_v23 = vpop.f32.mrb[9].mxu0 }
 0x137   :  { %v2660_v24 = vadd.f32 %v2659_v23, %v2658_v22  ;;  %v2661_v25 = vpop.f32.mrb[10].mxu0  ;;  %v2680_v26 = vpop.f32.mrb[8].mxu1 }
 0x138   :  { %v2662_v27 = vpop.f32.mrb[11].mxu0  ;;  %v2681_v28 = vpop.f32.mrb[9].mxu1 }
 0x139   :  { %v2012_v29 = vadd.f32 %v2660_v24, %v1972_v21  ;;  %v2682_v30 = vadd.f32 %v2681_v28, %v2680_v26  ;;  %v2683_v31 = vpop.f32.mrb[10].mxu1 }
 0x13a   :  { %v2684_v32 = vpop.f32.mrb[11].mxu1 }
 0x13b   :  { %v2052_v33 = vadd.f32 %v2682_v30, %v2012_v29 }
 0x155   :  { %v2702_v34 = vpop.f32.mrb[12].mxu0 }
 0x156   :  { %v2703_v35 = vpop.f32.mrb[13].mxu0 }
 0x157   :  { %v2704_v36 = vadd.f32 %v2703_v35, %v2702_v34  ;;  %v2705_v37 = vpop.f32.mrb[14].mxu0  ;;  %v2724_v38 = vpop.f32.mrb[12].mxu1 }
 0x158   :  { %v2706_v39 = vpop.f32.mrb[15].mxu0  ;;  %v2725_v40 = vpop.f32.mrb[13].mxu1 }
 0x159   :  { %v2092_v42 = vadd.f32 %v2704_v36, %v2052_v33  ;;  %v2726_v43 = vadd.f32 %v2725_v40, %v2724_v38  ;;  %v2727_v44 = vpop.f32.mrb[14].mxu1 }
 0x15a   :  { %v2728_v45 = vpop.f32.mrb[15].mxu1 }
 0x15b   :  { %v2132_v46 = vadd.f32 %v2726_v43, %v2092_v42 }
 0x175   :  { %v2746_v47 = vpop.f32.mrb[16].mxu0 }
 0x176   :  { %v2747_v48 = vpop.f32.mrb[17].mxu0 }
 0x177   :  { %v2748_v49 = vadd.f32 %v2747_v48, %v2746_v47  ;;  %v2749_v50 = vpop.f32.mrb[18].mxu0  ;;  %v2768_v51 = vpop.f32.mrb[16].mxu1 }
 0x178   :  { %v2750_v52 = vpop.f32.mrb[19].mxu0  ;;  %v2769_v53 = vpop.f32.mrb[17].mxu1 }
 0x179   :  { %v2172_v54 = vadd.f32 %v2748_v49, %v2132_v46  ;;  %v2770_v55 = vadd.f32 %v2769_v53, %v2768_v51  ;;  %v2771_v56 = vpop.f32.mrb[18].mxu1 }
 0x17a   :  { %v2772_v57 = vpop.f32.mrb[19].mxu1 }
 0x17b   :  { %v2212_v58 = vadd.f32 %v2770_v55, %v2172_v54 }
 0x195   :  { %v2790_v59 = vpop.f32.mrb[20].mxu0 }
 0x196   :  { %v2791_v60 = vpop.f32.mrb[21].mxu0 }
 0x197   :  { %v2792_v61 = vadd.f32 %v2791_v60, %v2790_v59  ;;  %v2793_v62 = vpop.f32.mrb[22].mxu0  ;;  %v2812_v63 = vpop.f32.mrb[20].mxu1 }
 0x198   :  { %v2794_v0 = vpop.f32.mrb[23].mxu0  ;;  %v2813_v1 = vpop.f32.mrb[21].mxu1 }
 0x199   :  { %v2252_v2 = vadd.f32 %v2792_v61, %v2212_v58  ;;  %v2814_v3 = vadd.f32 %v2813_v1, %v2812_v63  ;;  %v2815_v4 = vpop.f32.mrb[22].mxu1 }
 0x19a   :  { %v2816_v5 = vpop.f32.mrb[23].mxu1 }
 0x19b   :  { %v2292_v6 = vadd.f32 %v2814_v3, %v2252_v2 }
 0x1b5   :  { %v2331_v7 = vpop.f32.mrb[24].mxu0 }
 0x1b6   :  { %v2332_v8 = vadd.f32 %v2331_v7, %v2292_v6  ;;  %v2845_v9 = vpop.f32.mrb[25].mxu0 }
 0x1b7   :  { %v2334_v10 = vpop.f32.mrb[26].mxu0 }
 0x1b8   :  { %2337 = vst [vmem:[#allocation2] sm:$0x3] %v2332_v8  ;;  %v2846_v11 = vpop.f32.mrb[27].mxu0 }
 0x1b9   :  { %3065 = shalt.err (!%p3062_p4)
}
 0x1ba   :  { %s3066_s19 = scalar_lea.hbm %s3768_s3, 32 }
 0x1bb   :  { %p3067_p5 = scmp.ne.s32.totalorder %s3768_s3, %s3066_s19  ;;  %p3070_p6 = scmp.lt.u32.totalorder %s3066_s19, %s3768_s3 }
 0x1bd   :  { %p3072_p7 = pnand %p3070_p6, %p3067_p5 }
 0x1bf   :  { %3075 = shalt.err (!%p3072_p7)
}
 0x1c0   :  { %2347 = dma.vmem_to_hbm [thread:$0]  %s2345_s1, 32, %s3768_s3, [#allocation3]  }
 0x1c1   :  { %3076 = dma.done.wait [#allocation3], 32  }
 0x1c2   :  { %3077 = vsyncadd [#allocation3], 4294967264 }
 0x1c3   :  { %2351 = vsyncpa [#allocation3], 1 }

</bundles_post_ra>
